<compile_context>
chip_gen: v7x
topology: tpu7x:2x2x1
jax: 0.10.0
libtpu: 0.0.40
codegen_flags: <defaults>
</compile_context>

<pallas_src>
import numpy as np

import jax
import jax.numpy as jnp
from jax.experimental import pallas as pl
from jax.experimental.pallas import tpu as pltpu


# ---------------------------------------------------------------------------
# trace-time constant builders (numpy -> baked into the jitted program)
# ---------------------------------------------------------------------------
def _row_pick(n_blk, rows_out, rows_in, src_of):
    """(n_blk*rows_out, n_blk*rows_in) 0/1 matrix.  Left-multiplying an
    activation whose rows are laid out in `n_blk` blocks of `rows_in` picks,
    per block, input row `src_of(r)` into output row r."""
    m = np.zeros((n_blk * rows_out, n_blk * rows_in), np.float32)
    for n in range(n_blk):
        for r in range(rows_out):
            m[n * rows_out + r, n * rows_in + src_of(r)] = 1.0
    return m


def _col_pick(n_blk, cols_in, cols_out, odd):
    """(n_blk*cols_in, n_blk*cols_out) 0/1 matrix.  Right-multiplying picks,
    per channel block of width `cols_in`, input column 2*p+odd -> column p."""
    m = np.zeros((n_blk * cols_in, n_blk * cols_out), np.float32)
    for c in range(n_blk):
        for p in range(cols_out):
            m[c * cols_in + 2 * p + odd, c * cols_out + p] = 1.0
    return m


def _pick_batch_tile(n):
    """Batch-tile so selection constants stay small; grid shards over it."""
    if n <= 16:
        return n
    for nb in (16, 8):
        if n % nb == 0:
            return nb
    return n  # fall back to a single block


# ---------------------------------------------------------------------------
# Fused forward kernel: conv1 -> pool -> conv2 -> pool -> fc1 -> fc2 -> fc3
# ---------------------------------------------------------------------------
def _cnn_kernel(x_ref, g1_ref, w1_ref, b1_ref, r1_ref, c1_ref,
                g2_ref, w2_ref, b2_ref, r2_ref, c2_ref,
                fs_ref, fw1_ref, fb1_ref, fw2_ref, fb2_ref, fw3_ref, fb3_ref,
                o_ref):
    f32 = jnp.float32
    bf16 = jnp.bfloat16

    def mm(a, b):                      # f32 gather / pooling-selection matmul
        return jnp.dot(a, b, preferred_element_type=f32)

    def mmb(a, b):                     # bf16-operand MXU matmul, f32 accumulate
        return jnp.dot(a.astype(bf16), b, preferred_element_type=f32)

    def maxpool(a, r_ref, c_ref):
        # rows = (n, h) blocks, lanes = (c, w) blocks; 2x2 stride-2 max pool.
        rmax = jnp.maximum(mm(r_ref[0], a), mm(r_ref[1], a))
        return jnp.maximum(mm(rmax, c_ref[0]), mm(rmax, c_ref[1]))

    x = x_ref[...]                                     # (nb*32, 96)  rows=(n,h) lanes=(ic,w)

    # ---- conv1 (5x5, 3->6) + bias + ReLU: rows=(n,oh)=nb*28, lanes=(oc,ow)=168
    acc = mmb(mm(g1_ref[0], x), w1_ref[0])
    for ki in range(1, 5):
        acc = acc + mmb(mm(g1_ref[ki], x), w1_ref[ki])
    a1 = jnp.maximum(acc + b1_ref[...], 0.0)
    a1 = maxpool(a1, r1_ref, c1_ref)                   # (nb*14, 84)

    # ---- conv2 (5x5, 6->16) + bias + ReLU: rows=nb*10, lanes=(oc,ow)=160
    acc = mmb(mm(g2_ref[0], a1), w2_ref[0])
    for ki in range(1, 5):
        acc = acc + mmb(mm(g2_ref[ki], a1), w2_ref[ki])
    a2 = jnp.maximum(acc + b2_ref[...], 0.0)
    a2 = maxpool(a2, r2_ref, c2_ref)                   # (nb*5, 80)

    # ---- fc1 (16*5*5 -> 120) + ReLU, consuming one pooled row h at a time
    acc = mmb(mm(fs_ref[0], a2), fw1_ref[0])
    for h in range(1, 5):
        acc = acc + mmb(mm(fs_ref[h], a2), fw1_ref[h])
    f1 = jnp.maximum(acc + fb1_ref[...], 0.0)          # (nb, 120)

    # ---- fc2 (120 -> 85) + ReLU, fc3 (85 -> 10)
    f2 = jnp.maximum(mmb(f1, fw2_ref[...]) + fb2_ref[...], 0.0)
    o_ref[...] = (mmb(f2, fw3_ref[...]) + fb3_ref[...]).astype(o_ref.dtype)


# ---------------------------------------------------------------------------
# Parameter preparation (hoisted: call once, reuse for every forward)
# ---------------------------------------------------------------------------
def prepare_params(params):
    bf16 = jnp.bfloat16
    f32 = jnp.float32

    def banded(w, in_w, out_w):
        # W~[ki, ic*in_w + iw, oc*out_w + ow] = w[oc, ic, ki, iw - ow] (band of width 5)
        oc, ic, kh, kw = w.shape
        basis = np.zeros((kw, in_w, out_w), np.float32)
        for kj in range(kw):
            for ow in range(out_w):
                basis[kj, ow + kj, ow] = 1.0
        m = jnp.einsum('ocbd,dxy->bcxoy', w, jnp.asarray(basis))
        return m.reshape(kh, ic * in_w, oc * out_w)

    fw1 = params['fc1_w'].reshape(120, 16, 5, 5).transpose(2, 1, 3, 0).reshape(5, 80, 120)
    return {
        'w1b': banded(params['conv1_w'], 32, 28).astype(bf16),   # (5, 96, 168)
        'b1': jnp.repeat(params['conv1_b'], 28).reshape(1, 168).astype(f32),
        'w2b': banded(params['conv2_w'], 14, 10).astype(bf16),   # (5, 84, 160)
        'b2': jnp.repeat(params['conv2_b'], 10).reshape(1, 160).astype(f32),
        'fw1': fw1.astype(bf16),                                 # (5, 80, 120)
        'fb1': params['fc1_b'].reshape(1, 120).astype(f32),
        'fw2': params['fc2_w'].T.astype(bf16),                   # (120, 85)
        'fb2': params['fc2_b'].reshape(1, 85).astype(f32),
        'fw3': params['fc3_w'].T.astype(bf16),                   # (85, 10)
        'fb3': params['fc3_b'].reshape(1, 10).astype(f32),
    }


# ---------------------------------------------------------------------------
# Forward wrapper
# ---------------------------------------------------------------------------
def cnn_forward(prep, x):
    """x: (N, 3, 32, 32) float32 NCHW -> logits (N, 10)."""
    n = x.shape[0]
    assert x.shape[1:] == (3, 32, 32), "expected CIFAR-sized NCHW input"
    nb = _pick_batch_tile(n)
    grid = (n // nb,)

    # rows = (n, h), lanes = (ic, w): only per-call layout glue on the input.
    x_r = jnp.transpose(x, (0, 2, 1, 3)).reshape(n * 32, 3 * 32).astype(jnp.float32)

    # trace-time selection constants (become jit constants, zero runtime cost)
    g1 = np.stack([_row_pick(nb, 28, 32, lambda r, k=ki: r + k) for ki in range(5)])
    r1 = np.stack([_row_pick(nb, 14, 28, lambda r, o=o: 2 * r + o) for o in (0, 1)])
    c1 = np.stack([_col_pick(6, 28, 14, o) for o in (0, 1)])
    g2 = np.stack([_row_pick(nb, 10, 14, lambda r, k=ki: r + k) for ki in range(5)])
    r2 = np.stack([_row_pick(nb, 5, 10, lambda r, o=o: 2 * r + o) for o in (0, 1)])
    c2 = np.stack([_col_pick(16, 10, 5, o) for o in (0, 1)])
    fs = np.stack([_row_pick(nb, 1, 5, lambda r, h=h: h) for h in range(5)])

    operands = (x_r, g1, prep['w1b'], prep['b1'], r1, c1,
                g2, prep['w2b'], prep['b2'], r2, c2,
                fs, prep['fw1'], prep['fb1'], prep['fw2'], prep['fb2'],
                prep['fw3'], prep['fb3'])

    def _full(a):
        return pl.BlockSpec(a.shape, lambda i, nd=a.ndim: (0,) * nd)

    in_specs = [pl.BlockSpec((nb * 32, 96), lambda i: (i, 0))]
    in_specs += [_full(a) for a in operands[1:]]

    return pl.pallas_call(
        _cnn_kernel,
        out_shape=jax.ShapeDtypeStruct((n, 10), jnp.float32),
        grid=grid,
        in_specs=in_specs,
        out_specs=pl.BlockSpec((nb, 10), lambda i: (i, 0)),
        compiler_params=pltpu.CompilerParams(
            dimension_semantics=("parallel",)),
    )(*operands)


# ---------------------------------------------------------------------------
# Parameter init (PyTorch default: U(-1/sqrt(fan_in), 1/sqrt(fan_in)))
# ---------------------------------------------------------------------------
def init_params(key):
    def uniform(k, shape, fan_in):
        s = 1.0 / jnp.sqrt(jnp.float32(fan_in))
        return jax.random.uniform(k, shape, jnp.float32, -s, s)

    ks = jax.random.split(key, 10)
    return {
        "conv1_w": uniform(ks[0], (6, 3, 5, 5), 3 * 5 * 5),
        "conv1_b": uniform(ks[1], (6,), 3 * 5 * 5),
        "conv2_w": uniform(ks[2], (16, 6, 5, 5), 6 * 5 * 5),
        "conv2_b": uniform(ks[3], (16,), 6 * 5 * 5),
        "fc1_w": uniform(ks[4], (120, 400), 400),
        "fc1_b": uniform(ks[5], (120,), 400),
        "fc2_w": uniform(ks[6], (85, 120), 120),   # fc2: 120 -> 85 (per reference module)
        "fc2_b": uniform(ks[7], (85,), 120),
        "fc3_w": uniform(ks[8], (10, 85), 85),
        "fc3_b": uniform(ks[9], (10,), 85),
    }


if __name__ == "__main__":
    key = jax.random.PRNGKey(0)
    k_param, k_inp = jax.random.split(key)
    params = init_params(k_param)
    prep = prepare_params(params)          # weight re-layout hoisted, done once

    # CIFAR-sized input: 32x32 spatial is required so the flatten is 16*5*5.
    x = jax.random.normal(k_inp, (2, 3, 32, 32), jnp.float32)

    fwd = jax.jit(cnn_forward)
    logits = fwd(prep, x)
    jax.block_until_ready(logits)
    assert logits.shape == (2, 10) and logits.dtype == jnp.float32
    print("KERNEL_OK")
</pallas_src>

<mosaic_0001>
module attributes {stable_mosaic.version = 11 : i64} {
  func.func @_cnn_kernel(%arg0: i32, %arg1: memref<64x96xf32, #tpu.memory_space<vmem>>, %arg2: memref<5x56x64xf32, #tpu.memory_space<vmem>>, %arg3: memref<5x96x168xbf16, #tpu.memory_space<vmem>>, %arg4: memref<1x168xf32, #tpu.memory_space<vmem>>, %arg5: memref<2x28x56xf32, #tpu.memory_space<vmem>>, %arg6: memref<2x168x84xf32, #tpu.memory_space<vmem>>, %arg7: memref<5x20x28xf32, #tpu.memory_space<vmem>>, %arg8: memref<5x84x160xbf16, #tpu.memory_space<vmem>>, %arg9: memref<1x160xf32, #tpu.memory_space<vmem>>, %arg10: memref<2x10x20xf32, #tpu.memory_space<vmem>>, %arg11: memref<2x160x80xf32, #tpu.memory_space<vmem>>, %arg12: memref<5x2x10xf32, #tpu.memory_space<vmem>>, %arg13: memref<5x80x120xbf16, #tpu.memory_space<vmem>>, %arg14: memref<1x120xf32, #tpu.memory_space<vmem>>, %arg15: memref<120x85xbf16, #tpu.memory_space<vmem>>, %arg16: memref<1x85xf32, #tpu.memory_space<vmem>>, %arg17: memref<85x10xbf16, #tpu.memory_space<vmem>>, %arg18: memref<1x10xf32, #tpu.memory_space<vmem>>, %arg19: memref<2x10xf32, #tpu.memory_space<vmem>>) attributes {dimension_semantics = [#tpu.dimension_semantics<parallel>], iteration_bounds = array<i64: 1>, scalar_prefetch = 0 : i64, scratch_operands = 0 : i64, tpu.core_type = #tpu.core_type<tc>, window_params = [{transform_indices = @transform_0, window_bounds = array<i64: 64, 96>}, {pipeline_mode = #tpu.pipeline_mode<synchronous>, transform_indices = @transform_1, window_bounds = array<i64: 5, 56, 64>}, {pipeline_mode = #tpu.pipeline_mode<synchronous>, transform_indices = @transform_2, window_bounds = array<i64: 5, 96, 168>}, {pipeline_mode = #tpu.pipeline_mode<synchronous>, transform_indices = @transform_3, window_bounds = array<i64: 1, 168>}, {pipeline_mode = #tpu.pipeline_mode<synchronous>, transform_indices = @transform_4, window_bounds = array<i64: 2, 28, 56>}, {pipeline_mode = #tpu.pipeline_mode<synchronous>, transform_indices = @transform_5, window_bounds = array<i64: 2, 168, 84>}, {pipeline_mode = #tpu.pipeline_mode<synchronous>, transform_indices = @transform_6, window_bounds = array<i64: 5, 20, 28>}, {pipeline_mode = #tpu.pipeline_mode<synchronous>, transform_indices = @transform_7, window_bounds = array<i64: 5, 84, 160>}, {pipeline_mode = #tpu.pipeline_mode<synchronous>, transform_indices = @transform_8, window_bounds = array<i64: 1, 160>}, {pipeline_mode = #tpu.pipeline_mode<synchronous>, transform_indices = @transform_9, window_bounds = array<i64: 2, 10, 20>}, {pipeline_mode = #tpu.pipeline_mode<synchronous>, transform_indices = @transform_10, window_bounds = array<i64: 2, 160, 80>}, {pipeline_mode = #tpu.pipeline_mode<synchronous>, transform_indices = @transform_11, window_bounds = array<i64: 5, 2, 10>}, {pipeline_mode = #tpu.pipeline_mode<synchronous>, transform_indices = @transform_12, window_bounds = array<i64: 5, 80, 120>}, {pipeline_mode = #tpu.pipeline_mode<synchronous>, transform_indices = @transform_13, window_bounds = array<i64: 1, 120>}, {pipeline_mode = #tpu.pipeline_mode<synchronous>, transform_indices = @transform_14, window_bounds = array<i64: 120, 85>}, {pipeline_mode = #tpu.pipeline_mode<synchronous>, transform_indices = @transform_15, window_bounds = array<i64: 1, 85>}, {pipeline_mode = #tpu.pipeline_mode<synchronous>, transform_indices = @transform_16, window_bounds = array<i64: 85, 10>}, {pipeline_mode = #tpu.pipeline_mode<synchronous>, transform_indices = @transform_17, window_bounds = array<i64: 1, 10>}, {transform_indices = @transform_18, window_bounds = array<i64: 2, 10>}]} {
    %c0 = arith.constant 0 : index
    %c0_0 = arith.constant 0 : index
    %0 = vector.load %arg1[%c0, %c0_0] : memref<64x96xf32, #tpu.memory_space<vmem>>, vector<64x96xf32>
    %c0_1 = arith.constant 0 : index
    %c0_2 = arith.constant 0 : index
    %c0_3 = arith.constant 0 : index
    %1 = vector.load %arg2[%c0_1, %c0_2, %c0_3] : memref<5x56x64xf32, #tpu.memory_space<vmem>>, vector<1x56x64xf32>
    %2 = vector.shape_cast %1 : vector<1x56x64xf32> to vector<56x64xf32>
    %cst = arith.constant dense<0.000000e+00> : vector<56x96xf32>
    %3 = tpu.matmul %2, %0, %cst {dimension_numbers = #tpu.dot_dimension_numbers<[1], [0], [0], [1], [0, 0, 1, 1], [], []>} : vector<56x64xf32>, vector<64x96xf32>, vector<56x96xf32> -> vector<56x96xf32>
    %c0_4 = arith.constant 0 : index
    %c0_5 = arith.constant 0 : index
    %c0_6 = arith.constant 0 : index
    %4 = vector.load %arg3[%c0_4, %c0_5, %c0_6] : memref<5x96x168xbf16, #tpu.memory_space<vmem>>, vector<1x96x168xbf16>
    %5 = vector.shape_cast %4 : vector<1x96x168xbf16> to vector<96x168xbf16>
    %6 = arith.truncf %3 : vector<56x96xf32> to vector<56x96xbf16>
    %cst_7 = arith.constant dense<0.000000e+00> : vector<56x168xf32>
    %7 = tpu.matmul %6, %5, %cst_7 {dimension_numbers = #tpu.dot_dimension_numbers<[1], [0], [0], [1], [0, 0, 1, 1], [], []>} : vector<56x96xbf16>, vector<96x168xbf16>, vector<56x168xf32> -> vector<56x168xf32>
    %c1 = arith.constant 1 : index
    %c0_8 = arith.constant 0 : index
    %c0_9 = arith.constant 0 : index
    %8 = vector.load %arg2[%c1, %c0_8, %c0_9] : memref<5x56x64xf32, #tpu.memory_space<vmem>>, vector<1x56x64xf32>
    %9 = vector.shape_cast %8 : vector<1x56x64xf32> to vector<56x64xf32>
    %cst_10 = arith.constant dense<0.000000e+00> : vector<56x96xf32>
    %10 = tpu.matmul %9, %0, %cst_10 {dimension_numbers = #tpu.dot_dimension_numbers<[1], [0], [0], [1], [0, 0, 1, 1], [], []>} : vector<56x64xf32>, vector<64x96xf32>, vector<56x96xf32> -> vector<56x96xf32>
    %c1_11 = arith.constant 1 : index
    %c0_12 = arith.constant 0 : index
    %c0_13 = arith.constant 0 : index
    %11 = vector.load %arg3[%c1_11, %c0_12, %c0_13] : memref<5x96x168xbf16, #tpu.memory_space<vmem>>, vector<1x96x168xbf16>
    %12 = vector.shape_cast %11 : vector<1x96x168xbf16> to vector<96x168xbf16>
    %13 = arith.truncf %10 : vector<56x96xf32> to vector<56x96xbf16>
    %cst_14 = arith.constant dense<0.000000e+00> : vector<56x168xf32>
    %14 = tpu.matmul %13, %12, %cst_14 {dimension_numbers = #tpu.dot_dimension_numbers<[1], [0], [0], [1], [0, 0, 1, 1], [], []>} : vector<56x96xbf16>, vector<96x168xbf16>, vector<56x168xf32> -> vector<56x168xf32>
    %15 = arith.addf %7, %14 : vector<56x168xf32>
    %c2 = arith.constant 2 : index
    %c0_15 = arith.constant 0 : index
    %c0_16 = arith.constant 0 : index
    %16 = vector.load %arg2[%c2, %c0_15, %c0_16] : memref<5x56x64xf32, #tpu.memory_space<vmem>>, vector<1x56x64xf32>
    %17 = vector.shape_cast %16 : vector<1x56x64xf32> to vector<56x64xf32>
    %cst_17 = arith.constant dense<0.000000e+00> : vector<56x96xf32>
    %18 = tpu.matmul %17, %0, %cst_17 {dimension_numbers = #tpu.dot_dimension_numbers<[1], [0], [0], [1], [0, 0, 1, 1], [], []>} : vector<56x64xf32>, vector<64x96xf32>, vector<56x96xf32> -> vector<56x96xf32>
    %c2_18 = arith.constant 2 : index
    %c0_19 = arith.constant 0 : index
    %c0_20 = arith.constant 0 : index
    %19 = vector.load %arg3[%c2_18, %c0_19, %c0_20] : memref<5x96x168xbf16, #tpu.memory_space<vmem>>, vector<1x96x168xbf16>
    %20 = vector.shape_cast %19 : vector<1x96x168xbf16> to vector<96x168xbf16>
    %21 = arith.truncf %18 : vector<56x96xf32> to vector<56x96xbf16>
    %cst_21 = arith.constant dense<0.000000e+00> : vector<56x168xf32>
    %22 = tpu.matmul %21, %20, %cst_21 {dimension_numbers = #tpu.dot_dimension_numbers<[1], [0], [0], [1], [0, 0, 1, 1], [], []>} : vector<56x96xbf16>, vector<96x168xbf16>, vector<56x168xf32> -> vector<56x168xf32>
    %23 = arith.addf %15, %22 : vector<56x168xf32>
    %c3 = arith.constant 3 : index
    %c0_22 = arith.constant 0 : index
    %c0_23 = arith.constant 0 : index
    %24 = vector.load %arg2[%c3, %c0_22, %c0_23] : memref<5x56x64xf32, #tpu.memory_space<vmem>>, vector<1x56x64xf32>
    %25 = vector.shape_cast %24 : vector<1x56x64xf32> to vector<56x64xf32>
    %cst_24 = arith.constant dense<0.000000e+00> : vector<56x96xf32>
    %26 = tpu.matmul %25, %0, %cst_24 {dimension_numbers = #tpu.dot_dimension_numbers<[1], [0], [0], [1], [0, 0, 1, 1], [], []>} : vector<56x64xf32>, vector<64x96xf32>, vector<56x96xf32> -> vector<56x96xf32>
    %c3_25 = arith.constant 3 : index
    %c0_26 = arith.constant 0 : index
    %c0_27 = arith.constant 0 : index
    %27 = vector.load %arg3[%c3_25, %c0_26, %c0_27] : memref<5x96x168xbf16, #tpu.memory_space<vmem>>, vector<1x96x168xbf16>
    %28 = vector.shape_cast %27 : vector<1x96x168xbf16> to vector<96x168xbf16>
    %29 = arith.truncf %26 : vector<56x96xf32> to vector<56x96xbf16>
    %cst_28 = arith.constant dense<0.000000e+00> : vector<56x168xf32>
    %30 = tpu.matmul %29, %28, %cst_28 {dimension_numbers = #tpu.dot_dimension_numbers<[1], [0], [0], [1], [0, 0, 1, 1], [], []>} : vector<56x96xbf16>, vector<96x168xbf16>, vector<56x168xf32> -> vector<56x168xf32>
    %31 = arith.addf %23, %30 : vector<56x168xf32>
    %c4 = arith.constant 4 : index
    %c0_29 = arith.constant 0 : index
    %c0_30 = arith.constant 0 : index
    %32 = vector.load %arg2[%c4, %c0_29, %c0_30] : memref<5x56x64xf32, #tpu.memory_space<vmem>>, vector<1x56x64xf32>
    %33 = vector.shape_cast %32 : vector<1x56x64xf32> to vector<56x64xf32>
    %cst_31 = arith.constant dense<0.000000e+00> : vector<56x96xf32>
    %34 = tpu.matmul %33, %0, %cst_31 {dimension_numbers = #tpu.dot_dimension_numbers<[1], [0], [0], [1], [0, 0, 1, 1], [], []>} : vector<56x64xf32>, vector<64x96xf32>, vector<56x96xf32> -> vector<56x96xf32>
    %c4_32 = arith.constant 4 : index
    %c0_33 = arith.constant 0 : index
    %c0_34 = arith.constant 0 : index
    %35 = vector.load %arg3[%c4_32, %c0_33, %c0_34] : memref<5x96x168xbf16, #tpu.memory_space<vmem>>, vector<1x96x168xbf16>
    %36 = vector.shape_cast %35 : vector<1x96x168xbf16> to vector<96x168xbf16>
    %37 = arith.truncf %34 : vector<56x96xf32> to vector<56x96xbf16>
    %cst_35 = arith.constant dense<0.000000e+00> : vector<56x168xf32>
    %38 = tpu.matmul %37, %36, %cst_35 {dimension_numbers = #tpu.dot_dimension_numbers<[1], [0], [0], [1], [0, 0, 1, 1], [], []>} : vector<56x96xbf16>, vector<96x168xbf16>, vector<56x168xf32> -> vector<56x168xf32>
    %39 = arith.addf %31, %38 : vector<56x168xf32>
    %c0_36 = arith.constant 0 : index
    %c0_37 = arith.constant 0 : index
    %40 = vector.load %arg4[%c0_36, %c0_37] : memref<1x168xf32, #tpu.memory_space<vmem>>, vector<1x168xf32>
    %41 = vector.broadcast %40 : vector<1x168xf32> to vector<56x168xf32>
    %42 = arith.addf %39, %41 : vector<56x168xf32>
    %cst_38 = arith.constant 0.000000e+00 : f32
    %43 = vector.broadcast %cst_38 : f32 to vector<56x168xf32>
    %44 = arith.maximumf %42, %43 : vector<56x168xf32>
    %c0_39 = arith.constant 0 : index
    %c0_40 = arith.constant 0 : index
    %c0_41 = arith.constant 0 : index
    %45 = vector.load %arg5[%c0_39, %c0_40, %c0_41] : memref<2x28x56xf32, #tpu.memory_space<vmem>>, vector<1x28x56xf32>
    %46 = vector.shape_cast %45 : vector<1x28x56xf32> to vector<28x56xf32>
    %cst_42 = arith.constant dense<0.000000e+00> : vector<28x168xf32>
    %47 = tpu.matmul %46, %44, %cst_42 {dimension_numbers = #tpu.dot_dimension_numbers<[1], [0], [0], [1], [0, 0, 1, 1], [], []>} : vector<28x56xf32>, vector<56x168xf32>, vector<28x168xf32> -> vector<28x168xf32>
    %c1_43 = arith.constant 1 : index
    %c0_44 = arith.constant 0 : index
    %c0_45 = arith.constant 0 : index
    %48 = vector.load %arg5[%c1_43, %c0_44, %c0_45] : memref<2x28x56xf32, #tpu.memory_space<vmem>>, vector<1x28x56xf32>
    %49 = vector.shape_cast %48 : vector<1x28x56xf32> to vector<28x56xf32>
    %cst_46 = arith.constant dense<0.000000e+00> : vector<28x168xf32>
    %50 = tpu.matmul %49, %44, %cst_46 {dimension_numbers = #tpu.dot_dimension_numbers<[1], [0], [0], [1], [0, 0, 1, 1], [], []>} : vector<28x56xf32>, vector<56x168xf32>, vector<28x168xf32> -> vector<28x168xf32>
    %51 = arith.maximumf %47, %50 : vector<28x168xf32>
    %c0_47 = arith.constant 0 : index
    %c0_48 = arith.constant 0 : index
    %c0_49 = arith.constant 0 : index
    %52 = vector.load %arg6[%c0_47, %c0_48, %c0_49] : memref<2x168x84xf32, #tpu.memory_space<vmem>>, vector<1x168x84xf32>
    %53 = vector.shape_cast %52 : vector<1x168x84xf32> to vector<168x84xf32>
    %cst_50 = arith.constant dense<0.000000e+00> : vector<28x84xf32>
    %54 = tpu.matmul %51, %53, %cst_50 {dimension_numbers = #tpu.dot_dimension_numbers<[1], [0], [0], [1], [0, 0, 1, 1], [], []>} : vector<28x168xf32>, vector<168x84xf32>, vector<28x84xf32> -> vector<28x84xf32>
    %c1_51 = arith.constant 1 : index
    %c0_52 = arith.constant 0 : index
    %c0_53 = arith.constant 0 : index
    %55 = vector.load %arg6[%c1_51, %c0_52, %c0_53] : memref<2x168x84xf32, #tpu.memory_space<vmem>>, vector<1x168x84xf32>
    %56 = vector.shape_cast %55 : vector<1x168x84xf32> to vector<168x84xf32>
    %cst_54 = arith.constant dense<0.000000e+00> : vector<28x84xf32>
    %57 = tpu.matmul %51, %56, %cst_54 {dimension_numbers = #tpu.dot_dimension_numbers<[1], [0], [0], [1], [0, 0, 1, 1], [], []>} : vector<28x168xf32>, vector<168x84xf32>, vector<28x84xf32> -> vector<28x84xf32>
    %58 = arith.maximumf %54, %57 : vector<28x84xf32>
    %c0_55 = arith.constant 0 : index
    %c0_56 = arith.constant 0 : index
    %c0_57 = arith.constant 0 : index
    %59 = vector.load %arg7[%c0_55, %c0_56, %c0_57] : memref<5x20x28xf32, #tpu.memory_space<vmem>>, vector<1x20x28xf32>
    %60 = vector.shape_cast %59 : vector<1x20x28xf32> to vector<20x28xf32>
    %cst_58 = arith.constant dense<0.000000e+00> : vector<20x84xf32>
    %61 = tpu.matmul %60, %58, %cst_58 {dimension_numbers = #tpu.dot_dimension_numbers<[1], [0], [0], [1], [0, 0, 1, 1], [], []>} : vector<20x28xf32>, vector<28x84xf32>, vector<20x84xf32> -> vector<20x84xf32>
    %c0_59 = arith.constant 0 : index
    %c0_60 = arith.constant 0 : index
    %c0_61 = arith.constant 0 : index
    %62 = vector.load %arg8[%c0_59, %c0_60, %c0_61] : memref<5x84x160xbf16, #tpu.memory_space<vmem>>, vector<1x84x160xbf16>
    %63 = vector.shape_cast %62 : vector<1x84x160xbf16> to vector<84x160xbf16>
    %64 = arith.truncf %61 : vector<20x84xf32> to vector<20x84xbf16>
    %cst_62 = arith.constant dense<0.000000e+00> : vector<20x160xf32>
    %65 = tpu.matmul %64, %63, %cst_62 {dimension_numbers = #tpu.dot_dimension_numbers<[1], [0], [0], [1], [0, 0, 1, 1], [], []>} : vector<20x84xbf16>, vector<84x160xbf16>, vector<20x160xf32> -> vector<20x160xf32>
    %c1_63 = arith.constant 1 : index
    %c0_64 = arith.constant 0 : index
    %c0_65 = arith.constant 0 : index
    %66 = vector.load %arg7[%c1_63, %c0_64, %c0_65] : memref<5x20x28xf32, #tpu.memory_space<vmem>>, vector<1x20x28xf32>
    %67 = vector.shape_cast %66 : vector<1x20x28xf32> to vector<20x28xf32>
    %cst_66 = arith.constant dense<0.000000e+00> : vector<20x84xf32>
    %68 = tpu.matmul %67, %58, %cst_66 {dimension_numbers = #tpu.dot_dimension_numbers<[1], [0], [0], [1], [0, 0, 1, 1], [], []>} : vector<20x28xf32>, vector<28x84xf32>, vector<20x84xf32> -> vector<20x84xf32>
    %c1_67 = arith.constant 1 : index
    %c0_68 = arith.constant 0 : index
    %c0_69 = arith.constant 0 : index
    %69 = vector.load %arg8[%c1_67, %c0_68, %c0_69] : memref<5x84x160xbf16, #tpu.memory_space<vmem>>, vector<1x84x160xbf16>
    %70 = vector.shape_cast %69 : vector<1x84x160xbf16> to vector<84x160xbf16>
    %71 = arith.truncf %68 : vector<20x84xf32> to vector<20x84xbf16>
    %cst_70 = arith.constant dense<0.000000e+00> : vector<20x160xf32>
    %72 = tpu.matmul %71, %70, %cst_70 {dimension_numbers = #tpu.dot_dimension_numbers<[1], [0], [0], [1], [0, 0, 1, 1], [], []>} : vector<20x84xbf16>, vector<84x160xbf16>, vector<20x160xf32> -> vector<20x160xf32>
    %73 = arith.addf %65, %72 : vector<20x160xf32>
    %c2_71 = arith.constant 2 : index
    %c0_72 = arith.constant 0 : index
    %c0_73 = arith.constant 0 : index
    %74 = vector.load %arg7[%c2_71, %c0_72, %c0_73] : memref<5x20x28xf32, #tpu.memory_space<vmem>>, vector<1x20x28xf32>
    %75 = vector.shape_cast %74 : vector<1x20x28xf32> to vector<20x28xf32>
    %cst_74 = arith.constant dense<0.000000e+00> : vector<20x84xf32>
    %76 = tpu.matmul %75, %58, %cst_74 {dimension_numbers = #tpu.dot_dimension_numbers<[1], [0], [0], [1], [0, 0, 1, 1], [], []>} : vector<20x28xf32>, vector<28x84xf32>, vector<20x84xf32> -> vector<20x84xf32>
    %c2_75 = arith.constant 2 : index
    %c0_76 = arith.constant 0 : index
    %c0_77 = arith.constant 0 : index
    %77 = vector.load %arg8[%c2_75, %c0_76, %c0_77] : memref<5x84x160xbf16, #tpu.memory_space<vmem>>, vector<1x84x160xbf16>
    %78 = vector.shape_cast %77 : vector<1x84x160xbf16> to vector<84x160xbf16>
    %79 = arith.truncf %76 : vector<20x84xf32> to vector<20x84xbf16>
    %cst_78 = arith.constant dense<0.000000e+00> : vector<20x160xf32>
    %80 = tpu.matmul %79, %78, %cst_78 {dimension_numbers = #tpu.dot_dimension_numbers<[1], [0], [0], [1], [0, 0, 1, 1], [], []>} : vector<20x84xbf16>, vector<84x160xbf16>, vector<20x160xf32> -> vector<20x160xf32>
    %81 = arith.addf %73, %80 : vector<20x160xf32>
    %c3_79 = arith.constant 3 : index
    %c0_80 = arith.constant 0 : index
    %c0_81 = arith.constant 0 : index
    %82 = vector.load %arg7[%c3_79, %c0_80, %c0_81] : memref<5x20x28xf32, #tpu.memory_space<vmem>>, vector<1x20x28xf32>
    %83 = vector.shape_cast %82 : vector<1x20x28xf32> to vector<20x28xf32>
    %cst_82 = arith.constant dense<0.000000e+00> : vector<20x84xf32>
    %84 = tpu.matmul %83, %58, %cst_82 {dimension_numbers = #tpu.dot_dimension_numbers<[1], [0], [0], [1], [0, 0, 1, 1], [], []>} : vector<20x28xf32>, vector<28x84xf32>, vector<20x84xf32> -> vector<20x84xf32>
    %c3_83 = arith.constant 3 : index
    %c0_84 = arith.constant 0 : index
    %c0_85 = arith.constant 0 : index
    %85 = vector.load %arg8[%c3_83, %c0_84, %c0_85] : memref<5x84x160xbf16, #tpu.memory_space<vmem>>, vector<1x84x160xbf16>
    %86 = vector.shape_cast %85 : vector<1x84x160xbf16> to vector<84x160xbf16>
    %87 = arith.truncf %84 : vector<20x84xf32> to vector<20x84xbf16>
    %cst_86 = arith.constant dense<0.000000e+00> : vector<20x160xf32>
    %88 = tpu.matmul %87, %86, %cst_86 {dimension_numbers = #tpu.dot_dimension_numbers<[1], [0], [0], [1], [0, 0, 1, 1], [], []>} : vector<20x84xbf16>, vector<84x160xbf16>, vector<20x160xf32> -> vector<20x160xf32>
    %89 = arith.addf %81, %88 : vector<20x160xf32>
    %c4_87 = arith.constant 4 : index
    %c0_88 = arith.constant 0 : index
    %c0_89 = arith.constant 0 : index
    %90 = vector.load %arg7[%c4_87, %c0_88, %c0_89] : memref<5x20x28xf32, #tpu.memory_space<vmem>>, vector<1x20x28xf32>
    %91 = vector.shape_cast %90 : vector<1x20x28xf32> to vector<20x28xf32>
    %cst_90 = arith.constant dense<0.000000e+00> : vector<20x84xf32>
    %92 = tpu.matmul %91, %58, %cst_90 {dimension_numbers = #tpu.dot_dimension_numbers<[1], [0], [0], [1], [0, 0, 1, 1], [], []>} : vector<20x28xf32>, vector<28x84xf32>, vector<20x84xf32> -> vector<20x84xf32>
    %c4_91 = arith.constant 4 : index
    %c0_92 = arith.constant 0 : index
    %c0_93 = arith.constant 0 : index
    %93 = vector.load %arg8[%c4_91, %c0_92, %c0_93] : memref<5x84x160xbf16, #tpu.memory_space<vmem>>, vector<1x84x160xbf16>
    %94 = vector.shape_cast %93 : vector<1x84x160xbf16> to vector<84x160xbf16>
    %95 = arith.truncf %92 : vector<20x84xf32> to vector<20x84xbf16>
    %cst_94 = arith.constant dense<0.000000e+00> : vector<20x160xf32>
    %96 = tpu.matmul %95, %94, %cst_94 {dimension_numbers = #tpu.dot_dimension_numbers<[1], [0], [0], [1], [0, 0, 1, 1], [], []>} : vector<20x84xbf16>, vector<84x160xbf16>, vector<20x160xf32> -> vector<20x160xf32>
    %97 = arith.addf %89, %96 : vector<20x160xf32>
    %c0_95 = arith.constant 0 : index
    %c0_96 = arith.constant 0 : index
    %98 = vector.load %arg9[%c0_95, %c0_96] : memref<1x160xf32, #tpu.memory_space<vmem>>, vector<1x160xf32>
    %99 = vector.broadcast %98 : vector<1x160xf32> to vector<20x160xf32>
    %100 = arith.addf %97, %99 : vector<20x160xf32>
    %cst_97 = arith.constant 0.000000e+00 : f32
    %101 = vector.broadcast %cst_97 : f32 to vector<20x160xf32>
    %102 = arith.maximumf %100, %101 : vector<20x160xf32>
    %c0_98 = arith.constant 0 : index
    %c0_99 = arith.constant 0 : index
    %c0_100 = arith.constant 0 : index
    %103 = vector.load %arg10[%c0_98, %c0_99, %c0_100] : memref<2x10x20xf32, #tpu.memory_space<vmem>>, vector<1x10x20xf32>
    %104 = vector.shape_cast %103 : vector<1x10x20xf32> to vector<10x20xf32>
    %cst_101 = arith.constant dense<0.000000e+00> : vector<10x160xf32>
    %105 = tpu.matmul %104, %102, %cst_101 {dimension_numbers = #tpu.dot_dimension_numbers<[1], [0], [0], [1], [0, 0, 1, 1], [], []>} : vector<10x20xf32>, vector<20x160xf32>, vector<10x160xf32> -> vector<10x160xf32>
    %c1_102 = arith.constant 1 : index
    %c0_103 = arith.constant 0 : index
    %c0_104 = arith.constant 0 : index
    %106 = vector.load %arg10[%c1_102, %c0_103, %c0_104] : memref<2x10x20xf32, #tpu.memory_space<vmem>>, vector<1x10x20xf32>
    %107 = vector.shape_cast %106 : vector<1x10x20xf32> to vector<10x20xf32>
    %cst_105 = arith.constant dense<0.000000e+00> : vector<10x160xf32>
    %108 = tpu.matmul %107, %102, %cst_105 {dimension_numbers = #tpu.dot_dimension_numbers<[1], [0], [0], [1], [0, 0, 1, 1], [], []>} : vector<10x20xf32>, vector<20x160xf32>, vector<10x160xf32> -> vector<10x160xf32>
    %109 = arith.maximumf %105, %108 : vector<10x160xf32>
    %c0_106 = arith.constant 0 : index
    %c0_107 = arith.constant 0 : index
    %c0_108 = arith.constant 0 : index
    %110 = vector.load %arg11[%c0_106, %c0_107, %c0_108] : memref<2x160x80xf32, #tpu.memory_space<vmem>>, vector<1x160x80xf32>
    %111 = vector.shape_cast %110 : vector<1x160x80xf32> to vector<160x80xf32>
    %cst_109 = arith.constant dense<0.000000e+00> : vector<10x80xf32>
    %112 = tpu.matmul %109, %111, %cst_109 {dimension_numbers = #tpu.dot_dimension_numbers<[1], [0], [0], [1], [0, 0, 1, 1], [], []>} : vector<10x160xf32>, vector<160x80xf32>, vector<10x80xf32> -> vector<10x80xf32>
    %c1_110 = arith.constant 1 : index
    %c0_111 = arith.constant 0 : index
    %c0_112 = arith.constant 0 : index
    %113 = vector.load %arg11[%c1_110, %c0_111, %c0_112] : memref<2x160x80xf32, #tpu.memory_space<vmem>>, vector<1x160x80xf32>
    %114 = vector.shape_cast %113 : vector<1x160x80xf32> to vector<160x80xf32>
    %cst_113 = arith.constant dense<0.000000e+00> : vector<10x80xf32>
    %115 = tpu.matmul %109, %114, %cst_113 {dimension_numbers = #tpu.dot_dimension_numbers<[1], [0], [0], [1], [0, 0, 1, 1], [], []>} : vector<10x160xf32>, vector<160x80xf32>, vector<10x80xf32> -> vector<10x80xf32>
    %116 = arith.maximumf %112, %115 : vector<10x80xf32>
    %c0_114 = arith.constant 0 : index
    %c0_115 = arith.constant 0 : index
    %c0_116 = arith.constant 0 : index
    %117 = vector.load %arg12[%c0_114, %c0_115, %c0_116] : memref<5x2x10xf32, #tpu.memory_space<vmem>>, vector<1x2x10xf32>
    %118 = vector.shape_cast %117 : vector<1x2x10xf32> to vector<2x10xf32>
    %cst_117 = arith.constant dense<0.000000e+00> : vector<2x80xf32>
    %119 = tpu.matmul %118, %116, %cst_117 {dimension_numbers = #tpu.dot_dimension_numbers<[1], [0], [0], [1], [0, 0, 1, 1], [], []>} : vector<2x10xf32>, vector<10x80xf32>, vector<2x80xf32> -> vector<2x80xf32>
    %c0_118 = arith.constant 0 : index
    %c0_119 = arith.constant 0 : index
    %c0_120 = arith.constant 0 : index
    %120 = vector.load %arg13[%c0_118, %c0_119, %c0_120] : memref<5x80x120xbf16, #tpu.memory_space<vmem>>, vector<1x80x120xbf16>
    %121 = vector.shape_cast %120 : vector<1x80x120xbf16> to vector<80x120xbf16>
    %122 = arith.truncf %119 : vector<2x80xf32> to vector<2x80xbf16>
    %cst_121 = arith.constant dense<0.000000e+00> : vector<2x120xf32>
    %123 = tpu.matmul %122, %121, %cst_121 {dimension_numbers = #tpu.dot_dimension_numbers<[1], [0], [0], [1], [0, 0, 1, 1], [], []>} : vector<2x80xbf16>, vector<80x120xbf16>, vector<2x120xf32> -> vector<2x120xf32>
    %c1_122 = arith.constant 1 : index
    %c0_123 = arith.constant 0 : index
    %c0_124 = arith.constant 0 : index
    %124 = vector.load %arg12[%c1_122, %c0_123, %c0_124] : memref<5x2x10xf32, #tpu.memory_space<vmem>>, vector<1x2x10xf32>
    %125 = vector.shape_cast %124 : vector<1x2x10xf32> to vector<2x10xf32>
    %cst_125 = arith.constant dense<0.000000e+00> : vector<2x80xf32>
    %126 = tpu.matmul %125, %116, %cst_125 {dimension_numbers = #tpu.dot_dimension_numbers<[1], [0], [0], [1], [0, 0, 1, 1], [], []>} : vector<2x10xf32>, vector<10x80xf32>, vector<2x80xf32> -> vector<2x80xf32>
    %c1_126 = arith.constant 1 : index
    %c0_127 = arith.constant 0 : index
    %c0_128 = arith.constant 0 : index
    %127 = vector.load %arg13[%c1_126, %c0_127, %c0_128] : memref<5x80x120xbf16, #tpu.memory_space<vmem>>, vector<1x80x120xbf16>
    %128 = vector.shape_cast %127 : vector<1x80x120xbf16> to vector<80x120xbf16>
    %129 = arith.truncf %126 : vector<2x80xf32> to vector<2x80xbf16>
    %cst_129 = arith.constant dense<0.000000e+00> : vector<2x120xf32>
    %130 = tpu.matmul %129, %128, %cst_129 {dimension_numbers = #tpu.dot_dimension_numbers<[1], [0], [0], [1], [0, 0, 1, 1], [], []>} : vector<2x80xbf16>, vector<80x120xbf16>, vector<2x120xf32> -> vector<2x120xf32>
    %131 = arith.addf %123, %130 : vector<2x120xf32>
    %c2_130 = arith.constant 2 : index
    %c0_131 = arith.constant 0 : index
    %c0_132 = arith.constant 0 : index
    %132 = vector.load %arg12[%c2_130, %c0_131, %c0_132] : memref<5x2x10xf32, #tpu.memory_space<vmem>>, vector<1x2x10xf32>
    %133 = vector.shape_cast %132 : vector<1x2x10xf32> to vector<2x10xf32>
    %cst_133 = arith.constant dense<0.000000e+00> : vector<2x80xf32>
    %134 = tpu.matmul %133, %116, %cst_133 {dimension_numbers = #tpu.dot_dimension_numbers<[1], [0], [0], [1], [0, 0, 1, 1], [], []>} : vector<2x10xf32>, vector<10x80xf32>, vector<2x80xf32> -> vector<2x80xf32>
    %c2_134 = arith.constant 2 : index
    %c0_135 = arith.constant 0 : index
    %c0_136 = arith.constant 0 : index
    %135 = vector.load %arg13[%c2_134, %c0_135, %c0_136] : memref<5x80x120xbf16, #tpu.memory_space<vmem>>, vector<1x80x120xbf16>
    %136 = vector.shape_cast %135 : vector<1x80x120xbf16> to vector<80x120xbf16>
    %137 = arith.truncf %134 : vector<2x80xf32> to vector<2x80xbf16>
    %cst_137 = arith.constant dense<0.000000e+00> : vector<2x120xf32>
    %138 = tpu.matmul %137, %136, %cst_137 {dimension_numbers = #tpu.dot_dimension_numbers<[1], [0], [0], [1], [0, 0, 1, 1], [], []>} : vector<2x80xbf16>, vector<80x120xbf16>, vector<2x120xf32> -> vector<2x120xf32>
    %139 = arith.addf %131, %138 : vector<2x120xf32>
    %c3_138 = arith.constant 3 : index
    %c0_139 = arith.constant 0 : index
    %c0_140 = arith.constant 0 : index
    %140 = vector.load %arg12[%c3_138, %c0_139, %c0_140] : memref<5x2x10xf32, #tpu.memory_space<vmem>>, vector<1x2x10xf32>
    %141 = vector.shape_cast %140 : vector<1x2x10xf32> to vector<2x10xf32>
    %cst_141 = arith.constant dense<0.000000e+00> : vector<2x80xf32>
    %142 = tpu.matmul %141, %116, %cst_141 {dimension_numbers = #tpu.dot_dimension_numbers<[1], [0], [0], [1], [0, 0, 1, 1], [], []>} : vector<2x10xf32>, vector<10x80xf32>, vector<2x80xf32> -> vector<2x80xf32>
    %c3_142 = arith.constant 3 : index
    %c0_143 = arith.constant 0 : index
    %c0_144 = arith.constant 0 : index
    %143 = vector.load %arg13[%c3_142, %c0_143, %c0_144] : memref<5x80x120xbf16, #tpu.memory_space<vmem>>, vector<1x80x120xbf16>
    %144 = vector.shape_cast %143 : vector<1x80x120xbf16> to vector<80x120xbf16>
    %145 = arith.truncf %142 : vector<2x80xf32> to vector<2x80xbf16>
    %cst_145 = arith.constant dense<0.000000e+00> : vector<2x120xf32>
    %146 = tpu.matmul %145, %144, %cst_145 {dimension_numbers = #tpu.dot_dimension_numbers<[1], [0], [0], [1], [0, 0, 1, 1], [], []>} : vector<2x80xbf16>, vector<80x120xbf16>, vector<2x120xf32> -> vector<2x120xf32>
    %147 = arith.addf %139, %146 : vector<2x120xf32>
    %c4_146 = arith.constant 4 : index
    %c0_147 = arith.constant 0 : index
    %c0_148 = arith.constant 0 : index
    %148 = vector.load %arg12[%c4_146, %c0_147, %c0_148] : memref<5x2x10xf32, #tpu.memory_space<vmem>>, vector<1x2x10xf32>
    %149 = vector.shape_cast %148 : vector<1x2x10xf32> to vector<2x10xf32>
    %cst_149 = arith.constant dense<0.000000e+00> : vector<2x80xf32>
    %150 = tpu.matmul %149, %116, %cst_149 {dimension_numbers = #tpu.dot_dimension_numbers<[1], [0], [0], [1], [0, 0, 1, 1], [], []>} : vector<2x10xf32>, vector<10x80xf32>, vector<2x80xf32> -> vector<2x80xf32>
    %c4_150 = arith.constant 4 : index
    %c0_151 = arith.constant 0 : index
    %c0_152 = arith.constant 0 : index
    %151 = vector.load %arg13[%c4_150, %c0_151, %c0_152] : memref<5x80x120xbf16, #tpu.memory_space<vmem>>, vector<1x80x120xbf16>
    %152 = vector.shape_cast %151 : vector<1x80x120xbf16> to vector<80x120xbf16>
    %153 = arith.truncf %150 : vector<2x80xf32> to vector<2x80xbf16>
    %cst_153 = arith.constant dense<0.000000e+00> : vector<2x120xf32>
    %154 = tpu.matmul %153, %152, %cst_153 {dimension_numbers = #tpu.dot_dimension_numbers<[1], [0], [0], [1], [0, 0, 1, 1], [], []>} : vector<2x80xbf16>, vector<80x120xbf16>, vector<2x120xf32> -> vector<2x120xf32>
    %155 = arith.addf %147, %154 : vector<2x120xf32>
    %c0_154 = arith.constant 0 : index
    %c0_155 = arith.constant 0 : index
    %156 = vector.load %arg14[%c0_154, %c0_155] : memref<1x120xf32, #tpu.memory_space<vmem>>, vector<1x120xf32>
    %157 = vector.broadcast %156 : vector<1x120xf32> to vector<2x120xf32>
    %158 = arith.addf %155, %157 : vector<2x120xf32>
    %cst_156 = arith.constant 0.000000e+00 : f32
    %159 = vector.broadcast %cst_156 : f32 to vector<2x120xf32>
    %160 = arith.maximumf %158, %159 : vector<2x120xf32>
    %c0_157 = arith.constant 0 : index
    %c0_158 = arith.constant 0 : index
    %161 = vector.load %arg15[%c0_157, %c0_158] : memref<120x85xbf16, #tpu.memory_space<vmem>>, vector<120x85xbf16>
    %162 = arith.truncf %160 : vector<2x120xf32> to vector<2x120xbf16>
    %cst_159 = arith.constant dense<0.000000e+00> : vector<2x85xf32>
    %163 = tpu.matmul %162, %161, %cst_159 {dimension_numbers = #tpu.dot_dimension_numbers<[1], [0], [0], [1], [0, 0, 1, 1], [], []>} : vector<2x120xbf16>, vector<120x85xbf16>, vector<2x85xf32> -> vector<2x85xf32>
    %c0_160 = arith.constant 0 : index
    %c0_161 = arith.constant 0 : index
    %164 = vector.load %arg16[%c0_160, %c0_161] : memref<1x85xf32, #tpu.memory_space<vmem>>, vector<1x85xf32>
    %165 = vector.broadcast %164 : vector<1x85xf32> to vector<2x85xf32>
    %166 = arith.addf %163, %165 : vector<2x85xf32>
    %cst_162 = arith.constant 0.000000e+00 : f32
    %167 = vector.broadcast %cst_162 : f32 to vector<2x85xf32>
    %168 = arith.maximumf %166, %167 : vector<2x85xf32>
    %c0_163 = arith.constant 0 : index
    %c0_164 = arith.constant 0 : index
    %169 = vector.load %arg17[%c0_163, %c0_164] : memref<85x10xbf16, #tpu.memory_space<vmem>>, vector<85x10xbf16>
    %170 = arith.truncf %168 : vector<2x85xf32> to vector<2x85xbf16>
    %cst_165 = arith.constant dense<0.000000e+00> : vector<2x10xf32>
    %171 = tpu.matmul %170, %169, %cst_165 {dimension_numbers = #tpu.dot_dimension_numbers<[1], [0], [0], [1], [0, 0, 1, 1], [], []>} : vector<2x85xbf16>, vector<85x10xbf16>, vector<2x10xf32> -> vector<2x10xf32>
    %c0_166 = arith.constant 0 : index
    %c0_167 = arith.constant 0 : index
    %172 = vector.load %arg18[%c0_166, %c0_167] : memref<1x10xf32, #tpu.memory_space<vmem>>, vector<1x10xf32>
    %173 = vector.broadcast %172 : vector<1x10xf32> to vector<2x10xf32>
    %174 = arith.addf %171, %173 : vector<2x10xf32>
    %c0_168 = arith.constant 0 : index
    %c0_169 = arith.constant 0 : index
    %175 = vector.load %arg19[%c0_168, %c0_169] : memref<2x10xf32, #tpu.memory_space<vmem>>, vector<2x10xf32>
    tpu.vector_store %arg19[%c0_168, %c0_169], %174 {strides = array<i32>} : memref<2x10xf32, #tpu.memory_space<vmem>>, vector<2x10xf32>,
    return
  }
  func.func @transform_0(%arg0: i32) -> (i32, i32) {
    %c0_i32 = arith.constant 0 : i32
    %c0_i32_0 = arith.constant 0 : i32
    return %arg0, %c0_i32 : i32, i32
  }
  func.func @transform_1(%arg0: i32) -> (i32, i32, i32) {
    %c0_i32 = arith.constant 0 : i32
    %c0_i32_0 = arith.constant 0 : i32
    %c0_i32_1 = arith.constant 0 : i32
    %c0_i32_2 = arith.constant 0 : i32
    return %c0_i32, %c0_i32_0, %c0_i32_1 : i32, i32, i32
  }
  func.func @transform_2(%arg0: i32) -> (i32, i32, i32) {
    %c0_i32 = arith.constant 0 : i32
    %c0_i32_0 = arith.constant 0 : i32
    %c0_i32_1 = arith.constant 0 : i32
    %c0_i32_2 = arith.constant 0 : i32
    return %c0_i32, %c0_i32_0, %c0_i32_1 : i32, i32, i32
  }
  func.func @transform_3(%arg0: i32) -> (i32, i32) {
    %c0_i32 = arith.constant 0 : i32
    %c0_i32_0 = arith.constant 0 : i32
    %c0_i32_1 = arith.constant 0 : i32
    return %c0_i32, %c0_i32_0 : i32, i32
  }
  func.func @transform_4(%arg0: i32) -> (i32, i32, i32) {
    %c0_i32 = arith.constant 0 : i32
    %c0_i32_0 = arith.constant 0 : i32
    %c0_i32_1 = arith.constant 0 : i32
    %c0_i32_2 = arith.constant 0 : i32
    return %c0_i32, %c0_i32_0, %c0_i32_1 : i32, i32, i32
  }
  func.func @transform_5(%arg0: i32) -> (i32, i32, i32) {
    %c0_i32 = arith.constant 0 : i32
    %c0_i32_0 = arith.constant 0 : i32
    %c0_i32_1 = arith.constant 0 : i32
    %c0_i32_2 = arith.constant 0 : i32
    return %c0_i32, %c0_i32_0, %c0_i32_1 : i32, i32, i32
  }
  func.func @transform_6(%arg0: i32) -> (i32, i32, i32) {
    %c0_i32 = arith.constant 0 : i32
    %c0_i32_0 = arith.constant 0 : i32
    %c0_i32_1 = arith.constant 0 : i32
    %c0_i32_2 = arith.constant 0 : i32
    return %c0_i32, %c0_i32_0, %c0_i32_1 : i32, i32, i32
  }
  func.func @transform_7(%arg0: i32) -> (i32, i32, i32) {
    %c0_i32 = arith.constant 0 : i32
    %c0_i32_0 = arith.constant 0 : i32
    %c0_i32_1 = arith.constant 0 : i32
    %c0_i32_2 = arith.constant 0 : i32
    return %c0_i32, %c0_i32_0, %c0_i32_1 : i32, i32, i32
  }
  func.func @transform_8(%arg0: i32) -> (i32, i32) {
    %c0_i32 = arith.constant 0 : i32
    %c0_i32_0 = arith.constant 0 : i32
    %c0_i32_1 = arith.constant 0 : i32
    return %c0_i32, %c0_i32_0 : i32, i32
  }
  func.func @transform_9(%arg0: i32) -> (i32, i32, i32) {
    %c0_i32 = arith.constant 0 : i32
    %c0_i32_0 = arith.constant 0 : i32
    %c0_i32_1 = arith.constant 0 : i32
    %c0_i32_2 = arith.constant 0 : i32
    return %c0_i32, %c0_i32_0, %c0_i32_1 : i32, i32, i32
  }
  func.func @transform_10(%arg0: i32) -> (i32, i32, i32) {
    %c0_i32 = arith.constant 0 : i32
    %c0_i32_0 = arith.constant 0 : i32
    %c0_i32_1 = arith.constant 0 : i32
    %c0_i32_2 = arith.constant 0 : i32
    return %c0_i32, %c0_i32_0, %c0_i32_1 : i32, i32, i32
  }
  func.func @transform_11(%arg0: i32) -> (i32, i32, i32) {
    %c0_i32 = arith.constant 0 : i32
    %c0_i32_0 = arith.constant 0 : i32
    %c0_i32_1 = arith.constant 0 : i32
    %c0_i32_2 = arith.constant 0 : i32
    return %c0_i32, %c0_i32_0, %c0_i32_1 : i32, i32, i32
  }
  func.func @transform_12(%arg0: i32) -> (i32, i32, i32) {
    %c0_i32 = arith.constant 0 : i32
    %c0_i32_0 = arith.constant 0 : i32
    %c0_i32_1 = arith.constant 0 : i32
    %c0_i32_2 = arith.constant 0 : i32
    return %c0_i32, %c0_i32_0, %c0_i32_1 : i32, i32, i32
  }
  func.func @transform_13(%arg0: i32) -> (i32, i32) {
    %c0_i32 = arith.constant 0 : i32
    %c0_i32_0 = arith.constant 0 : i32
    %c0_i32_1 = arith.constant 0 : i32
    return %c0_i32, %c0_i32_0 : i32, i32
  }
  func.func @transform_14(%arg0: i32) -> (i32, i32) {
    %c0_i32 = arith.constant 0 : i32
    %c0_i32_0 = arith.constant 0 : i32
    %c0_i32_1 = arith.constant 0 : i32
    return %c0_i32, %c0_i32_0 : i32, i32
  }
  func.func @transform_15(%arg0: i32) -> (i32, i32) {
    %c0_i32 = arith.constant 0 : i32
    %c0_i32_0 = arith.constant 0 : i32
    %c0_i32_1 = arith.constant 0 : i32
    return %c0_i32, %c0_i32_0 : i32, i32
  }
  func.func @transform_16(%arg0: i32) -> (i32, i32) {
    %c0_i32 = arith.constant 0 : i32
    %c0_i32_0 = arith.constant 0 : i32
    %c0_i32_1 = arith.constant 0 : i32
    return %c0_i32, %c0_i32_0 : i32, i32
  }
  func.func @transform_17(%arg0: i32) -> (i32, i32) {
    %c0_i32 = arith.constant 0 : i32
    %c0_i32_0 = arith.constant 0 : i32
    %c0_i32_1 = arith.constant 0 : i32
    return %c0_i32, %c0_i32_0 : i32, i32
  }
  func.func @transform_18(%arg0: i32) -> (i32, i32) {
    %c0_i32 = arith.constant 0 : i32
    %c0_i32_0 = arith.constant 0 : i32
    return %arg0, %c0_i32 : i32, i32
  }
}

</mosaic_0001>

<bundles_post_ra>
// kernel: cnn_forward.1
= control target key start
LH: loop header
LB: loop body
LE: loop exit
PB: predicated region body
PF: predicated region fallthrough
CT: control target
= control target key end

     0   :  { %s7998_s0 = inlined_call_operand.vmem [shape: f32[64,96], index: 0, kind: input, shape index: {}]   ;;  %s7999_s1 = inlined_call_operand.vmem [shape: f32[5,56,64], index: 1, kind: input, shape index: {}]   ;;  %s8000_s2 = inlined_call_operand.vmem [shape: bf16[5,96,168], index: 2, kind: input, shape index: {}]   ;;  %s8001_s3 = inlined_call_operand.vmem [shape: f32[1,168], index: 3, kind: input, shape index: {}]   ;;  %s8002_s4 = inlined_call_operand.vmem [shape: f32[2,28,56], index: 4, kind: input, shape index: {}]   ;;  %s8003_s5 = inlined_call_operand.vmem [shape: f32[2,168,84], index: 5, kind: input, shape index: {}]   ;;  %s8004_s6 = inlined_call_operand.vmem [shape: f32[5,20,28], index: 6, kind: input, shape index: {}]   ;;  %s8005_s7 = inlined_call_operand.vmem [shape: bf16[5,84,160], index: 7, kind: input, shape index: {}]   ;;  %s8006_s8 = inlined_call_operand.vmem [shape: f32[1,160], index: 8, kind: input, shape index: {}]   ;;  %s8007_s9 = inlined_call_operand.vmem [shape: f32[2,10,20], index: 9, kind: input, shape index: {}]   ;;  %s8008_s10 = inlined_call_operand.vmem [shape: f32[2,160,80], index: 10, kind: input, shape index: {}]   ;;  %s8009_s11 = inlined_call_operand.vmem [shape: f32[5,2,10], index: 11, kind: input, shape index: {}]   ;;  %s8010_s12 = inlined_call_operand.vmem [shape: bf16[5,80,120], index: 12, kind: input, shape index: {}]   ;;  %s8011_s13 = inlined_call_operand.vmem [shape: f32[1,120], index: 13, kind: input, shape index: {}]   ;;  %s8012_s14 = inlined_call_operand.vmem [shape: bf16[120,85], index: 14, kind: input, shape index: {}]   ;;  %s8013_s15 = inlined_call_operand.vmem [shape: f32[1,85], index: 15, kind: input, shape index: {}]   ;;  %s8014_s16 = inlined_call_operand.vmem [shape: bf16[85,10], index: 16, kind: input, shape index: {}]   ;;  %s8015_s17 = inlined_call_operand.vmem [shape: f32[1,10], index: 17, kind: input, shape index: {}]   ;;  %s8016_s18 = inlined_call_operand.hbm [shape: f32[2,10], index: 18, kind: output, shape index: {}]  }
   0x1   :  { %8020 = sst [smem:[#allocation5_spill]] %s7998_s0 }
   0x2   :  { %8021 = sst [smem:[#allocation6_spill]] %s7999_s1 }
   0x3   :  { %8022 = sst [smem:[#allocation7_spill]] %s8000_s2 }
   0x4   :  { %s8023_s29 = sld [smem:[#allocation5_spill]]  ;;  %v6327_v3 = vmov 0.0|0.0   ;;  %vm6328_vm0 = vmmov 0   ;;  %v6329_v6 = vmov 0.0   ;;  %s8024_s19 = sld [smem:[#allocation6_spill]]  ;;  %vm76_vm1 = vcmask 523264  }
   0x5   :  { %5763 = vmatprep.subr.bf16.mxu1 %v6327_v3  ;;  %5393 = vmatprep.mubr.msk.f32.mxu1 %vm6328_vm0, %v6329_v6  ;;  %s8025_s22 = sld [smem:[#allocation7_spill]] }
   0x6   :  { %5751 = vmatprep.subr.bf16.mxu0 %v6327_v3  ;;  %5356 = vmatprep.mubr.msk.f32.mxu0 %vm6328_vm0, %v6329_v6 }
   0xa   :  { %v61_v0 = vld [vmem:[%s8023_s29] sm:$0xff]  ;;  %v62_v1 = vld [vmem:[%s8023_s29 + $0x8] sm:$0xff]  ;;  %v63_v2 = vld [vmem:[%s8023_s29 + $0x10] sm:$0xff] }
   0xb   :  { %v6439_v4 = vpack.c.bf16 %v62_v1, %v61_v0  ;;  %v64_v5 = vld [vmem:[%s8023_s29 + $0x18] sm:$0xff]  ;;  %v65_v8 = vld [vmem:[%s8023_s29 + $0x20] sm:$0xff]  ;;  %v66_v9 = vld [vmem:[%s8023_s29 + $0x28] sm:$0xff] }
   0xc   :  { %v6450_v7 = vpack.c.bf16 %v64_v5, %v63_v2  ;;  %v6462_v10 = vpack.c.bf16 %v66_v9, %v65_v8  ;;  %v67_v11 = vld [vmem:[%s8023_s29 + $0x30] sm:$0xff]  ;;  %v68_v12 = vld [vmem:[%s8023_s29 + $0x38] sm:$0xff]  ;;  %v69_v15 = vld [vmem:[%s8024_s19] sm:$0xff] }
   0xd   :  { %5765 = vmatpush3.bf16.msra.mxu1 %v6439_v4  ;;  %5753 = vmatpush3.bf16.msra.mxu0 %v6439_v4  ;;  %v6474_v13 = vpack.c.bf16 %v68_v12, %v67_v11  ;;  %v4656_v14 = vld [vmem:[%s8024_s19 + $0x38] sm:$0xff]  ;;  %v6091_v16 = vld [vmem:[%s8025_s22 + $0x64] ss:$8 sps:$4 sm:$0xff]   ;;  %v6089_v17 = vld [vmem:[%s8025_s22 + $0x60] ss:$8 sps:$4 sm:$0xff]  }
   0xe   :  { %5766 = vmatprep.subr.bf16.mxu1 %v6327_v3  ;;  %5754 = vmatprep.subr.bf16.mxu0 %v6327_v3  ;;  %v6094_v18 = vld [vmem:[%s8025_s22 + $0x74] ss:$8 sps:$4 sm:$0xff]   ;;  %v4657_v19 = vld [vmem:[%s8024_s19 + $0x40] sm:$0xff]  ;;  %v70_v20 = vld [vmem:[%s8024_s19 + $0x8] sm:$0xff] }
   0xf   :  { %v6092_v21 = vld [vmem:[%s8025_s22 + $0x70] ss:$8 sps:$4 sm:$0xff]   ;;  %v6097_v22 = vld [vmem:[%s8025_s22 + $0x84] ss:$8 sps:$4 sm:$0xff]   ;;  %v6095_v25 = vld [vmem:[%s8025_s22 + $0x80] ss:$8 sps:$4 sm:$0xff]  }
  0x10   :  { %v4658_v23 = vld [vmem:[%s8024_s19 + $0x48] sm:$0xff]  ;;  %v71_v24 = vld [vmem:[%s8024_s19 + $0x10] sm:$0xff]  ;;  %v72_v28 = vld [vmem:[%s8024_s19 + $0x18] sm:$0xff] }
  0x11   :  { %5768 = vmatpush3.bf16.msra.mxu1 %v6450_v7  ;;  %5756 = vmatpush3.bf16.msra.mxu0 %v6450_v7  ;;  %v6100_v26 = vld [vmem:[%s8025_s22 + $0x94] ss:$8 sps:$4 sm:$0xff]   ;;  %v6098_v29 = vld [vmem:[%s8025_s22 + $0x90] ss:$8 sps:$4 sm:$0xff]   ;;  %v6103_v30 = vld [vmem:[%s8025_s22 + $0xa4] ss:$8 sps:$4 sm:$0xff]  }
  0x12   :  { %5769 = vmatprep.subr.bf16.mxu1 %v6327_v3  ;;  %5757 = vmatprep.subr.bf16.mxu0 %v6327_v3  ;;  %v4659_v27 = vld [vmem:[%s8024_s19 + $0x50] sm:$0xff]  ;;  %v4660_v31 = vld [vmem:[%s8024_s19 + $0x58] sm:$0xff]  ;;  %v73_v32 = vld [vmem:[%s8024_s19 + $0x20] sm:$0xff] }
  0x13   :  { %v6101_v33 = vld [vmem:[%s8025_s22 + $0xa0] ss:$8 sps:$4 sm:$0xff]   ;;  %v75_v37 = vld [vmem:[%s8024_s19 + $0x30] sm:$0xff]  ;;  %v4715_v39 = vld [vmem:[%s8024_s19 + $0x78] sm:$0xff] }
  0x14   :  { %v4661_v34 = vld [vmem:[%s8024_s19 + $0x60] sm:$0xff]  ;;  %v74_v35 = vld [vmem:[%s8024_s19 + $0x28] sm:$0xff]  ;;  %v4714_v38 = vld [vmem:[%s8024_s19 + $0x70] sm:$0xff] }
  0x15   :  { %5771 = vmatpush3.bf16.msra.mxu1 %v6462_v10  ;;  %5759 = vmatpush3.bf16.msra.mxu0 %v6462_v10  ;;  %v4662_v36 = vld [vmem:[%s8024_s19 + $0x68] sm:$0xff]  ;;  %v4716_v40 = vld [vmem:[%s8024_s19 + $0x80] sm:$0xff]  ;;  %v4718_v42 = vld [vmem:[%s8024_s19 + $0x90] sm:$0xff] }
  0x16   :  { %5772 = vmatprep.subr.bf16.mxu1 %v6327_v3  ;;  %5760 = vmatprep.subr.bf16.mxu0 %v6327_v3  ;;  %v4717_v41 = vld [vmem:[%s8024_s19 + $0x88] sm:$0xff]  ;;  %v4719_v43 = vld [vmem:[%s8024_s19 + $0x98] sm:$0xff]  ;;  %v4720_v44 = vld [vmem:[%s8024_s19 + $0xa0] sm:$0xff] }
  0x17   :  { %v4756_v45 = vld [vmem:[%s8024_s19 + $0xa8] sm:$0xff]  ;;  %v4757_v46 = vld [vmem:[%s8024_s19 + $0xb0] sm:$0xff]  ;;  %v4758_v47 = vld [vmem:[%s8024_s19 + $0xb8] sm:$0xff] }
  0x19   :  { %5774 = vmatpush3.bf16.msra.mxu1 %v6474_v13  ;;  %5762 = vmatpush3.bf16.msra.mxu0 %v6474_v13 }
  0x1a   :  { %5775 = vmatprep.subr.bf16.mxu1 %v6327_v3  ;;  %433 = vmatprep.subr.bf16.mxu0 %v6091_v16 }
  0x1c   :  { %5394 = vmatmul.mubr.msk.f32.vlgmr.msra.gmra.mrb[0].mxu1 %vm76_vm1, %v4656_v14  ;;  %5357 = vmatmul.mubr.msk.f32.vlgmr.msra.gmra.mrb[0].mxu0 %vm76_vm1, %v69_v15 }
  0x1d   :  { %5396 = vmatprep.mubr.msk.f32.mxu1 %vm6328_vm0, %v6329_v6  ;;  %5359 = vmatprep.mubr.msk.f32.mxu0 %vm6328_vm0, %v6329_v6 }
  0x1e   :  { %5777 = vmatpush3.bf16.msra.mxu1 %v6439_v4  ;;  %434 = vmatpush1.bf16.msra.mxu0 %v6089_v17 }
  0x1f   :  { %5778 = vmatprep.subr.bf16.mxu1 %v6327_v3  ;;  %435 = vmatprep.subr.bf16.mxu0 %v6094_v18 }
  0x20   :  { %5397 = vmatmul.mubr.msk.f32.gmra.mrb[2].mxu1 %vm76_vm1, %v4657_v19  ;;  %5360 = vmatmul.mubr.msk.f32.gmra.mrb[2].mxu0 %vm76_vm1, %v70_v20 }
  0x21   :  { %5399 = vmatprep.mubr.msk.f32.mxu1 %vm6328_vm0, %v6329_v6  ;;  %5362 = vmatprep.mubr.msk.f32.mxu0 %vm6328_vm0, %v6329_v6 }
  0x22   :  { %5780 = vmatpush3.bf16.msra.mxu1 %v6450_v7  ;;  %436 = vmatpush1.bf16.msra.mxu0 %v6092_v21 }
  0x23   :  { %5781 = vmatprep.subr.bf16.mxu1 %v6327_v3  ;;  %437 = vmatprep.subr.bf16.mxu0 %v6097_v22 }
  0x24   :  { %5400 = vmatmul.mubr.msk.f32.gmra.mrb[4].mxu1 %vm76_vm1, %v4658_v23  ;;  %5363 = vmatmul.mubr.msk.f32.gmra.mrb[4].mxu0 %vm76_vm1, %v71_v24 }
  0x25   :  { %5402 = vmatprep.mubr.msk.f32.mxu1 %vm6328_vm0, %v6329_v6  ;;  %5365 = vmatprep.mubr.msk.f32.mxu0 %vm6328_vm0, %v6329_v6 }
  0x26   :  { %5783 = vmatpush3.bf16.msra.mxu1 %v6462_v10  ;;  %438 = vmatpush1.bf16.msra.mxu0 %v6095_v25 }
  0x27   :  { %5784 = vmatprep.subr.bf16.mxu1 %v6327_v3  ;;  %439 = vmatprep.subr.bf16.mxu0 %v6100_v26 }
  0x28   :  { %5403 = vmatmul.mubr.msk.f32.gmra.mrb[6].mxu1 %vm76_vm1, %v4659_v27  ;;  %5366 = vmatmul.mubr.msk.f32.gmra.mrb[6].mxu0 %vm76_vm1, %v72_v28 }
  0x29   :  { %5405 = vmatprep.mubr.msk.f32.mxu1 %vm6328_vm0, %v6329_v6  ;;  %5368 = vmatprep.mubr.msk.f32.mxu0 %vm6328_vm0, %v6329_v6 }
  0x2a   :  { %5786 = vmatpush3.bf16.msra.mxu1 %v6474_v13  ;;  %440 = vmatpush1.bf16.msra.mxu0 %v6098_v29 }
  0x2b   :  { %5787 = vmatprep.subr.bf16.mxu1 %v6327_v3  ;;  %441 = vmatprep.subr.bf16.mxu0 %v6103_v30 }
  0x2c   :  { %5406 = vmatmul.mubr.msk.f32.gmra.mrb[8].mxu1 %vm76_vm1, %v4660_v31  ;;  %5369 = vmatmul.mubr.msk.f32.gmra.mrb[8].mxu0 %vm76_vm1, %v73_v32 }
  0x2d   :  { %5408 = vmatprep.mubr.msk.f32.mxu1 %vm6328_vm0, %v6329_v6  ;;  %5371 = vmatprep.mubr.msk.f32.mxu0 %vm6328_vm0, %v6329_v6 }
  0x2e   :  { %442 = vmatpush1.bf16.msra.mxu0 %v6101_v33 }
  0x30   :  { %5409 = vmatmul.mubr.msk.f32.gmra.mrb[10].mxu1 %vm76_vm1, %v4661_v34  ;;  %5372 = vmatmul.mubr.msk.f32.gmra.mrb[10].mxu0 %vm76_vm1, %v74_v35 }
  0x31   :  { %5411 = vmatprep.mubr.msk.f32.mxu1 %vm6328_vm0, %v6329_v6  ;;  %5374 = vmatprep.mubr.msk.f32.mxu0 %vm6328_vm0, %v6329_v6 }
  0x34   :  { %5412 = vmatmul.mubr.msk.f32.gmra.mrb[12].mxu1 %vm76_vm1, %v4662_v36  ;;  %5375 = vmatmul.mubr.msk.f32.gmra.mrb[12].mxu0 %vm76_vm1, %v75_v37 }
  0x35   :  { %5430 = vmatprep.mubr.msk.f32.mxu1 %vm6328_vm0, %v6329_v6 }
  0x38   :  { %5431 = vmatmul.mubr.msk.f32.vlgmr.msra.gmra.mrb[14].mxu1 %vm76_vm1, %v4714_v38 }
  0x39   :  { %5433 = vmatprep.mubr.msk.f32.mxu1 %vm6328_vm0, %v6329_v6  ;;  %5789 = vmatpush3.bf16.msra.mxu1 %v6439_v4 }
  0x3a   :  { %5790 = vmatprep.subr.bf16.mxu1 %v6327_v3 }
  0x3c   :  { %5434 = vmatmul.mubr.msk.f32.gmra.mrb[16].mxu1 %vm76_vm1, %v4715_v39 }
  0x3d   :  { %5436 = vmatprep.mubr.msk.f32.mxu1 %vm6328_vm0, %v6329_v6  ;;  %5792 = vmatpush3.bf16.msra.mxu1 %v6450_v7 }
  0x3e   :  { %5793 = vmatprep.subr.bf16.mxu1 %v6327_v3 }
  0x40   :  { %5437 = vmatmul.mubr.msk.f32.gmra.mrb[18].mxu1 %vm76_vm1, %v4716_v40 }
  0x41   :  { %5439 = vmatprep.mubr.msk.f32.mxu1 %vm6328_vm0, %v6329_v6  ;;  %5795 = vmatpush3.bf16.msra.mxu1 %v6462_v10 }
  0x42   :  { %5796 = vmatprep.subr.bf16.mxu1 %v6327_v3 }
  0x44   :  { %5440 = vmatmul.mubr.msk.f32.gmra.mrb[20].mxu1 %vm76_vm1, %v4717_v41 }
  0x45   :  { %5442 = vmatprep.mubr.msk.f32.mxu1 %vm6328_vm0, %v6329_v6  ;;  %5798 = vmatpush3.bf16.msra.mxu1 %v6474_v13 }
  0x46   :  { %5799 = vmatprep.subr.bf16.mxu1 %v6327_v3 }
  0x48   :  { %5443 = vmatmul.mubr.msk.f32.gmra.mrb[22].mxu1 %vm76_vm1, %v4718_v42 }
  0x49   :  { %5445 = vmatprep.mubr.msk.f32.mxu1 %vm6328_vm0, %v6329_v6 }
  0x4c   :  { %5446 = vmatmul.mubr.msk.f32.gmra.mrb[24].mxu1 %vm76_vm1, %v4719_v43 }
  0x4d   :  { %5448 = vmatprep.mubr.msk.f32.mxu1 %vm6328_vm0, %v6329_v6 }
  0x50   :  { %5449 = vmatmul.mubr.msk.f32.gmra.mrb[26].mxu1 %vm76_vm1, %v4720_v44 }
  0x51   :  { %5467 = vmatprep.mubr.msk.f32.mxu1 %vm6328_vm0, %v6329_v6 }
  0x54   :  { %5468 = vmatmul.mubr.msk.f32.vlgmr.msra.gmra.mrb[28].mxu1 %vm76_vm1, %v4756_v45 }
  0x55   :  { %5470 = vmatprep.mubr.msk.f32.mxu1 %vm6328_vm0, %v6329_v6  ;;  %5801 = vmatpush3.bf16.msra.mxu1 %v6439_v4 }
  0x56   :  { %5802 = vmatprep.subr.bf16.mxu1 %v6327_v3 }
  0x58   :  { %5471 = vmatmul.mubr.msk.f32.gmra.mrb[30].mxu1 %vm76_vm1, %v4757_v46 }
  0x59   :  { %5473 = vmatprep.mubr.msk.f32.mxu1 %vm6328_vm0, %v6329_v6  ;;  %5804 = vmatpush3.bf16.msra.mxu1 %v6450_v7 }
  0x5a   :  { %23 = vsyncpa [#allocation3], 0  ;;  %5805 = vmatprep.subr.bf16.mxu1 %v6327_v3  ;;  %v4759_v48 = vld [vmem:[%s8024_s19 + $0xc0] sm:$0xff]  ;;  %v4760_v49 = vld [vmem:[%s8024_s19 + $0xc8] sm:$0xff]  ;;  %v6330_v57 = vmov 0   ;;  %vm420_vm2 = vcmask 785408  }
  0x5b   :  { %v4761_v50 = vld [vmem:[%s8024_s19 + $0xd0] sm:$0xff]  ;;  %v4762_v51 = vld [vmem:[%s8024_s19 + $0xd8] sm:$0xff]  ;;  %v4798_v52 = vld [vmem:[%s8024_s19 + $0xe0] sm:$0xff]  ;;  %465 = vmatprep.mubr.bf16.mxu0 %v6330_v57  ;;  %vm1600_vm3 = vcmask 457728   ;;  %vm1837_vm4 = vcmask 326656   ;;  %vm2059_vm5 = vcmask 1043456  }
  0x5c   :  { %5474 = vmatmul.mubr.msk.f32.gmra.mrb[32].mxu1 %vm76_vm1, %v4758_v47  ;;  %v6104_v53 = vld [vmem:[%s8025_s22 + $0xb0] ss:$8 sps:$4 sm:$0xff]   ;;  %v6106_v54 = vld [vmem:[%s8025_s22 + $0xb4] ss:$8 sps:$4 sm:$0xff]   ;;  %v4799_v55 = vld [vmem:[%s8024_s19 + $0xe8] sm:$0xff]  ;;  %vm6331_vm6 = vmmov 1  }
  0x5d   :  { %5476 = vmatprep.mubr.msk.f32.mxu1 %vm6328_vm0, %v6329_v6  ;;  %5807 = vmatpush3.bf16.msra.mxu1 %v6462_v10  ;;  %v4800_v56 = vld [vmem:[%s8024_s19 + $0xf0] sm:$0xff]  ;;  %v4801_v58 = vld [vmem:[%s8024_s19 + $0xf8] sm:$0xff]  ;;  %v6109_v59 = vld [vmem:[%s8025_s22 + $0x4] ss:$8 sps:$4 sm:$0xff]   ;;  %vm2049_vm8 = vcmask 228352   ;;  %vm2325_vm9 = vcmask 1041408  }
  0x5e   :  { %5808 = vmatprep.subr.bf16.mxu1 %v6327_v3  ;;  %443 = vmatprep.subr.bf16.mxu0 %v6106_v54  ;;  %v4802_v60 = vld [vmem:[%s8024_s19 + $0x100] sm:$0xff]  ;;  %v4803_v61 = vld [vmem:[%s8024_s19 + $0x108] sm:$0xff]  ;;  %v4804_v62 = vld [vmem:[%s8024_s19 + $0x110] sm:$0xff]  ;;  %vm2318_vm10 = vcmask 687104   ;;  %vm3220_vm11 = vcmask 162816   ;;  %vm3420_vm12 = vcmask 261120  }
  0x5f   :  { %444 = vmatpush1.bf16.msra.mxu0 %v6104_v53  ;;  %v6107_v5 = vld [vmem:[%s8025_s22] ss:$8 sps:$4 sm:$0xff]   ;;  %v6112_v10 = vld [vmem:[%s8025_s22 + $0x14] ss:$8 sps:$4 sm:$0xff]   ;;  %v6110_v14 = vld [vmem:[%s8025_s22 + $0x10] ss:$8 sps:$4 sm:$0xff]  }
  0x60   :  { %5477 = vmatmul.mubr.msk.f32.gmra.mrb[34].mxu1 %vm76_vm1, %v4759_v48  ;;  %576 = vmatprep.subr.bf16.mxu0 %v6109_v59  ;;  %v6115_v17 = vld [vmem:[%s8025_s22 + $0x24] ss:$8 sps:$4 sm:$0xff]   ;;  %v6113_v20 = vld [vmem:[%s8025_s22 + $0x20] ss:$8 sps:$4 sm:$0xff]   ;;  %v6118_v24 = vld [vmem:[%s8025_s22 + $0x34] ss:$8 sps:$4 sm:$0xff]  }
  0x61   :  { %5479 = vmatprep.mubr.msk.f32.mxu1 %vm6328_vm0, %v6329_v6  ;;  %5810 = vmatpush3.bf16.msra.mxu1 %v6474_v13  ;;  %v6116_v28 = vld [vmem:[%s8025_s22 + $0x30] ss:$8 sps:$4 sm:$0xff]   ;;  %v6121_v31 = vld [vmem:[%s8025_s22 + $0x44] ss:$8 sps:$4 sm:$0xff]   ;;  %v6119_v34 = vld [vmem:[%s8025_s22 + $0x40] ss:$8 sps:$4 sm:$0xff]  }
  0x62   :  { %v6124_v38 = vld [vmem:[%s8025_s22 + $0x54] ss:$8 sps:$4 sm:$0xff]   ;;  %v6122_v42 = vld [vmem:[%s8025_s22 + $0x50] ss:$8 sps:$4 sm:$0xff]   ;;  %v6127_v45 = vld [vmem:[%s8025_s22 + $0xc4] ss:$8 sps:$4 sm:$0xff]  }
  0x63   :  { %v6125_v53 = vld [vmem:[%s8025_s22 + $0xc0] ss:$8 sps:$4 sm:$0xff]   ;;  %vm7232_vm7 = vmpackc.low %vm2059_vm5, %vm6331_vm6  ;;  %vm3601_vm14 = vcmask 80896   ;;  %vm3806_vm15 = vcmask 654336  }
  0x64   :  { %5480 = vmatmul.mubr.msk.f32.gmra.mrb[36].mxu1 %vm76_vm1, %v4760_v49  ;;  %vm7750_vm13 = vmpackc.low %vm2325_vm9, %vm6331_vm6 }
  0x65   :  { %5482 = vmatprep.mubr.msk.f32.mxu1 %vm6328_vm0, %v6329_v6 }
  0x68   :  { %5483 = vmatmul.mubr.msk.f32.gmra.mrb[38].mxu1 %vm76_vm1, %v4761_v50 }
  0x69   :  { %5485 = vmatprep.mubr.msk.f32.mxu1 %vm6328_vm0, %v6329_v6 }
  0x6c   :  { %5486 = vmatmul.mubr.msk.f32.gmra.mrb[40].mxu1 %vm76_vm1, %v4762_v51 }
  0x6d   :  { %5504 = vmatprep.mubr.msk.f32.mxu1 %vm6328_vm0, %v6329_v6 }
  0x70   :  { %5505 = vmatmul.mubr.msk.f32.vlgmr.msra.gmra.mrb[42].mxu1 %vm76_vm1, %v4798_v52 }
  0x71   :  { %5507 = vmatprep.mubr.msk.f32.mxu1 %vm6328_vm0, %v6329_v6 }
  0x74   :  { %5508 = vmatmul.mubr.msk.f32.gmra.mrb[44].mxu1 %vm76_vm1, %v4799_v55  ;;  %v6130_v55 = vld [vmem:[%s8025_s22 + $0xd4] ss:$8 sps:$4 sm:$0xff]  }
  0x75   :  { %5510 = vmatprep.mubr.msk.f32.mxu1 %vm6328_vm0, %v6329_v6 }
  0x78   :  { %5511 = vmatmul.mubr.msk.f32.gmra.mrb[46].mxu1 %vm76_vm1, %v4800_v56 }
  0x79   :  { %5513 = vmatprep.mubr.msk.f32.mxu1 %vm6328_vm0, %v6329_v6 }
  0x7c   :  { %5514 = vmatmul.mubr.msk.f32.gmra.mrb[48].mxu1 %vm76_vm1, %v4801_v58  ;;  %v6128_v58 = vld [vmem:[%s8025_s22 + $0xd0] ss:$8 sps:$4 sm:$0xff]  }
  0x7d   :  { %5516 = vmatprep.mubr.msk.f32.mxu1 %vm6328_vm0, %v6329_v6 }
  0x80   :  { %5517 = vmatmul.mubr.msk.f32.gmra.mrb[50].mxu1 %vm76_vm1, %v4802_v60  ;;  %v6133_v60 = vld [vmem:[%s8025_s22 + $0xe4] ss:$8 sps:$4 sm:$0xff]  }
  0x81   :  { %5519 = vmatprep.mubr.msk.f32.mxu1 %vm6328_vm0, %v6329_v6 }
  0x84   :  { %5520 = vmatmul.mubr.msk.f32.gmra.mrb[52].mxu1 %vm76_vm1, %v4803_v61 }
  0x85   :  { %5522 = vmatprep.mubr.msk.f32.mxu1 %vm6328_vm0, %v6329_v6 }
  0x88   :  { %5523 = vmatmul.mubr.msk.f32.gmra.mrb[54].mxu1 %vm76_vm1, %v4804_v62  ;;  %vm4587_vm1 = vcmask 1042432  }
  0x89   :  { %1677 = vmatprep.mubr.f32.mxu1 %v6329_v6 }
  0xef   :  { %v309_v63 = vpop.f32.mrb[0].mxu1  ;;  %v6752_v0 = vpop.f32.mrb[0].mxu0 }
  0xf0   :  { %v5395_v1 = vpop.f32.mrb[1].mxu1  ;;  %v5358_v2 = vpop.f32.mrb[1].mxu0 }
  0xf1   :  { %v6136_v1 = vld [vmem:[%s8025_s22 + $0xf4] ss:$8 sps:$4 sm:$0xff]  }
  0xf3   :  { %v314_v4 = vpop.f32.mrb[2].mxu1  ;;  %v6757_v7 = vpop.f32.mrb[2].mxu0 }
  0xf4   :  { %v356_v8 = vpack.c.bf16 %v314_v4, %v309_v63  ;;  %v5398_v9 = vpop.f32.mrb[3].mxu1  ;;  %v210_v11 = vpack.c.bf16 %v6757_v7, %v6752_v0  ;;  %v5361_v12 = vpop.f32.mrb[3].mxu0  ;;  %v6131_v63 = vld [vmem:[%s8025_s22 + $0xe0] ss:$8 sps:$4 sm:$0xff]   ;;  %v6134_v4 = vld [vmem:[%s8025_s22 + $0xf0] ss:$8 sps:$4 sm:$0xff]  }
  0xf5   :  { %v6139_v7 = vld [vmem:[%s8025_s22 + $0x104] ss:$8 sps:$4 sm:$0xff]   ;;  %v6142_v12 = vld [vmem:[%s8025_s22 + $0x114] ss:$8 sps:$4 sm:$0xff]  }
  0xf6   :  { %4694 = vmatmul.mubr.msk.bf16.vlgmr.msra.gmra.mrb[16].mxu0 %vm420_vm2, %v356_v8 }
  0xf7   :  { %v319_v13 = vpop.f32.mrb[4].mxu1  ;;  %475 = vmatprep.mubr.bf16.mxu0 %v6330_v57  ;;  %577 = vmatpush1.bf16.msra.mxu0 %v6107_v5  ;;  %v6769_v15 = vpop.f32.mrb[4].mxu0 }
  0xf8   :  { %v5401_v16 = vpop.f32.mrb[5].mxu1  ;;  %578 = vmatprep.subr.bf16.mxu0 %v6112_v10  ;;  %v5364_v18 = vpop.f32.mrb[5].mxu0  ;;  %v6137_v10 = vld [vmem:[%s8025_s22 + $0x100] ss:$8 sps:$4 sm:$0xff]  }
  0xf9   :  { %v6145_v16 = vld [vmem:[%s8025_s22 + $0x124] ss:$8 sps:$4 sm:$0xff]  }
  0xfb   :  { %v324_v19 = vpop.f32.mrb[6].mxu1  ;;  %579 = vmatpush1.bf16.msra.mxu0 %v6110_v14  ;;  %v6777_v21 = vpop.f32.mrb[6].mxu0  ;;  %v6140_v14 = vld [vmem:[%s8025_s22 + $0x110] ss:$8 sps:$4 sm:$0xff]  }
  0xfc   :  { %v357_v22 = vpack.c.bf16 %v324_v19, %v319_v13  ;;  %v5404_v23 = vpop.f32.mrb[7].mxu1  ;;  %580 = vmatprep.subr.bf16.mxu0 %v6115_v17  ;;  %v211_v25 = vpack.c.bf16 %v6777_v21, %v6769_v15  ;;  %v5367_v26 = vpop.f32.mrb[7].mxu0 }
  0xfd   :  { %v6148_v26 = vld [vmem:[%s8025_s22 + $0x134] ss:$8 sps:$4 sm:$0xff]  }
  0xfe   :  { %4695 = vmatmul.mubr.msk.bf16.gmra.mrb[20].mxu0 %vm420_vm2, %v357_v22 }
  0xff   :  { %v329_v27 = vpop.f32.mrb[8].mxu1  ;;  %485 = vmatprep.mubr.bf16.mxu0 %v6330_v57  ;;  %581 = vmatpush1.bf16.msra.mxu0 %v6113_v20  ;;  %v6789_v29 = vpop.f32.mrb[8].mxu0 }
 0x100   :  { %v5407_v30 = vpop.f32.mrb[9].mxu1  ;;  %582 = vmatprep.subr.bf16.mxu0 %v6118_v24  ;;  %v5370_v32 = vpop.f32.mrb[9].mxu0  ;;  %v6143_v24 = vld [vmem:[%s8025_s22 + $0x120] ss:$8 sps:$4 sm:$0xff]  }
 0x103   :  { %v334_v33 = vpop.f32.mrb[10].mxu1  ;;  %583 = vmatpush1.bf16.msra.mxu0 %v6116_v28  ;;  %v189_v35 = vpop.f32.mrb[10].mxu0 }
 0x104   :  { %v358_v36 = vpack.c.bf16 %v334_v33, %v329_v27  ;;  %v5410_v37 = vpop.f32.mrb[11].mxu1  ;;  %584 = vmatprep.subr.bf16.mxu0 %v6121_v31  ;;  %v212_v39 = vpack.c.bf16 %v189_v35, %v6789_v29  ;;  %v5373_v40 = vpop.f32.mrb[11].mxu0  ;;  %v6146_v29 = vld [vmem:[%s8025_s22 + $0x130] ss:$8 sps:$4 sm:$0xff]   ;;  %v6151_v31 = vld [vmem:[%s8025_s22 + $0x144] ss:$8 sps:$4 sm:$0xff]  }
 0x105   :  { %v6149_v33 = vld [vmem:[%s8025_s22 + $0x140] ss:$8 sps:$4 sm:$0xff]   ;;  %v6154_v35 = vld [vmem:[%s8025_s22 + $0x154] ss:$8 sps:$4 sm:$0xff]   ;;  %v6157_v40 = vld [vmem:[%s8025_s22 + $0x164] ss:$8 sps:$4 sm:$0xff]  }
 0x106   :  { %4696 = vmatmul.mubr.msk.bf16.gmra.mrb[24].mxu0 %vm420_vm2, %v358_v36 }
 0x107   :  { %v339_v41 = vpop.f32.mrb[12].mxu1  ;;  %495 = vmatprep.mubr.bf16.mxu0 %v6330_v57  ;;  %585 = vmatpush1.bf16.msra.mxu0 %v6119_v34  ;;  %v6806_v43 = vpop.f32.mrb[12].mxu0 }
 0x108   :  { %v5413_v44 = vpop.f32.mrb[13].mxu1  ;;  %586 = vmatprep.subr.bf16.mxu0 %v6124_v38  ;;  %v5376_v46 = vpop.f32.mrb[13].mxu0  ;;  %v359_v47 = vpack.c.bf16 %v339_v41, %v339_v41  ;;  %v213_v18 = vpack.c.bf16 %v6806_v43, %v6806_v43  ;;  %v6152_v38 = vld [vmem:[%s8025_s22 + $0x150] ss:$8 sps:$4 sm:$0xff]  }
 0x109   :  { %v6160_v44 = vld [vmem:[%s8025_s22 + $0x174] ss:$8 sps:$4 sm:$0xff]   ;;  %v6158_v46 = vld [vmem:[%s8025_s22 + $0x170] ss:$8 sps:$4 sm:$0xff]  }
 0x10b   :  { %587 = vmatpush1.bf16.msra.mxu0 %v6122_v42  ;;  %v6811_v48 = vpop.f32.mrb[14].mxu1  ;;  %v6155_v42 = vld [vmem:[%s8025_s22 + $0x160] ss:$8 sps:$4 sm:$0xff]  }
 0x10c   :  { %865 = vmatprep.subr.bf16.mxu0 %v6127_v45  ;;  %v5432_v49 = vpop.f32.mrb[15].mxu1 }
 0x10e   :  { %4697 = vmatmul.mubr.msk.bf16.gmra.mrb[28].mxu0 %vm420_vm2, %v359_v47 }
 0x10f   :  { %608 = vmatprep.mubr.bf16.mxu0 %v6330_v57  ;;  %v747_v50 = vpop.f32.mrb[16].mxu1 }
 0x110   :  { %v789_v51 = vpack.c.bf16 %v747_v50, %v6811_v48  ;;  %v5435_v52 = vpop.f32.mrb[17].mxu1  ;;  %v6163_v48 = vld [vmem:[%s8025_s22 + $0x184] ss:$8 sps:$4 sm:$0xff]  }
 0x113   :  { %v6819_v54 = vpop.f32.mrb[18].mxu1 }
 0x114   :  { %v5438_v56 = vpop.f32.mrb[19].mxu1 }
 0x116   :  { %4710 = vmatmul.mubr.msk.bf16.vlgmr.msra.gmra.mrb[16].mxu0 %vm420_vm2, %v210_v11 }
 0x117   :  { %618 = vmatprep.mubr.bf16.mxu0 %v6330_v57  ;;  %866 = vmatpush1.bf16.msra.mxu0 %v6125_v53  ;;  %v6832_v59 = vpop.f32.mrb[20].mxu1 }
 0x118   :  { %867 = vmatprep.subr.bf16.mxu0 %v6130_v55  ;;  %v790_v61 = vpack.c.bf16 %v6832_v59, %v6819_v54  ;;  %v5441_v62 = vpop.f32.mrb[21].mxu1 }
 0x119   :  { %v6164_v62 = vld [vmem:[%s8025_s22 + $0x190] ss:$8 sps:$4 sm:$0xff]  }
 0x11b   :  { %868 = vmatpush1.bf16.msra.mxu0 %v6128_v58  ;;  %v6842_v0 = vpop.f32.mrb[22].mxu1  ;;  %v6161_v58 = vld [vmem:[%s8025_s22 + $0x180] ss:$8 sps:$4 sm:$0xff]  }
 0x11c   :  { %869 = vmatprep.subr.bf16.mxu0 %v6133_v60  ;;  %v5444_v2 = vpop.f32.mrb[23].mxu1  ;;  %v6166_v60 = vld [vmem:[%s8025_s22 + $0x194] ss:$8 sps:$4 sm:$0xff]  }
 0x11e   :  { %4711 = vmatmul.mubr.msk.bf16.gmra.mrb[20].mxu0 %vm420_vm2, %v211_v25 }
 0x11f   :  { %628 = vmatprep.mubr.bf16.mxu0 %v6330_v57  ;;  %870 = vmatpush1.bf16.msra.mxu0 %v6131_v63  ;;  %v6852_v5 = vpop.f32.mrb[24].mxu1 }
 0x120   :  { %871 = vmatprep.subr.bf16.mxu0 %v6136_v1  ;;  %v791_v8 = vpack.c.bf16 %v6852_v5, %v6842_v0  ;;  %v5447_v9 = vpop.f32.mrb[25].mxu1  ;;  %v6169_v0 = vld [vmem:[%s8025_s22 + $0x1a4] ss:$8 sps:$4 sm:$0xff]  }
 0x121   :  { %v6170_v9 = vld [vmem:[%s8025_s22 + $0x1b0] ss:$8 sps:$4 sm:$0xff]  }
 0x123   :  { %872 = vmatpush1.bf16.msra.mxu0 %v6134_v4  ;;  %v6862_v11 = vpop.f32.mrb[26].mxu1  ;;  %v6167_v4 = vld [vmem:[%s8025_s22 + $0x1a0] ss:$8 sps:$4 sm:$0xff]  }
 0x124   :  { %873 = vmatprep.subr.bf16.mxu0 %v6139_v7  ;;  %v5450_v13 = vpop.f32.mrb[27].mxu1  ;;  %v6172_v7 = vld [vmem:[%s8025_s22 + $0x1b4] ss:$8 sps:$4 sm:$0xff]  }
 0x125   :  { %v6176_v13 = vld [vmem:[%s8025_s22 + $0x1d0] ss:$8 sps:$4 sm:$0xff]  }
 0x126   :  { %4712 = vmatmul.mubr.msk.bf16.gmra.mrb[24].mxu0 %vm420_vm2, %v212_v39 }
 0x127   :  { %638 = vmatprep.mubr.bf16.mxu0 %v6330_v57  ;;  %874 = vmatpush1.bf16.msra.mxu0 %v6137_v10  ;;  %v6872_v15 = vpop.f32.mrb[28].mxu1  ;;  %v6175_v10 = vld [vmem:[%s8025_s22 + $0x1c4] ss:$8 sps:$4 sm:$0xff]  }
 0x128   :  { %875 = vmatprep.subr.bf16.mxu0 %v6142_v12  ;;  %v5469_v17 = vpop.f32.mrb[29].mxu1  ;;  %v6178_v12 = vld [vmem:[%s8025_s22 + $0x1d4] ss:$8 sps:$4 sm:$0xff]  }
 0x12b   :  { %876 = vmatpush1.bf16.msra.mxu0 %v6140_v14  ;;  %v6879_v19 = vpop.f32.mrb[30].mxu1 }
 0x12c   :  { %1168 = vmatprep.subr.bf16.mxu0 %v6145_v16  ;;  %v1092_v20 = vpack.c.bf16 %v6879_v19, %v6872_v15  ;;  %v5472_v21 = vpop.f32.mrb[31].mxu1 }
 0x12e   :  { %4713 = vmatmul.mubr.msk.bf16.gmra.mrb[32].mxu0 %vm420_vm2, %v213_v18 }
 0x12f   :  { %897 = vmatprep.mubr.bf16.mxu0 %v6330_v57  ;;  %v6885_v22 = vpop.f32.mrb[32].mxu1 }
 0x130   :  { %v5475_v23 = vpop.f32.mrb[33].mxu1 }
 0x133   :  { %v6890_v25 = vpop.f32.mrb[34].mxu1 }
 0x134   :  { %v1093_v27 = vpack.c.bf16 %v6890_v25, %v6885_v22  ;;  %v5478_v28 = vpop.f32.mrb[35].mxu1 }
 0x136   :  { %4752 = vmatmul.mubr.msk.bf16.vlgmr.msra.gmra.mrb[16].mxu0 %vm420_vm2, %v789_v51  ;;  %v792_v51 = vpack.c.bf16 %v6862_v11, %v6862_v11  ;;  %v6173_v11 = vld [vmem:[%s8025_s22 + $0x1c0] ss:$8 sps:$4 sm:$0xff]  }
 0x137   :  { %907 = vmatprep.mubr.bf16.mxu0 %v6330_v57  ;;  %1169 = vmatpush1.bf16.msra.mxu0 %v6143_v24  ;;  %v6902_v30 = vpop.f32.mrb[36].mxu1 }
 0x138   :  { %1170 = vmatprep.subr.bf16.mxu0 %v6148_v26  ;;  %v5481_v32 = vpop.f32.mrb[37].mxu1  ;;  %v4856_v26 = vld [vmem:[%s8003_s5 + $0xa8] sm:$0xff] }
 0x139   :  { %v4860_v32 = vld [vmem:[%s8003_s5 + $0xc8] sm:$0xff] }
 0x13b   :  { %1171 = vmatpush1.bf16.msra.mxu0 %v6146_v29  ;;  %v6910_v34 = vpop.f32.mrb[38].mxu1  ;;  %v4858_v29 = vld [vmem:[%s8003_s5 + $0xb8] sm:$0xff] }
 0x13c   :  { %1172 = vmatprep.subr.bf16.mxu0 %v6151_v31  ;;  %v1094_v36 = vpack.c.bf16 %v6910_v34, %v6902_v30  ;;  %v5484_v37 = vpop.f32.mrb[39].mxu1  ;;  %v4859_v30 = vld [vmem:[%s8003_s5 + $0xc0] sm:$0xff] }
 0x13d   :  { %v5869_v31 = vpack.c.bf16 %v4859_v30, %v4858_v29 }
 0x13e   :  { %4753 = vmatmul.mubr.msk.bf16.gmra.mrb[20].mxu0 %vm420_vm2, %v790_v61 }
 0x13f   :  { %917 = vmatprep.mubr.bf16.mxu0 %v6330_v57  ;;  %1173 = vmatpush1.bf16.msra.mxu0 %v6149_v33  ;;  %v6922_v39 = vpop.f32.mrb[40].mxu1  ;;  %v4861_v33 = vld [vmem:[%s8003_s5 + $0xd0] sm:$0xff] }
 0x140   :  { %1174 = vmatprep.subr.bf16.mxu0 %v6154_v35  ;;  %v5487_v41 = vpop.f32.mrb[41].mxu1  ;;  %v1095_v14 = vpack.c.bf16 %v6922_v39, %v6922_v39  ;;  %v5872_v34 = vpack.c.bf16 %v4861_v33, %v4860_v32  ;;  %v4862_v35 = vld [vmem:[%s8003_s5 + $0xd8] sm:$0xff]  ;;  %v4865_v39 = vld [vmem:[%s8003_s5 + $0xf0] sm:$0xff] }
 0x143   :  { %1175 = vmatpush1.bf16.msra.mxu0 %v6152_v38  ;;  %v6930_v43 = vpop.f32.mrb[42].mxu1  ;;  %v4864_v38 = vld [vmem:[%s8003_s5 + $0xe8] sm:$0xff] }
 0x144   :  { %1176 = vmatprep.subr.bf16.mxu0 %v6157_v40  ;;  %v5506_v45 = vpop.f32.mrb[43].mxu1  ;;  %v5878_v40 = vpack.c.bf16 %v4865_v39, %v4864_v38 }
 0x146   :  { %4754 = vmatmul.mubr.msk.bf16.gmra.mrb[24].mxu0 %vm420_vm2, %v791_v8 }
 0x147   :  { %927 = vmatprep.mubr.bf16.mxu0 %v6330_v57  ;;  %1177 = vmatpush1.bf16.msra.mxu0 %v6155_v42  ;;  %v1353_v47 = vpop.f32.mrb[44].mxu1 }
 0x148   :  { %1178 = vmatprep.subr.bf16.mxu0 %v6160_v44  ;;  %v1395_v49 = vpack.c.bf16 %v1353_v47, %v6930_v43  ;;  %v5509_v50 = vpop.f32.mrb[45].mxu1  ;;  %v1558_v47 = vlaneseq }
 0x14b   :  { %1179 = vmatpush1.bf16.msra.mxu0 %v6158_v46  ;;  %v1358_v52 = vpop.f32.mrb[46].mxu1 }
 0x14c   :  { %1471 = vmatprep.subr.bf16.mxu0 %v6163_v48  ;;  %v5512_v53 = vpop.f32.mrb[47].mxu1  ;;  %v7043_v48 = vshrl.u32 %v1558_v47, 7 }
 0x14e   :  { %4755 = vmatmul.mubr.msk.bf16.gmra.mrb[36].mxu0 %vm420_vm2, %v792_v51 }
 0x14f   :  { %1200 = vmatprep.mubr.bf16.mxu0 %v6330_v57  ;;  %v1363_v54 = vpop.f32.mrb[48].mxu1 }
 0x150   :  { %v1396_v55 = vpack.c.bf16 %v1363_v54, %v1358_v52  ;;  %v5515_v56 = vpop.f32.mrb[49].mxu1  ;;  %v1560_v52 = vsub.s32 0, %v7043_v48 }
 0x151   :  { %v1564_v56 = vsub.s32 1, %v7043_v48 }
 0x153   :  { %v1368_v59 = vpop.f32.mrb[50].mxu1 }
 0x154   :  { %v5518_v61 = vpop.f32.mrb[51].mxu1 }
 0x156   :  { %4794 = vmatmul.mubr.msk.bf16.vlgmr.msra.gmra.mrb[16].mxu0 %vm420_vm2, %v1092_v20 }
 0x157   :  { %1210 = vmatprep.mubr.bf16.mxu0 %v6330_v57  ;;  %1472 = vmatpush1.bf16.msra.mxu0 %v6161_v58  ;;  %v1373_v63 = vpop.f32.mrb[52].mxu1 }
 0x158   :  { %1473 = vmatprep.subr.bf16.mxu0 %v6166_v60  ;;  %v1397_v1 = vpack.c.bf16 %v1373_v63, %v1368_v59  ;;  %v5521_v2 = vpop.f32.mrb[53].mxu1 }
 0x15b   :  { %1474 = vmatpush1.bf16.msra.mxu0 %v6164_v62  ;;  %v1378_v5 = vpop.f32.mrb[54].mxu1 }
 0x15c   :  { %1475 = vmatprep.subr.bf16.mxu0 %v6169_v0  ;;  %v5524_v8 = vpop.f32.mrb[55].mxu1  ;;  %v1398_v15 = vpack.c.bf16 %v1378_v5, %v1378_v5 }
 0x15e   :  { %4795 = vmatmul.mubr.msk.bf16.gmra.mrb[20].mxu0 %vm420_vm2, %v1093_v27  ;;  %v4857_v27 = vld [vmem:[%s8003_s5 + $0xb0] sm:$0xff] }
 0x15f   :  { %1220 = vmatprep.mubr.bf16.mxu0 %v6330_v57  ;;  %1476 = vmatpush1.bf16.msra.mxu0 %v6167_v4  ;;  %v5866_v28 = vpack.c.bf16 %v4857_v27, %v4856_v26 }
 0x160   :  { %1477 = vmatprep.subr.bf16.mxu0 %v6172_v7 }
 0x163   :  { %1478 = vmatpush1.bf16.msra.mxu0 %v6170_v9 }
 0x164   :  { %1479 = vmatprep.subr.bf16.mxu0 %v6175_v10 }
 0x166   :  { %4796 = vmatmul.mubr.msk.bf16.gmra.mrb[24].mxu0 %vm420_vm2, %v1094_v36  ;;  %v4863_v36 = vld [vmem:[%s8003_s5 + $0xe0] sm:$0xff] }
 0x167   :  { %1230 = vmatprep.mubr.bf16.mxu0 %v6330_v57  ;;  %1480 = vmatpush1.bf16.msra.mxu0 %v6173_v11  ;;  %v5875_v37 = vpack.c.bf16 %v4863_v36, %v4862_v35 }
 0x168   :  { %1481 = vmatprep.subr.bf16.mxu0 %v6178_v12 }
 0x16b   :  { %1482 = vmatpush1.bf16.msra.mxu0 %v6176_v13 }
 0x16c   :  { %5865 = vmatprep.subr.bf16.mxu0 %v6327_v3 }
 0x16e   :  { %4797 = vmatmul.mubr.msk.bf16.gmra.mrb[40].mxu0 %vm420_vm2, %v1095_v14 }
 0x16f   :  { %1503 = vmatprep.mubr.bf16.mxu0 %v6330_v57 }
 0x176   :  { %4836 = vmatmul.mubr.msk.bf16.vlgmr.msra.gmra.mrb[16].mxu0 %vm420_vm2, %v1395_v49 }
 0x177   :  { %1513 = vmatprep.mubr.bf16.mxu0 %v6330_v57  ;;  %5867 = vmatpush1.bf16.msra.mxu0 %v5866_v28 }
 0x178   :  { %5868 = vmatprep.subr.bf16.mxu0 %v6327_v3 }
 0x17b   :  { %5870 = vmatpush1.bf16.msra.mxu0 %v5869_v31 }
 0x17c   :  { %5871 = vmatprep.subr.bf16.mxu0 %v6327_v3 }
 0x17e   :  { %4837 = vmatmul.mubr.msk.bf16.gmra.mrb[20].mxu0 %vm420_vm2, %v1396_v55  ;;  %v1556_v55 = vld [vmem:[%s8001_s3] sm:$0x3] }
 0x17f   :  { %1523 = vmatprep.mubr.bf16.mxu0 %v6330_v57  ;;  %5873 = vmatpush1.bf16.msra.mxu0 %v5872_v34  ;;  %v1561_v59 = vrot.slane %v1556_v55, %v1560_v52  ;;  %v1565_v60 = vrot.slane %v1556_v55, %v1564_v56  ;;  %v1596_v55 = vld [vmem:[%s8002_s4] sm:$0xff] }
 0x180   :  { %5874 = vmatprep.subr.bf16.mxu0 %v6327_v3 }
 0x183   :  { %5876 = vmatpush1.bf16.msra.mxu0 %v5875_v37 }
 0x184   :  { %5877 = vmatprep.subr.bf16.mxu0 %v6327_v3 }
 0x186   :  { %4838 = vmatmul.mubr.msk.bf16.gmra.mrb[24].mxu0 %vm420_vm2, %v1397_v1 }
 0x187   :  { %1533 = vmatprep.mubr.bf16.mxu0 %v6330_v57  ;;  %5879 = vmatpush1.bf16.msra.mxu0 %v5878_v40 }
 0x188   :  { %5880 = vmatprep.subr.bf16.mxu0 %v6327_v3 }
 0x18e   :  { %4839 = vmatmul.mubr.msk.bf16.gmra.mrb[44].mxu0 %vm420_vm2, %v1398_v15  ;;  %vm4583_vm2 = vcmask 695296  }
 0x1e1   :  { %v497_v16 = vpop.f32.mrb[28].mxu0 }
 0x1e2   :  { %v499_v17 = vpop.f32.mrb[29].mxu0 }
 0x1e3   :  { %v501_v18 = vpop.f32.mrb[30].mxu0 }
 0x1e4   :  { %v502_v19 = vpop.f32.mrb[31].mxu0 }
 0x201   :  { %v640_v20 = vpop.f32.mrb[32].mxu0 }
 0x202   :  { %v641_v21 = vadd.f32 %v640_v20, %v497_v16  ;;  %v642_v22 = vpop.f32.mrb[33].mxu0 }
 0x203   :  { %v643_v23 = vadd.f32 %v642_v22, %v499_v17  ;;  %v644_v24 = vpop.f32.mrb[34].mxu0 }
 0x204   :  { %v645_v25 = vpop.f32.mrb[35].mxu0 }
 0x221   :  { %v929_v41 = vpop.f32.mrb[36].mxu0 }
 0x222   :  { %v948_v42 = vadd.f32 %v929_v41, %v641_v21  ;;  %v931_v43 = vpop.f32.mrb[37].mxu0 }
 0x223   :  { %v949_v44 = vadd.f32 %v931_v43, %v643_v23  ;;  %v933_v45 = vpop.f32.mrb[38].mxu0 }
 0x224   :  { %v934_v46 = vpop.f32.mrb[39].mxu0 }
 0x241   :  { %v1232_v49 = vpop.f32.mrb[40].mxu0 }
 0x242   :  { %v1251_v50 = vadd.f32 %v1232_v49, %v948_v42  ;;  %v1234_v51 = vpop.f32.mrb[41].mxu0 }
 0x243   :  { %v1252_v53 = vadd.f32 %v1234_v51, %v949_v44  ;;  %v1236_v54 = vpop.f32.mrb[42].mxu0 }
 0x244   :  { %v1237_v58 = vpop.f32.mrb[43].mxu0 }
 0x245   :  { %v1599_v58 = vld [vmem:[%s8002_s4 + $0x18] sm:$0xf] }
 0x249   :  { %v1505_v61 = vpop.f32.mrb[16].mxu0 }
 0x24a   :  { %v1568_v62 = vadd.f32 %v1561_v59, %v1505_v61  ;;  %v1507_v63 = vpop.f32.mrb[17].mxu0  ;;  %v4844_v61 = vld [vmem:[%s8002_s4 + $0x20] sm:$0xff] }
 0x24b   :  { %v1569_v0 = vadd.f32 %v1565_v60, %v1507_v63  ;;  %v1509_v1 = vpop.f32.mrb[18].mxu0  ;;  %v1818_v63 = vld [vmem:[%s8003_s5 + $0x10] sm:$0xff] }
 0x24c   :  { %v1570_v2 = vadd.f32 %v1561_v59, %v1509_v1  ;;  %v1511_v4 = vpop.f32.mrb[19].mxu0  ;;  %v1582_v7 = vmax.f32 %v1568_v62, 0.0  ;;  %v4845_v1 = vld [vmem:[%s8002_s4 + $0x28] sm:$0xff] }
 0x24d   :  { %v1571_v5 = vadd.f32 %v1565_v60, %v1511_v4  ;;  %v1583_v9 = vmax.f32 %v1569_v0, 0.0  ;;  %v1819_v0 = vld [vmem:[%s8003_s5 + $0x18] sm:$0xff]  ;;  %v1820_v4 = vld [vmem:[%s8003_s5 + $0x20] sm:$0xff] }
 0x24e   :  { %v1584_v8 = vmax.f32 %v1570_v2, 0.0  ;;  %v5839_v2 = vpack.c.bf16 %v1819_v0, %v1818_v63 }
 0x24f   :  { %v1585_v10 = vmax.f32 %v1571_v5, 0.0  ;;  %v1821_v5 = vld [vmem:[%s8003_s5 + $0x28] sm:$0xff] }
 0x250   :  { %v5813_v11 = vpack.c.bf16 %v1584_v8, %v1582_v7  ;;  %v4846_v7 = vld [vmem:[%s8002_s4 + $0x30] sm:$0xff]  ;;  %v5842_v8 = vpack.c.bf16 %v1821_v5, %v1820_v4 }
 0x251   :  { %v5811_v12 = vpack.c.bf16 %v1585_v10, %v1583_v9  ;;  %v1515_v13 = vpop.f32.mrb[20].mxu0  ;;  %v1822_v9 = vld [vmem:[%s8003_s5 + $0x30] sm:$0xff]  ;;  %v1823_v10 = vld [vmem:[%s8003_s5 + $0x38] sm:$0xff] }
 0x252   :  { %v1572_v14 = vadd.f32 %v1561_v59, %v1515_v13  ;;  %v1517_v15 = vpop.f32.mrb[21].mxu0  ;;  %v1824_v13 = vld [vmem:[%s8003_s5 + $0x40] sm:$0xff] }
 0x253   :  { %v1573_v16 = vadd.f32 %v1565_v60, %v1517_v15  ;;  %v1519_v17 = vpop.f32.mrb[22].mxu0  ;;  %5812 = vmatprep.subr.bf16.mxu1 %v5811_v12 }
 0x254   :  { %v1574_v18 = vadd.f32 %v1561_v59, %v1519_v17  ;;  %v1521_v19 = vpop.f32.mrb[23].mxu0  ;;  %5814 = vmatpush1.bf16.msra.mxu1 %v5813_v11  ;;  %v1586_v21 = vmax.f32 %v1572_v14, 0.0  ;;  %v1825_v14 = vld [vmem:[%s8003_s5 + $0x48] sm:$0xff]  ;;  %v1827_v17 = vld [vmem:[%s8003_s5 + $0x58] sm:$0xff] }
 0x255   :  { %v1575_v20 = vadd.f32 %v1565_v60, %v1521_v19  ;;  %v1587_v23 = vmax.f32 %v1573_v16, 0.0  ;;  %v5848_v15 = vpack.c.bf16 %v1825_v14, %v1824_v13  ;;  %v1826_v16 = vld [vmem:[%s8003_s5 + $0x50] sm:$0xff]  ;;  %v6179_v14 = vld [vmem:[%s8005_s7 + $0x58] ss:$8 sps:$4 sm:$0xff]  }
 0x256   :  { %v1588_v22 = vmax.f32 %v1574_v18, 0.0  ;;  %v4866_v18 = vld [vmem:[%s8003_s5 + $0xf8] sm:$0xff]  ;;  %v5851_v19 = vpack.c.bf16 %v1827_v17, %v1826_v16  ;;  %v6184_v16 = vld [vmem:[%s8005_s7 + $0x6c] ss:$8 sps:$4 sm:$0xff]   ;;  %v6182_v17 = vld [vmem:[%s8005_s7 + $0x68] ss:$8 sps:$4 sm:$0xff]  }
 0x257   :  { %v1589_v24 = vmax.f32 %v1575_v20, 0.0  ;;  %v4867_v20 = vld [vmem:[%s8003_s5 + $0x100] sm:$0xff] }
 0x258   :  { %v5817_v25 = vpack.c.bf16 %v1588_v22, %v1586_v21  ;;  %v5881_v21 = vpack.c.bf16 %v4867_v20, %v4866_v18  ;;  %v1828_v22 = vld [vmem:[%s8003_s5 + $0x60] sm:$0xff] }
 0x259   :  { %v5815_v26 = vpack.c.bf16 %v1589_v24, %v1587_v23  ;;  %v1525_v27 = vpop.f32.mrb[24].mxu0  ;;  %v1829_v23 = vld [vmem:[%s8003_s5 + $0x68] sm:$0xff] }
 0x25a   :  { %v1576_v28 = vadd.f32 %v1561_v59, %v1525_v27  ;;  %v1527_v29 = vpop.f32.mrb[25].mxu0  ;;  %5882 = vmatpush1.bf16.msra.mxu0 %v5881_v21  ;;  %v4868_v24 = vld [vmem:[%s8003_s5 + $0x108] sm:$0xff] }
 0x25b   :  { %v1577_v30 = vadd.f32 %v1565_v60, %v1527_v29  ;;  %v1529_v31 = vpop.f32.mrb[26].mxu0  ;;  %5816 = vmatprep.subr.bf16.mxu1 %v5815_v26  ;;  %5883 = vmatprep.subr.bf16.mxu0 %v6327_v3  ;;  %v1831_v29 = vld [vmem:[%s8003_s5 + $0x78] sm:$0xff] }
 0x25c   :  { %v1578_v32 = vadd.f32 %v1561_v59, %v1529_v31  ;;  %v1531_v33 = vpop.f32.mrb[27].mxu0  ;;  %5818 = vmatpush1.bf16.msra.mxu1 %v5817_v25  ;;  %v1590_v35 = vmax.f32 %v1576_v28, 0.0  ;;  %v1830_v28 = vld [vmem:[%s8003_s5 + $0x70] sm:$0xff] }
 0x25d   :  { %v1579_v34 = vadd.f32 %v1565_v60, %v1531_v33  ;;  %v1591_v37 = vmax.f32 %v1577_v30, 0.0  ;;  %v4870_v30 = vld [vmem:[%s8003_s5 + $0x118] sm:$0xff]  ;;  %v5857_v31 = vpack.c.bf16 %v1831_v29, %v1830_v28 }
 0x25e   :  { %v1592_v36 = vmax.f32 %v1578_v32, 0.0  ;;  %v4871_v32 = vld [vmem:[%s8003_s5 + $0x120] sm:$0xff] }
 0x25f   :  { %v1593_v38 = vmax.f32 %v1579_v34, 0.0  ;;  %v5887_v33 = vpack.c.bf16 %v4871_v32, %v4870_v30  ;;  %v1832_v34 = vld [vmem:[%s8003_s5 + $0x80] sm:$0xff] }
 0x260   :  { %v5821_v39 = vpack.c.bf16 %v1592_v36, %v1590_v35  ;;  %v1833_v35 = vld [vmem:[%s8003_s5 + $0x88] sm:$0xff] }
 0x261   :  { %v5819_v40 = vpack.c.bf16 %v1593_v38, %v1591_v37  ;;  %v1535_v41 = vpop.f32.mrb[44].mxu0  ;;  %v4872_v36 = vld [vmem:[%s8003_s5 + $0x128] sm:$0xff]  ;;  %v5860_v37 = vpack.c.bf16 %v1833_v35, %v1832_v34  ;;  %v4873_v38 = vld [vmem:[%s8003_s5 + $0x130] sm:$0xff] }
 0x262   :  { %v1554_v42 = vadd.f32 %v1535_v41, %v1251_v50  ;;  %v1537_v43 = vpop.f32.mrb[45].mxu0  ;;  %v1597_v50 = vld [vmem:[%s8002_s4 + $0x8] sm:$0xff]  ;;  %v1835_v41 = vld [vmem:[%s8003_s5 + $0x98] sm:$0xff] }
 0x263   :  { %v1555_v44 = vadd.f32 %v1537_v43, %v1252_v53  ;;  %v1539_v45 = vpop.f32.mrb[46].mxu0  ;;  %5820 = vmatprep.subr.bf16.mxu1 %v5819_v40  ;;  %v1598_v53 = vld [vmem:[%s8002_s4 + $0x10] sm:$0xff] }
 0x264   :  { %v1580_v46 = vadd.f32 %v1561_v59, %v1554_v42  ;;  %v1540_v47 = vpop.f32.mrb[47].mxu0  ;;  %5822 = vmatpush1.bf16.msra.mxu1 %v5821_v39  ;;  %v1816_v59 = vld [vmem:[%s8003_s5] sm:$0xff]  ;;  %v4874_v42 = vld [vmem:[%s8003_s5 + $0x138] sm:$0xff] }
 0x265   :  { %v1581_v49 = vadd.f32 %v1565_v60, %v1555_v44  ;;  %v1817_v60 = vld [vmem:[%s8003_s5 + $0x8] sm:$0xff]  ;;  %v4875_v44 = vld [vmem:[%s8003_s5 + $0x140] sm:$0xff] }
 0x266   :  { %v1594_v54 = vmax.f32 %v1580_v46, 0.0  ;;  %v5836_v62 = vpack.c.bf16 %v1817_v60, %v1816_v59  ;;  %v5893_v45 = vpack.c.bf16 %v4875_v44, %v4874_v42  ;;  %v1836_v46 = vld [vmem:[%s8003_s5 + $0xa0] sm:$0xff]  ;;  %v4876_v47 = vld [vmem:[%s8003_s5 + $0x148] sm:$0xff]  ;;  %v4885_v44 = vld [vmem:[%s8004_s6 + $0x18] sm:$0xff] }
 0x267   :  { %v1595_v51 = vmax.f32 %v1581_v49, 0.0  ;;  %v2047_v42 = vld [vmem:[%s8004_s6 + $0x8] sm:$0xff] }
 0x269   :  { %1625 = vmatprep.subr.mxu1 %v1595_v51 }
 0x26a   :  { %1626 = vmatpush1.msra.mxu1 %v1594_v54 }
 0x26b   :  { %4840 = vmatmul.mubr.msk.f32.vlgmr.msra.gmra.mrb[56].mxu1 %vm1600_vm3, %v1596_v55  ;;  %5824 = vmatprep.subr.bf16.mxu1 %v5811_v12  ;;  %v5845_v12 = vpack.c.bf16 %v1823_v10, %v1822_v9 }
 0x26c   :  { %5826 = vmatpush1.bf16.msra.mxu1 %v5813_v11  ;;  %1683 = vmatprep.mubr.f32.mxu1 %v6329_v6  ;;  %v4847_v11 = vld [vmem:[%s8002_s4 + $0x38] sm:$0xf] }
 0x26d   :  { %5828 = vmatprep.subr.bf16.mxu1 %v5815_v26  ;;  %v4869_v26 = vld [vmem:[%s8003_s5 + $0x110] sm:$0xff] }
 0x26e   :  { %v5884_v27 = vpack.c.bf16 %v4869_v26, %v4868_v24 }
 0x26f   :  { %4841 = vmatmul.mubr.msk.f32.gmra.mrb[58].mxu1 %vm1600_vm3, %v1597_v50 }
 0x270   :  { %5830 = vmatpush1.bf16.msra.mxu1 %v5817_v25  ;;  %1689 = vmatprep.mubr.f32.mxu1 %v6329_v6  ;;  %v5854_v25 = vpack.c.bf16 %v1829_v23, %v1828_v22 }
 0x271   :  { %5832 = vmatprep.subr.bf16.mxu1 %v5819_v40  ;;  %5885 = vmatpush1.bf16.msra.mxu0 %v5884_v27  ;;  %v1834_v40 = vld [vmem:[%s8003_s5 + $0x90] sm:$0xff] }
 0x272   :  { %5886 = vmatprep.subr.bf16.mxu0 %v6327_v3  ;;  %v5863_v43 = vpack.c.bf16 %v1835_v41, %v1834_v40  ;;  %v2046_v41 = vld [vmem:[%s8004_s6] sm:$0xff] }
 0x273   :  { %4842 = vmatmul.mubr.msk.f32.gmra.mrb[60].mxu1 %vm1600_vm3, %v1598_v53 }
 0x274   :  { %5834 = vmatpush1.bf16.msra.mxu1 %v5821_v39  ;;  %1695 = vmatprep.mubr.f32.mxu1 %v6329_v6  ;;  %v5890_v39 = vpack.c.bf16 %v4873_v38, %v4872_v36 }
 0x275   :  { %1731 = vmatprep.subr.mxu1 %v1595_v51  ;;  %5888 = vmatpush1.bf16.msra.mxu0 %v5887_v33 }
 0x276   :  { %5889 = vmatprep.subr.bf16.mxu0 %v6327_v3 }
 0x277   :  { %4843 = vmatmul.mubr.msk.f32.gmra.mrb[62].mxu1 %vm1600_vm3, %v1599_v58 }
 0x278   :  { %1732 = vmatpush1.msra.mxu1 %v1594_v54  ;;  %1783 = vmatprep.mubr.f32.mxu1 %v6329_v6 }
 0x279   :  { %5835 = vmatprep.subr.bf16.mxu1 %v6327_v3  ;;  %5891 = vmatpush1.bf16.msra.mxu0 %v5890_v39 }
 0x27a   :  { %5892 = vmatprep.subr.bf16.mxu0 %v6327_v3 }
 0x27b   :  { %4848 = vmatmul.mubr.msk.f32.vlgmr.msra.gmra.mrb[64].mxu1 %vm1600_vm3, %v4844_v61 }
 0x27c   :  { %1789 = vmatprep.mubr.f32.mxu1 %v6329_v6  ;;  %5837 = vmatpush1.bf16.msra.mxu1 %v5836_v62 }
 0x27d   :  { %5838 = vmatprep.subr.bf16.mxu1 %v6327_v3  ;;  %5894 = vmatpush1.bf16.msra.mxu0 %v5893_v45  ;;  %v4886_v45 = vld [vmem:[%s8004_s6 + $0x20] sm:$0xff] }
 0x27e   :  { %1997 = vmatprep.subr.mxu0 %v6329_v6 }
 0x27f   :  { %4849 = vmatmul.mubr.msk.f32.gmra.mrb[66].mxu1 %vm1600_vm3, %v4845_v1 }
 0x280   :  { %1795 = vmatprep.mubr.f32.mxu1 %v6329_v6  ;;  %5840 = vmatpush1.bf16.msra.mxu1 %v5839_v2 }
 0x281   :  { %5841 = vmatprep.subr.bf16.mxu1 %v6327_v3  ;;  %1998 = vmatpush1.msra.mxu0 %v4876_v47  ;;  %v4933_v47 = vld [vmem:[%s8004_s6 + $0x30] sm:$0xff] }
 0x283   :  { %4850 = vmatmul.mubr.msk.f32.gmra.mrb[68].mxu1 %vm1600_vm3, %v4846_v7 }
 0x284   :  { %1801 = vmatprep.mubr.f32.mxu1 %v6329_v6  ;;  %5843 = vmatpush1.bf16.msra.mxu1 %v5842_v8 }
 0x285   :  { %5844 = vmatprep.subr.bf16.mxu1 %v6327_v3 }
 0x287   :  { %4851 = vmatmul.mubr.msk.f32.gmra.mrb[70].mxu1 %vm1600_vm3, %v4847_v11  ;;  %vm4633_vm3 = vcmask 74752  }
 0x288   :  { %5846 = vmatpush1.bf16.msra.mxu1 %v5845_v12 }
 0x289   :  { %5847 = vmatprep.subr.bf16.mxu1 %v6327_v3 }
 0x28c   :  { %5849 = vmatpush1.bf16.msra.mxu1 %v5848_v15  ;;  %v6181_v15 = vld [vmem:[%s8005_s7 + $0x5c] ss:$8 sps:$4 sm:$0xff]  }
 0x28d   :  { %5850 = vmatprep.subr.bf16.mxu1 %v6327_v3  ;;  %2332 = vmatprep.subr.bf16.mxu0 %v6181_v15 }
 0x290   :  { %5852 = vmatpush1.bf16.msra.mxu1 %v5851_v19 }
 0x291   :  { %5853 = vmatprep.subr.bf16.mxu1 %v6327_v3 }
 0x294   :  { %5855 = vmatpush1.bf16.msra.mxu1 %v5854_v25 }
 0x295   :  { %5856 = vmatprep.subr.bf16.mxu1 %v6327_v3 }
 0x298   :  { %5858 = vmatpush1.bf16.msra.mxu1 %v5857_v31 }
 0x299   :  { %5859 = vmatprep.subr.bf16.mxu1 %v6327_v3 }
 0x29c   :  { %5861 = vmatpush1.bf16.msra.mxu1 %v5860_v37 }
 0x29d   :  { %5862 = vmatprep.subr.bf16.mxu1 %v6327_v3 }
 0x2a0   :  { %5864 = vmatpush1.bf16.msra.mxu1 %v5863_v43  ;;  %v2048_v43 = vld [vmem:[%s8004_s6 + $0x10] sm:$0xf] }
 0x2a1   :  { %1890 = vmatprep.subr.mxu1 %v6329_v6 }
 0x2a4   :  { %1891 = vmatpush1.msra.mxu1 %v1836_v46  ;;  %v4887_v46 = vld [vmem:[%s8004_s6 + $0x28] sm:$0xf] }
 0x2a5   :  { %5895 = vmatprep.subr.bf16.mxu1 %v6327_v3 }
 0x33e   :  { %v1679_v49 = vpop.f32.mrb[56].mxu1 }
 0x33f   :  { %v1681_v51 = vpop.f32.mrb[57].mxu1 }
 0x342   :  { %v1685_v54 = vpop.f32.mrb[58].mxu1 }
 0x343   :  { %v1687_v55 = vpop.f32.mrb[59].mxu1 }
 0x346   :  { %v1691_v50 = vpop.f32.mrb[60].mxu1 }
 0x347   :  { %v1693_v53 = vpop.f32.mrb[61].mxu1 }
 0x34a   :  { %v1697_v58 = vpop.f32.mrb[62].mxu1 }
 0x34b   :  { %v1699_v59 = vpop.f32.mrb[63].mxu1 }
 0x34e   :  { %v1785_v60 = vpop.f32.mrb[64].mxu1 }
 0x34f   :  { %v1808_v61 = vmax.f32 %v1679_v49, %v1785_v60  ;;  %v1787_v62 = vpop.f32.mrb[65].mxu1  ;;  %v4934_v49 = vld [vmem:[%s8004_s6 + $0x38] sm:$0xff] }
 0x350   :  { %v1809_v63 = vmax.f32 %v1681_v51, %v1787_v62  ;;  %v4935_v51 = vld [vmem:[%s8004_s6 + $0x40] sm:$0xf]  ;;  %v6188_v62 = vld [vmem:[%s8005_s7 + $0x88] ss:$8 sps:$4 sm:$0xff]  }
 0x351   :  { %v6185_v60 = vld [vmem:[%s8005_s7 + $0x78] ss:$8 sps:$4 sm:$0xff]  }
 0x352   :  { %v1791_v0 = vpop.f32.mrb[66].mxu1  ;;  %4852 = vmatprep.mubr.msk.f32.mxu1 %vm1837_vm4, %v1809_v63  ;;  %4877 = vmatprep.mubr.msk.f32.mxu0 %vm1837_vm4, %v1809_v63  ;;  %v6190_v63 = vld [vmem:[%s8005_s7 + $0x8c] ss:$8 sps:$4 sm:$0xff]  }
 0x353   :  { %v1810_v1 = vmax.f32 %v1685_v54, %v1791_v0  ;;  %v1793_v2 = vpop.f32.mrb[67].mxu1  ;;  %1915 = vmatmul.mubr.f32.vlgmr.msra.gmra.mrb[72].mxu1 %v1808_v61  ;;  %2022 = vmatmul.mubr.f32.vlgmr.msra.gmra.mrb[14].mxu0 %v1808_v61  ;;  %v4966_v54 = vld [vmem:[%s8004_s6 + $0x48] sm:$0xff]  ;;  %v6187_v61 = vld [vmem:[%s8005_s7 + $0x7c] ss:$8 sps:$4 sm:$0xff]   ;;  %v6191_v0 = vld [vmem:[%s8005_s7 + $0x98] ss:$8 sps:$4 sm:$0xff]  }
 0x354   :  { %v1811_v4 = vmax.f32 %v1687_v55, %v1793_v2  ;;  %2333 = vmatpush1.bf16.msra.mxu0 %v6179_v14  ;;  %v4967_v55 = vld [vmem:[%s8004_s6 + $0x50] sm:$0xff]  ;;  %v4902_v2 = vld [vmem:[%s8005_s7 + $0xa8] sm:$0x33] }
 0x355   :  { %2334 = vmatprep.subr.bf16.mxu0 %v6184_v16 }
 0x356   :  { %v1797_v5 = vpop.f32.mrb[68].mxu1  ;;  %4853 = vmatprep.mubr.msk.f32.mxu1 %vm1837_vm4, %v1811_v4  ;;  %4878 = vmatprep.mubr.msk.f32.mxu0 %vm1837_vm4, %v1811_v4  ;;  %v4914_v4 = vcombine.high %v4902_v2, %v4902_v2 }
 0x357   :  { %v1812_v7 = vmax.f32 %v1691_v50, %v1797_v5  ;;  %v1799_v8 = vpop.f32.mrb[69].mxu1  ;;  %1920 = vmatmul.mubr.f32.gmra.mrb[74].mxu1 %v1810_v1  ;;  %2027 = vmatmul.mubr.f32.gmra.mrb[48].mxu0 %v1810_v1  ;;  %v4968_v50 = vld [vmem:[%s8004_s6 + $0x58] sm:$0xf]  ;;  %v6193_v1 = vld [vmem:[%s8005_s7 + $0x9c] ss:$8 sps:$4 sm:$0xff]   ;;  %v4913_v5 = vcombine.low %v4902_v2, %v4902_v2 }
 0x358   :  { %v1813_v9 = vmax.f32 %v1693_v53, %v1799_v8  ;;  %2335 = vmatpush1.bf16.msra.mxu0 %v6182_v17  ;;  %v4999_v53 = vld [vmem:[%s8004_s6 + $0x60] sm:$0xff] }
 0x359   :  { %2336 = vmatprep.subr.bf16.mxu0 %v6187_v61  ;;  %v6198_v8 = vld [vmem:[%s8005_s7 + $0x4] ss:$8 sps:$4 sm:$0xff]  }
 0x35a   :  { %v1803_v10 = vpop.f32.mrb[70].mxu1  ;;  %4854 = vmatprep.mubr.msk.f32.mxu1 %vm1837_vm4, %v1813_v9  ;;  %4879 = vmatprep.mubr.msk.f32.mxu0 %vm1837_vm4, %v1813_v9 }
 0x35b   :  { %v1814_v11 = vmax.f32 %v1697_v58, %v1803_v10  ;;  %v1805_v12 = vpop.f32.mrb[71].mxu1  ;;  %1925 = vmatmul.mubr.f32.gmra.mrb[76].mxu1 %v1812_v7  ;;  %2032 = vmatmul.mubr.f32.gmra.mrb[50].mxu0 %v1812_v7  ;;  %v5000_v58 = vld [vmem:[%s8004_s6 + $0x68] sm:$0xff]  ;;  %v2327_v7 = vsel %vm2325_vm9, %v4913_v5, 0 }
 0x35c   :  { %v1815_v13 = vmax.f32 %v1699_v59, %v1805_v12  ;;  %v5001_v59 = vld [vmem:[%s8004_s6 + $0x70] sm:$0xf]  ;;  %2337 = vmatpush1.bf16.msra.mxu0 %v6185_v60 }
 0x35d   :  { %2338 = vmatprep.subr.bf16.mxu0 %v6190_v63  ;;  %v6219_v60 = vld [vmem:[%s8005_s7 + $0xd0] ss:$8 sps:$4 sm:$0xff]   ;;  %v6224_v63 = vld [vmem:[%s8005_s7 + $0xe4] ss:$8 sps:$4 sm:$0xff]  }
 0x35e   :  { %4855 = vmatprep.mubr.msk.f32.mxu1 %vm1837_vm4, %v1815_v13  ;;  %4880 = vmatprep.mubr.msk.f32.mxu0 %vm1837_vm4, %v1815_v13 }
 0x35f   :  { %1930 = vmatmul.mubr.f32.gmra.mrb[78].mxu1 %v1814_v11  ;;  %2037 = vmatmul.mubr.f32.gmra.mrb[52].mxu0 %v1814_v11 }
 0x360   :  { %5533 = vmatprep.mubr.msk.f32.mxu1 %vm6328_vm0, %v6329_v6  ;;  %2364 = vmatprep.mubr.bf16.mxu0 %v6330_v57 }
 0x361   :  { %2339 = vmatpush1.bf16.msra.mxu0 %v6188_v62 }
 0x362   :  { %2340 = vmatprep.subr.bf16.mxu0 %v6193_v1  ;;  %v6222_v1 = vld [vmem:[%s8005_s7 + $0xe0] ss:$8 sps:$4 sm:$0xff]  }
 0x365   :  { %2341 = vmatpush1.bf16.msra.mxu0 %v6191_v0 }
 0x366   :  { %4915 = vmatprep.subr.msk.bf16.mxu0 %vm2325_vm9, %v4914_v4  ;;  %v6227_v4 = vld [vmem:[%s8005_s7 + $0xf4] ss:$8 sps:$4 sm:$0xff]  }
 0x369   :  { %2343 = vmatpush1.bf16.msra.mxu0 %v2327_v7 }
 0x36a   :  { %2450 = vmatprep.subr.bf16.mxu0 %v6198_v8  ;;  %v4950_v8 = vld [vmem:[%s8005_s7 + $0x100] sm:$0x33] }
 0x426   :  { %v1916_v18 = vpop.f32.mrb[72].mxu1  ;;  %v2023_v19 = vpop.f32.mrb[14].mxu0 }
 0x427   :  { %v2042_v20 = vmax.f32 %v1916_v18, %v2023_v19  ;;  %v1918_v21 = vpop.f32.mrb[73].mxu1  ;;  %v2025_v22 = vpop.f32.mrb[15].mxu0  ;;  %v6196_v19 = vld [vmem:[%s8005_s7] ss:$8 sps:$4 sm:$0xff]  }
 0x428   :  { %v6201_v22 = vld [vmem:[%s8005_s7 + $0x14] ss:$8 sps:$4 sm:$0xff]  }
 0x42a   :  { %v1921_v23 = vpop.f32.mrb[74].mxu1  ;;  %v2028_v24 = vpop.f32.mrb[48].mxu0 }
 0x42b   :  { %v2043_v25 = vmax.f32 %v1921_v23, %v2028_v24  ;;  %v1923_v26 = vpop.f32.mrb[75].mxu1  ;;  %v2030_v27 = vpop.f32.mrb[49].mxu0  ;;  %v6199_v23 = vld [vmem:[%s8005_s7 + $0x10] ss:$8 sps:$4 sm:$0xff]  }
 0x42d   :  { %v5896_v28 = vpack.c.bf16 %v2043_v25, %v2042_v20  ;;  %v6204_v25 = vld [vmem:[%s8005_s7 + $0x24] ss:$8 sps:$4 sm:$0xff]  }
 0x42e   :  { %v1926_v29 = vpop.f32.mrb[76].mxu1  ;;  %v2033_v30 = vpop.f32.mrb[50].mxu0 }
 0x42f   :  { %v2044_v31 = vmax.f32 %v1926_v29, %v2033_v30  ;;  %v1928_v32 = vpop.f32.mrb[77].mxu1  ;;  %v2035_v33 = vpop.f32.mrb[51].mxu0  ;;  %5897 = vmatpush3.bf16.msra.mxu1 %v5896_v28  ;;  %v6207_v30 = vld [vmem:[%s8005_s7 + $0x34] ss:$8 sps:$4 sm:$0xff]  }
 0x430   :  { %5898 = vmatprep.subr.bf16.mxu1 %v6327_v3  ;;  %v6205_v32 = vld [vmem:[%s8005_s7 + $0x30] ss:$8 sps:$4 sm:$0xff]  }
 0x432   :  { %v1931_v34 = vpop.f32.mrb[78].mxu1  ;;  %v2038_v35 = vpop.f32.mrb[52].mxu0 }
 0x433   :  { %v2045_v36 = vmax.f32 %v1931_v34, %v2038_v35  ;;  %v1933_v37 = vpop.f32.mrb[79].mxu1  ;;  %v2040_v38 = vpop.f32.mrb[53].mxu0  ;;  %v6210_v34 = vld [vmem:[%s8005_s7 + $0x44] ss:$8 sps:$4 sm:$0xff]  }
 0x434   :  { %v2153_v37 = vld [vmem:[%s8005_s7 + $0x50] sm:$0x33]  ;;  %v6208_v38 = vld [vmem:[%s8005_s7 + $0x40] ss:$8 sps:$4 sm:$0xff]  }
 0x435   :  { %v5899_v40 = vpack.c.bf16 %v2045_v36, %v2044_v31 }
 0x437   :  { %5901 = vmatpush3.bf16.msk.msra.mxu1 %vm7232_vm7, %v5899_v40 }
 0x438   :  { %5902 = vmatprep.subr.bf16.mxu1 %v6327_v3 }
 0x43a   :  { %5534 = vmatmul.mubr.msk.f32.vlgmr.msra.gmra.mrb[80].mxu1 %vm2049_vm8, %v2046_v41  ;;  %v4928_v41 = vcombine.low %v2153_v37, %v2153_v37 }
 0x43b   :  { %5904 = vmatpush3.bf16.msra.mxu1 %v5896_v28  ;;  %5536 = vmatprep.mubr.msk.f32.mxu1 %vm6328_vm0, %v6329_v6 }
 0x43c   :  { %5905 = vmatprep.subr.bf16.mxu1 %v6327_v3 }
 0x43e   :  { %5537 = vmatmul.mubr.msk.f32.gmra.mrb[82].mxu1 %vm2049_vm8, %v2047_v42 }
 0x43f   :  { %5908 = vmatpush3.bf16.msk.msra.mxu1 %vm7232_vm7, %v5899_v40  ;;  %5539 = vmatprep.mubr.msk.f32.mxu1 %vm6328_vm0, %v6329_v6 }
 0x440   :  { %5909 = vmatprep.subr.bf16.mxu1 %v6327_v3 }
 0x442   :  { %5540 = vmatmul.mubr.msk.f32.gmra.mrb[84].mxu1 %vm2049_vm8, %v2048_v43 }
 0x443   :  { %5550 = vmatprep.mubr.msk.f32.mxu1 %vm6328_vm0, %v6329_v6 }
 0x446   :  { %5551 = vmatmul.mubr.msk.f32.vlgmr.msra.gmra.mrb[86].mxu1 %vm2049_vm8, %v4885_v44  ;;  %v2445_v44 = vsel %vm2325_vm9, %v4928_v41, 0  ;;  %v6259_v41 = vld [vmem:[%s8005_s7 + $0x1a0] ss:$8 sps:$4 sm:$0xff]  }
 0x447   :  { %5911 = vmatpush3.bf16.msra.mxu1 %v5896_v28  ;;  %5553 = vmatprep.mubr.msk.f32.mxu1 %vm6328_vm0, %v6329_v6 }
 0x448   :  { %5912 = vmatprep.subr.bf16.mxu1 %v6327_v3 }
 0x44a   :  { %5554 = vmatmul.mubr.msk.f32.gmra.mrb[88].mxu1 %vm2049_vm8, %v4886_v45  ;;  %v6215_v45 = vld [vmem:[%s8005_s7 + $0xb4] ss:$8 sps:$4 sm:$0xff]  }
 0x44b   :  { %5915 = vmatpush3.bf16.msk.msra.mxu1 %vm7232_vm7, %v5899_v40  ;;  %5556 = vmatprep.mubr.msk.f32.mxu1 %vm6328_vm0, %v6329_v6 }
 0x44c   :  { %5916 = vmatprep.subr.bf16.mxu1 %v6327_v3 }
 0x44e   :  { %5557 = vmatmul.mubr.msk.f32.gmra.mrb[90].mxu1 %vm2049_vm8, %v4887_v46 }
 0x44f   :  { %5567 = vmatprep.mubr.msk.f32.mxu1 %vm6328_vm0, %v6329_v6 }
 0x452   :  { %5568 = vmatmul.mubr.msk.f32.vlgmr.msra.gmra.mrb[92].mxu1 %vm2049_vm8, %v4933_v47  ;;  %v6213_v47 = vld [vmem:[%s8005_s7 + $0xb0] ss:$8 sps:$4 sm:$0xff]  }
 0x453   :  { %5918 = vmatpush3.bf16.msra.mxu1 %v5896_v28  ;;  %5570 = vmatprep.mubr.msk.f32.mxu1 %vm6328_vm0, %v6329_v6 }
 0x454   :  { %5919 = vmatprep.subr.bf16.mxu1 %v6327_v3 }
 0x456   :  { %5571 = vmatmul.mubr.msk.f32.gmra.mrb[94].mxu1 %vm2049_vm8, %v4934_v49 }
 0x457   :  { %5922 = vmatpush3.bf16.msk.msra.mxu1 %vm7232_vm7, %v5899_v40  ;;  %5573 = vmatprep.mubr.msk.f32.mxu1 %vm6328_vm0, %v6329_v6 }
 0x458   :  { %5923 = vmatprep.subr.bf16.mxu1 %v6327_v3 }
 0x45a   :  { %5574 = vmatmul.mubr.msk.f32.gmra.mrb[96].mxu1 %vm2049_vm8, %v4935_v51  ;;  %v6218_v51 = vld [vmem:[%s8005_s7 + $0xc4] ss:$8 sps:$4 sm:$0xff]  }
 0x45b   :  { %5584 = vmatprep.mubr.msk.f32.mxu1 %vm6328_vm0, %v6329_v6 }
 0x45e   :  { %5585 = vmatmul.mubr.msk.f32.vlgmr.msra.gmra.mrb[98].mxu1 %vm2049_vm8, %v4966_v54 }
 0x45f   :  { %5925 = vmatpush3.bf16.msra.mxu1 %v5896_v28  ;;  %5587 = vmatprep.mubr.msk.f32.mxu1 %vm6328_vm0, %v6329_v6  ;;  %v6202_v28 = vld [vmem:[%s8005_s7 + $0x20] ss:$8 sps:$4 sm:$0xff]  }
 0x460   :  { %5926 = vmatprep.subr.bf16.mxu1 %v6327_v3 }
 0x462   :  { %5588 = vmatmul.mubr.msk.f32.gmra.mrb[100].mxu1 %vm2049_vm8, %v4967_v55 }
 0x463   :  { %5929 = vmatpush3.bf16.msk.msra.mxu1 %vm7232_vm7, %v5899_v40  ;;  %5590 = vmatprep.mubr.msk.f32.mxu1 %vm6328_vm0, %v6329_v6  ;;  %v4929_v40 = vcombine.high %v2153_v37, %v2153_v37  ;;  %v6258_v37 = vld [vmem:[%s8005_s7 + $0x194] ss:$8 sps:$4 sm:$0xff]  }
 0x466   :  { %5591 = vmatmul.mubr.msk.f32.gmra.mrb[102].mxu1 %vm2049_vm8, %v4968_v50  ;;  %v6216_v50 = vld [vmem:[%s8005_s7 + $0xc0] ss:$8 sps:$4 sm:$0xff]  }
 0x467   :  { %5601 = vmatprep.mubr.msk.f32.mxu1 %vm6328_vm0, %v6329_v6 }
 0x46a   :  { %5602 = vmatmul.mubr.msk.f32.vlgmr.msra.gmra.mrb[104].mxu1 %vm2049_vm8, %v4999_v53 }
 0x46b   :  { %5604 = vmatprep.mubr.msk.f32.mxu1 %vm6328_vm0, %v6329_v6 }
 0x46e   :  { %5605 = vmatmul.mubr.msk.f32.gmra.mrb[106].mxu1 %vm2049_vm8, %v5000_v58  ;;  %v6221_v58 = vld [vmem:[%s8005_s7 + $0xd4] ss:$8 sps:$4 sm:$0xff]  }
 0x46f   :  { %5607 = vmatprep.mubr.msk.f32.mxu1 %vm6328_vm0, %v6329_v6 }
 0x472   :  { %5608 = vmatmul.mubr.msk.f32.gmra.mrb[108].mxu1 %vm2049_vm8, %v5001_v59 }
 0x473   :  { %3297 = vmatprep.mubr.f32.mxu1 %v6329_v6 }
 0x50d   :  { %v2129_v9 = vpop.f32.mrb[80].mxu1 }
 0x50e   :  { %v5535_v10 = vpop.f32.mrb[81].mxu1 }
 0x511   :  { %v2134_v11 = vpop.f32.mrb[82].mxu1 }
 0x512   :  { %v2154_v12 = vpack.c.bf16 %v2134_v11, %v2129_v9  ;;  %v5538_v13 = vpop.f32.mrb[83].mxu1  ;;  %v6225_v9 = vld [vmem:[%s8005_s7 + $0xf0] ss:$8 sps:$4 sm:$0xff]   ;;  %v4962_v11 = vcombine.high %v4950_v8, %v4950_v8 }
 0x515   :  { %v7369_v14 = vpop.f32.mrb[84].mxu1 }
 0x516   :  { %v5541_v15 = vpop.f32.mrb[85].mxu1  ;;  %v2155_v62 = vpack.c.bf16 %v7369_v14, %v7369_v14 }
 0x517   :  { %v6232_v15 = vld [vmem:[%s8005_s7 + $0x10c] ss:$8 sps:$4 sm:$0xff]  }
 0x519   :  { %v2235_v16 = vpop.f32.mrb[86].mxu1 }
 0x51a   :  { %v5552_v17 = vpop.f32.mrb[87].mxu1 }
 0x51b   :  { %v6235_v17 = vld [vmem:[%s8005_s7 + $0x11c] ss:$8 sps:$4 sm:$0xff]  }
 0x51d   :  { %v2240_v18 = vpop.f32.mrb[88].mxu1 }
 0x51e   :  { %v2261_v20 = vpack.c.bf16 %v2240_v18, %v2235_v16  ;;  %v5555_v21 = vpop.f32.mrb[89].mxu1  ;;  %v6230_v16 = vld [vmem:[%s8005_s7 + $0x108] ss:$8 sps:$4 sm:$0xff]   ;;  %v6233_v18 = vld [vmem:[%s8005_s7 + $0x118] ss:$8 sps:$4 sm:$0xff]  }
 0x51f   :  { %v6236_v21 = vld [vmem:[%s8005_s7 + $0x128] ss:$8 sps:$4 sm:$0xff]  }
 0x520   :  { %4916 = vmatmul.mubr.msk.bf16.vlgmr.msra.gmra.mrb[56].mxu0 %vm2318_vm10, %v2261_v20 }
 0x521   :  { %2451 = vmatpush1.bf16.msra.mxu0 %v6196_v19  ;;  %v2245_v24 = vpop.f32.mrb[90].mxu1  ;;  %2374 = vmatprep.mubr.bf16.mxu0 %v6330_v57  ;;  %v6238_v19 = vld [vmem:[%s8005_s7 + $0x12c] ss:$8 sps:$4 sm:$0xff]  }
 0x522   :  { %2452 = vmatprep.subr.bf16.mxu0 %v6201_v22  ;;  %v5558_v26 = vpop.f32.mrb[91].mxu1  ;;  %v2262_v27 = vpack.c.bf16 %v2245_v24, %v2245_v24  ;;  %v6241_v22 = vld [vmem:[%s8005_s7 + $0x13c] ss:$8 sps:$4 sm:$0xff]   ;;  %v6244_v24 = vld [vmem:[%s8005_s7 + $0x14c] ss:$8 sps:$4 sm:$0xff]  }
 0x523   :  { %v6242_v26 = vld [vmem:[%s8005_s7 + $0x148] ss:$8 sps:$4 sm:$0xff]  }
 0x525   :  { %2453 = vmatpush1.bf16.msra.mxu0 %v6199_v23  ;;  %v7388_v29 = vpop.f32.mrb[92].mxu1  ;;  %v6239_v23 = vld [vmem:[%s8005_s7 + $0x138] ss:$8 sps:$4 sm:$0xff]  }
 0x526   :  { %2454 = vmatprep.subr.bf16.mxu0 %v6204_v25  ;;  %v5569_v31 = vpop.f32.mrb[93].mxu1  ;;  %v4983_v25 = vld [vmem:[%s8005_s7 + $0x158] sm:$0x33] }
 0x527   :  { %v6247_v31 = vld [vmem:[%s8005_s7 + $0x160] ss:$8 sps:$4 sm:$0xff]  }
 0x528   :  { %4917 = vmatmul.mubr.msk.bf16.gmra.mrb[60].mxu0 %vm2318_vm10, %v2262_v27  ;;  %v4995_v27 = vcombine.high %v4983_v25, %v4983_v25 }
 0x529   :  { %2455 = vmatpush1.bf16.msra.mxu0 %v6202_v28  ;;  %2482 = vmatprep.mubr.bf16.mxu0 %v6330_v57  ;;  %v7398_v33 = vpop.f32.mrb[94].mxu1  ;;  %v4994_v28 = vcombine.low %v4983_v25, %v4983_v25 }
 0x52a   :  { %2456 = vmatprep.subr.bf16.mxu0 %v6207_v30  ;;  %v2606_v35 = vpack.c.bf16 %v7398_v33, %v7388_v29  ;;  %v5572_v36 = vpop.f32.mrb[95].mxu1  ;;  %v6249_v30 = vld [vmem:[%s8005_s7 + $0x164] ss:$8 sps:$4 sm:$0xff]   ;;  %v6250_v33 = vld [vmem:[%s8005_s7 + $0x170] ss:$8 sps:$4 sm:$0xff]  }
 0x52b   :  { %v2901_v29 = vsel %vm2325_vm9, %v4994_v28, 0  ;;  %v6253_v36 = vld [vmem:[%s8005_s7 + $0x180] ss:$8 sps:$4 sm:$0xff]  }
 0x52d   :  { %2457 = vmatpush1.bf16.msra.mxu0 %v6205_v32  ;;  %v7411_v39 = vpop.f32.mrb[96].mxu1  ;;  %v6252_v32 = vld [vmem:[%s8005_s7 + $0x174] ss:$8 sps:$4 sm:$0xff]  }
 0x52e   :  { %2458 = vmatprep.subr.bf16.mxu0 %v6210_v34  ;;  %v5575_v42 = vpop.f32.mrb[97].mxu1  ;;  %v2607_v20 = vpack.c.bf16 %v7411_v39, %v7411_v39  ;;  %v6255_v34 = vld [vmem:[%s8005_s7 + $0x184] ss:$8 sps:$4 sm:$0xff]  }
 0x52f   :  { %v6261_v39 = vld [vmem:[%s8005_s7 + $0x1a4] ss:$8 sps:$4 sm:$0xff]  }
 0x531   :  { %2459 = vmatpush1.bf16.msra.mxu0 %v6208_v38  ;;  %v7413_v43 = vpop.f32.mrb[98].mxu1  ;;  %v6256_v38 = vld [vmem:[%s8005_s7 + $0x190] ss:$8 sps:$4 sm:$0xff]  }
 0x532   :  { %4930 = vmatprep.subr.msk.bf16.mxu0 %vm2325_vm9, %v4929_v40  ;;  %v5586_v46 = vpop.f32.mrb[99].mxu1  ;;  %v5016_v40 = vld [vmem:[%s8005_s7 + $0x1b0] sm:$0x33] }
 0x533   :  { %v5028_v42 = vcombine.high %v5016_v40, %v5016_v40 }
 0x535   :  { %2461 = vmatpush1.bf16.msra.mxu0 %v2445_v44  ;;  %v7423_v49 = vpop.f32.mrb[100].mxu1 }
 0x536   :  { %2675 = vmatprep.subr.bf16.mxu0 %v6215_v45  ;;  %v2837_v54 = vpack.c.bf16 %v7423_v49, %v7413_v43  ;;  %v5589_v55 = vpop.f32.mrb[101].mxu1  ;;  %v5027_v43 = vcombine.low %v5016_v40, %v5016_v40  ;;  %v3403_v40 = vld [vmem:[%s8008_s10 + $0x18] sm:$0xff] }
 0x538   :  { %4931 = vmatmul.mubr.msk.bf16.vlgmr.msra.gmra.mrb[56].mxu0 %vm2318_vm10, %v2154_v12  ;;  %v4961_v12 = vcombine.low %v4950_v8, %v4950_v8  ;;  %v3132_v44 = vsel %vm2325_vm9, %v5027_v43, 0  ;;  %v3404_v43 = vld [vmem:[%s8008_s10 + $0x20] sm:$0xff] }
 0x539   :  { %2676 = vmatpush1.bf16.msra.mxu0 %v6213_v47  ;;  %2492 = vmatprep.mubr.bf16.mxu0 %v6330_v57  ;;  %v7435_v53 = vpop.f32.mrb[102].mxu1 }
 0x53a   :  { %2677 = vmatprep.subr.bf16.mxu0 %v6218_v51  ;;  %v5592_v59 = vpop.f32.mrb[103].mxu1  ;;  %v2670_v14 = vsel %vm2325_vm9, %v4961_v12, 0 }
 0x53d   :  { %2678 = vmatpush1.bf16.msra.mxu0 %v6216_v50  ;;  %v7443_v61 = vpop.f32.mrb[104].mxu1 }
 0x53e   :  { %2679 = vmatprep.subr.bf16.mxu0 %v6221_v58  ;;  %v5603_v0 = vpop.f32.mrb[105].mxu1 }
 0x540   :  { %4932 = vmatmul.mubr.msk.bf16.gmra.mrb[64].mxu0 %vm2318_vm10, %v2155_v62 }
 0x541   :  { %2680 = vmatpush1.bf16.msra.mxu0 %v6219_v60  ;;  %2707 = vmatprep.mubr.bf16.mxu0 %v6330_v57  ;;  %v7455_v2 = vpop.f32.mrb[106].mxu1 }
 0x542   :  { %2681 = vmatprep.subr.bf16.mxu0 %v6224_v63  ;;  %v3068_v5 = vpack.c.bf16 %v7455_v2, %v7443_v61  ;;  %v5606_v7 = vpop.f32.mrb[107].mxu1 }
 0x545   :  { %2682 = vmatpush1.bf16.msra.mxu0 %v6222_v1  ;;  %v7468_v10 = vpop.f32.mrb[108].mxu1 }
 0x546   :  { %2683 = vmatprep.subr.bf16.mxu0 %v6227_v4  ;;  %v5609_v13 = vpop.f32.mrb[109].mxu1  ;;  %v3069_v45 = vpack.c.bf16 %v7468_v10, %v7468_v10 }
 0x549   :  { %2684 = vmatpush1.bf16.msra.mxu0 %v6225_v9  ;;  %v3194_v9 = vld [vmem:[%s8006_s8] sm:$0x3] }
 0x54a   :  { %4963 = vmatprep.subr.msk.bf16.mxu0 %vm2325_vm9, %v4962_v11  ;;  %v3199_v10 = vrot.slane %v3194_v9, %v1560_v52  ;;  %v3203_v11 = vrot.slane %v3194_v9, %v1564_v56 }
 0x54d   :  { %2686 = vmatpush1.bf16.msra.mxu0 %v2670_v14 }
 0x54e   :  { %2906 = vmatprep.subr.bf16.mxu0 %v6232_v15 }
 0x550   :  { %4964 = vmatmul.mubr.msk.bf16.vlgmr.msra.gmra.mrb[56].mxu0 %vm2318_vm10, %v2606_v35  ;;  %v2838_v35 = vpack.c.bf16 %v7435_v53, %v7435_v53 }
 0x551   :  { %2907 = vmatpush1.bf16.msra.mxu0 %v6230_v16  ;;  %2717 = vmatprep.mubr.bf16.mxu0 %v6330_v57 }
 0x552   :  { %2908 = vmatprep.subr.bf16.mxu0 %v6235_v17 }
 0x555   :  { %2909 = vmatpush1.bf16.msra.mxu0 %v6233_v18 }
 0x556   :  { %2910 = vmatprep.subr.bf16.mxu0 %v6238_v19 }
 0x558   :  { %4965 = vmatmul.mubr.msk.bf16.gmra.mrb[68].mxu0 %vm2318_vm10, %v2607_v20 }
 0x559   :  { %2911 = vmatpush1.bf16.msra.mxu0 %v6236_v21  ;;  %2938 = vmatprep.mubr.bf16.mxu0 %v6330_v57 }
 0x55a   :  { %2912 = vmatprep.subr.bf16.mxu0 %v6241_v22 }
 0x55d   :  { %2913 = vmatpush1.bf16.msra.mxu0 %v6239_v23 }
 0x55e   :  { %2914 = vmatprep.subr.bf16.mxu0 %v6244_v24 }
 0x561   :  { %2915 = vmatpush1.bf16.msra.mxu0 %v6242_v26 }
 0x562   :  { %4996 = vmatprep.subr.msk.bf16.mxu0 %vm2325_vm9, %v4995_v27 }
 0x565   :  { %2917 = vmatpush1.bf16.msra.mxu0 %v2901_v29 }
 0x566   :  { %3137 = vmatprep.subr.bf16.mxu0 %v6249_v30 }
 0x568   :  { %4997 = vmatmul.mubr.msk.bf16.vlgmr.msra.gmra.mrb[56].mxu0 %vm2318_vm10, %v2837_v54 }
 0x569   :  { %3138 = vmatpush1.bf16.msra.mxu0 %v6247_v31  ;;  %2948 = vmatprep.mubr.bf16.mxu0 %v6330_v57 }
 0x56a   :  { %3139 = vmatprep.subr.bf16.mxu0 %v6252_v32 }
 0x56d   :  { %3140 = vmatpush1.bf16.msra.mxu0 %v6250_v33  ;;  %v3218_v33 = vld [vmem:[%s8007_s9] sm:$0xff] }
 0x56e   :  { %3141 = vmatprep.subr.bf16.mxu0 %v6255_v34  ;;  %v3219_v34 = vld [vmem:[%s8007_s9 + $0x8] sm:$0x3] }
 0x570   :  { %4998 = vmatmul.mubr.msk.bf16.gmra.mrb[72].mxu0 %vm2318_vm10, %v2838_v35  ;;  %v3400_v35 = vld [vmem:[%s8008_s10] sm:$0xff] }
 0x571   :  { %3142 = vmatpush1.bf16.msra.mxu0 %v6253_v36  ;;  %3169 = vmatprep.mubr.bf16.mxu0 %v6330_v57  ;;  %v3401_v36 = vld [vmem:[%s8008_s10 + $0x8] sm:$0xff] }
 0x572   :  { %3143 = vmatprep.subr.bf16.mxu0 %v6258_v37  ;;  %v5036_v37 = vld [vmem:[%s8007_s9 + $0x10] sm:$0xff] }
 0x575   :  { %3144 = vmatpush1.bf16.msra.mxu0 %v6256_v38  ;;  %v5939_v38 = vpack.c.bf16 %v3401_v36, %v3400_v35  ;;  %v5056_v35 = vld [vmem:[%s8008_s10 + $0x100] sm:$0xff]  ;;  %v5057_v36 = vld [vmem:[%s8008_s10 + $0x108] sm:$0xff] }
 0x576   :  { %3145 = vmatprep.subr.bf16.mxu0 %v6261_v39  ;;  %v3402_v39 = vld [vmem:[%s8008_s10 + $0x10] sm:$0xff] }
 0x579   :  { %3146 = vmatpush1.bf16.msra.mxu0 %v6259_v41  ;;  %v5037_v41 = vld [vmem:[%s8007_s9 + $0x18] sm:$0x3] }
 0x57a   :  { %5029 = vmatprep.subr.msk.bf16.mxu0 %vm2325_vm9, %v5028_v42  ;;  %v5942_v42 = vpack.c.bf16 %v3403_v40, %v3402_v39  ;;  %v5059_v39 = vld [vmem:[%s8008_s10 + $0x118] sm:$0xff] }
 0x57d   :  { %3148 = vmatpush1.bf16.msra.mxu0 %v3132_v44  ;;  %v3405_v44 = vld [vmem:[%s8008_s10 + $0x28] sm:$0xff] }
 0x57e   :  { %6002 = vmatprep.subr.bf16.mxu0 %v6327_v3 }
 0x580   :  { %5030 = vmatmul.mubr.msk.bf16.vlgmr.msra.gmra.mrb[56].mxu0 %vm2318_vm10, %v3068_v5 }
 0x581   :  { %3179 = vmatprep.mubr.bf16.mxu0 %v6330_v57 }
 0x588   :  { %5031 = vmatmul.mubr.msk.bf16.gmra.mrb[76].mxu0 %vm2318_vm10, %v3069_v45  ;;  %v5945_v45 = vpack.c.bf16 %v3405_v44, %v3404_v43  ;;  %v5062_v44 = vld [vmem:[%s8008_s10 + $0x130] sm:$0xff] }
 0x589   :  { %5621 = vmatprep.mubr.msk.f32.mxu0 %vm6328_vm0, %v6329_v6 }
 0x5fb   :  { %v2376_v46 = vpop.f32.mrb[60].mxu0 }
 0x5fc   :  { %v2378_v47 = vpop.f32.mrb[61].mxu0 }
 0x5fd   :  { %v2380_v49 = vpop.f32.mrb[62].mxu0 }
 0x5fe   :  { %v2381_v51 = vpop.f32.mrb[63].mxu0 }
 0x5ff   :  { %v3408_v51 = vld [vmem:[%s8008_s10 + $0x40] sm:$0xff] }
 0x613   :  { %v2494_v54 = vpop.f32.mrb[64].mxu0 }
 0x614   :  { %v2495_v55 = vadd.f32 %v2494_v54, %v2376_v46  ;;  %v2496_v50 = vpop.f32.mrb[65].mxu0  ;;  %v3406_v46 = vld [vmem:[%s8008_s10 + $0x30] sm:$0xff]  ;;  %v3409_v54 = vld [vmem:[%s8008_s10 + $0x48] sm:$0xff] }
 0x615   :  { %v2497_v53 = vadd.f32 %v2496_v50, %v2378_v47  ;;  %v2498_v58 = vpop.f32.mrb[66].mxu0  ;;  %v3407_v47 = vld [vmem:[%s8008_s10 + $0x38] sm:$0xff]  ;;  %v3410_v50 = vld [vmem:[%s8008_s10 + $0x50] sm:$0xff] }
 0x616   :  { %v2499_v59 = vpop.f32.mrb[67].mxu0  ;;  %v5948_v49 = vpack.c.bf16 %v3407_v47, %v3406_v46 }
 0x617   :  { %v3412_v59 = vld [vmem:[%s8008_s10 + $0x60] sm:$0xff] }
 0x62b   :  { %v2719_v60 = vpop.f32.mrb[68].mxu0 }
 0x62c   :  { %v2730_v57 = vadd.f32 %v2719_v60, %v2495_v55  ;;  %v2721_v61 = vpop.f32.mrb[69].mxu0  ;;  %v5951_v55 = vpack.c.bf16 %v3409_v54, %v3408_v51  ;;  %v3413_v60 = vld [vmem:[%s8008_s10 + $0x68] sm:$0xff] }
 0x62d   :  { %v2731_v62 = vadd.f32 %v2721_v61, %v2497_v53  ;;  %v2723_v63 = vpop.f32.mrb[70].mxu0  ;;  %v3411_v53 = vld [vmem:[%s8008_s10 + $0x58] sm:$0xff]  ;;  %v3414_v61 = vld [vmem:[%s8008_s10 + $0x70] sm:$0xff] }
 0x62e   :  { %v2724_v0 = vpop.f32.mrb[71].mxu0  ;;  %v5954_v58 = vpack.c.bf16 %v3411_v53, %v3410_v50 }
 0x62f   :  { %v3416_v0 = vld [vmem:[%s8008_s10 + $0x80] sm:$0xff] }
 0x643   :  { %v2950_v1 = vpop.f32.mrb[72].mxu0 }
 0x644   :  { %v2961_v2 = vadd.f32 %v2950_v1, %v2730_v57  ;;  %v2952_v4 = vpop.f32.mrb[73].mxu0  ;;  %v5957_v57 = vpack.c.bf16 %v3413_v60, %v3412_v59  ;;  %v3417_v1 = vld [vmem:[%s8008_s10 + $0x88] sm:$0xff] }
 0x645   :  { %v2962_v5 = vadd.f32 %v2952_v4, %v2731_v62  ;;  %v2954_v7 = vpop.f32.mrb[74].mxu0  ;;  %v3415_v62 = vld [vmem:[%s8008_s10 + $0x78] sm:$0xff]  ;;  %v3418_v4 = vld [vmem:[%s8008_s10 + $0x90] sm:$0xff] }
 0x646   :  { %v2955_v8 = vpop.f32.mrb[75].mxu0  ;;  %v5960_v63 = vpack.c.bf16 %v3415_v62, %v3414_v61  ;;  %v5068_v62 = vld [vmem:[%s8009_s11 + $0x2] sm:$0x3] }
 0x653   :  { %v3171_v12 = vpop.f32.mrb[56].mxu0 }
 0x654   :  { %v3206_v13 = vadd.f32 %v3199_v10, %v3171_v12  ;;  %v3173_v14 = vpop.f32.mrb[57].mxu0  ;;  %v5044_v12 = vld [vmem:[%s8008_s10 + $0xa0] sm:$0xff] }
 0x655   :  { %v3207_v15 = vadd.f32 %v3203_v11, %v3173_v14  ;;  %v3175_v16 = vpop.f32.mrb[58].mxu0 }
 0x656   :  { %v3208_v17 = vadd.f32 %v3199_v10, %v3175_v16  ;;  %v3177_v18 = vpop.f32.mrb[59].mxu0  ;;  %v3212_v20 = vmax.f32 %v3206_v13, 0.0  ;;  %v5045_v13 = vld [vmem:[%s8008_s10 + $0xa8] sm:$0xff] }
 0x657   :  { %v3209_v19 = vadd.f32 %v3203_v11, %v3177_v18  ;;  %v3213_v22 = vmax.f32 %v3207_v15, 0.0  ;;  %v5969_v18 = vpack.c.bf16 %v5045_v13, %v5044_v12 }
 0x658   :  { %v3214_v21 = vmax.f32 %v3208_v17, 0.0 }
 0x659   :  { %v3215_v23 = vmax.f32 %v3209_v19, 0.0  ;;  %v5046_v19 = vld [vmem:[%s8008_s10 + $0xb0] sm:$0xff] }
 0x65a   :  { %v5932_v24 = vpack.c.bf16 %v3214_v21, %v3212_v20  ;;  %v5047_v20 = vld [vmem:[%s8008_s10 + $0xb8] sm:$0xff] }
 0x65b   :  { %v5930_v25 = vpack.c.bf16 %v3215_v23, %v3213_v22  ;;  %v3181_v26 = vpop.f32.mrb[76].mxu0 }
 0x65c   :  { %v3192_v27 = vadd.f32 %v3181_v26, %v2961_v2  ;;  %v3183_v52 = vpop.f32.mrb[77].mxu0  ;;  %v5963_v2 = vpack.c.bf16 %v3417_v1, %v3416_v0  ;;  %v5048_v26 = vld [vmem:[%s8008_s10 + $0xc0] sm:$0xff]  ;;  %v6264_v0 = vld [vmem:[%s8010_s12 + $0x28] sm:$0xff]  }
 0x65d   :  { %v3193_v28 = vadd.f32 %v3183_v52, %v2962_v5  ;;  %v3185_v48 = vpop.f32.mrb[78].mxu0  ;;  %5931 = vmatprep.subr.bf16.mxu1 %v5930_v25  ;;  %v3419_v5 = vld [vmem:[%s8008_s10 + $0x98] sm:$0xff]  ;;  %v6268_v1 = vld [vmem:[%s8010_s12] sm:$0xff]  }
 0x65e   :  { %v3210_v56 = vadd.f32 %v3199_v10, %v3192_v27  ;;  %v3186_v29 = vpop.f32.mrb[79].mxu0  ;;  %5933 = vmatpush1.bf16.msra.mxu1 %v5932_v24  ;;  %v5966_v7 = vpack.c.bf16 %v3419_v5, %v3418_v4  ;;  %v5049_v27 = vld [vmem:[%s8008_s10 + $0xc8] sm:$0xff]  ;;  %v5051_v48 = vld [vmem:[%s8008_s10 + $0xd8] sm:$0xff]  ;;  %v6267_v5 = vld [vmem:[%s8010_s12 + $0x40] sm:$0xff]  }
 0x65f   :  { %v3211_v30 = vadd.f32 %v3203_v11, %v3193_v28  ;;  %v5975_v52 = vpack.c.bf16 %v5049_v27, %v5048_v26  ;;  %v5050_v28 = vld [vmem:[%s8008_s10 + $0xd0] sm:$0xff]  ;;  %v5052_v29 = vld [vmem:[%s8008_s10 + $0xe0] sm:$0xff]  ;;  %v6266_v4 = vld [vmem:[%s8010_s12 + $0x38] sm:$0xff]  }
 0x660   :  { %v3216_v32 = vmax.f32 %v3210_v56, 0.0  ;;  %v5978_v56 = vpack.c.bf16 %v5051_v48, %v5050_v28  ;;  %v6280_v26 = vld [vmem:[%s8010_s12 + $0x88] sm:$0xff]   ;;  %v6281_v27 = vld [vmem:[%s8010_s12 + $0x70] sm:$0xff]   ;;  %v6283_v28 = vld [vmem:[%s8010_s12 + $0x98] sm:$0xff]  }
 0x661   :  { %v3217_v31 = vmax.f32 %v3211_v30, 0.0  ;;  %v5053_v30 = vld [vmem:[%s8008_s10 + $0xe8] sm:$0xff] }
 0x663   :  { %5032 = vmatprep.subr.msk.mxu1 %vm2059_vm5, %v3217_v31 }
 0x664   :  { %5033 = vmatpush1.msk.msra.mxu1 %vm2059_vm5, %v3216_v32 }
 0x665   :  { %5034 = vmatmul.mubr.msk.f32.vlgmr.msra.gmra.mrb[110].mxu1 %vm3220_vm11, %v3218_v33  ;;  %5935 = vmatprep.subr.bf16.mxu1 %v5930_v25  ;;  %v5972_v25 = vpack.c.bf16 %v5047_v20, %v5046_v19  ;;  %v5055_v33 = vld [vmem:[%s8008_s10 + $0xf8] sm:$0xff]  ;;  %v5093_v20 = vld [vmem:[%s8009_s11 + $0x4] sm:$0x3] }
 0x666   :  { %5937 = vmatpush1.bf16.msra.mxu1 %v5932_v24  ;;  %3303 = vmatprep.mubr.f32.mxu1 %v6329_v6  ;;  %v6275_v19 = vld [vmem:[%s8010_s12 + $0x58] sm:$0xff]  }
 0x667   :  { %5038 = vmatprep.subr.msk.mxu1 %vm2059_vm5, %v3217_v31  ;;  %v5981_v31 = vpack.c.bf16 %v5053_v30, %v5052_v29 }
 0x669   :  { %5035 = vmatmul.mubr.msk.f32.gmra.mrb[112].mxu1 %vm3220_vm11, %v3219_v34 }
 0x66a   :  { %5039 = vmatpush1.msk.msra.mxu1 %vm2059_vm5, %v3216_v32  ;;  %3383 = vmatprep.mubr.f32.mxu1 %v6329_v6  ;;  %v5054_v32 = vld [vmem:[%s8008_s10 + $0xf0] sm:$0xff] }
 0x66b   :  { %5938 = vmatprep.subr.bf16.mxu1 %v6327_v3  ;;  %v5984_v34 = vpack.c.bf16 %v5055_v33, %v5054_v32 }
 0x66d   :  { %5040 = vmatmul.mubr.msk.f32.vlgmr.msra.gmra.mrb[114].mxu1 %vm3220_vm11, %v5036_v37  ;;  %v5987_v37 = vpack.c.bf16 %v5057_v36, %v5056_v35 }
 0x66e   :  { %3389 = vmatprep.mubr.f32.mxu1 %v6329_v6  ;;  %5940 = vmatpush1.bf16.msra.mxu1 %v5939_v38  ;;  %v5058_v38 = vld [vmem:[%s8008_s10 + $0x110] sm:$0xff] }
 0x66f   :  { %5941 = vmatprep.subr.bf16.mxu1 %v6327_v3  ;;  %v5990_v40 = vpack.c.bf16 %v5059_v39, %v5058_v38 }
 0x671   :  { %5041 = vmatmul.mubr.msk.f32.gmra.mrb[116].mxu1 %vm3220_vm11, %v5037_v41  ;;  %v5060_v41 = vld [vmem:[%s8008_s10 + $0x120] sm:$0xff] }
 0x672   :  { %5943 = vmatpush1.bf16.msra.mxu1 %v5942_v42  ;;  %v5061_v42 = vld [vmem:[%s8008_s10 + $0x128] sm:$0xff] }
 0x673   :  { %5944 = vmatprep.subr.bf16.mxu1 %v6327_v3  ;;  %v5993_v43 = vpack.c.bf16 %v5061_v42, %v5060_v41  ;;  %v5131_v41 = vld [vmem:[%s8009_s11 + $0x8] sm:$0x3]  ;;  %v6284_v42 = vld [vmem:[%s8010_s12 + $0xa0] sm:$0xff]  }
 0x676   :  { %5946 = vmatpush1.bf16.msra.mxu1 %v5945_v45  ;;  %v5063_v45 = vld [vmem:[%s8008_s10 + $0x138] sm:$0xff] }
 0x677   :  { %5947 = vmatprep.subr.bf16.mxu1 %v6327_v3  ;;  %v5996_v46 = vpack.c.bf16 %v5063_v45, %v5062_v44  ;;  %v6286_v44 = vld [vmem:[%s8010_s12 + $0xb0] sm:$0xff]   ;;  %v6287_v45 = vld [vmem:[%s8010_s12 + $0xb8] sm:$0xff]  }
 0x67a   :  { %5949 = vmatpush1.bf16.msra.mxu1 %v5948_v49 }
 0x67b   :  { %5950 = vmatprep.subr.bf16.mxu1 %v6327_v3 }
 0x67e   :  { %5952 = vmatpush1.bf16.msra.mxu1 %v5951_v55 }
 0x67f   :  { %5953 = vmatprep.subr.bf16.mxu1 %v6327_v3 }
 0x682   :  { %5955 = vmatpush1.bf16.msra.mxu1 %v5954_v58 }
 0x683   :  { %5956 = vmatprep.subr.bf16.mxu1 %v6327_v3 }
 0x686   :  { %5958 = vmatpush1.bf16.msra.mxu1 %v5957_v57 }
 0x687   :  { %5959 = vmatprep.subr.bf16.mxu1 %v6327_v3 }
 0x68a   :  { %5961 = vmatpush1.bf16.msra.mxu1 %v5960_v63  ;;  %v3600_v63 = vld [vmem:[%s8009_s11] sm:$0x3] }
 0x68b   :  { %5962 = vmatprep.subr.bf16.mxu1 %v6327_v3 }
 0x68e   :  { %5964 = vmatpush1.bf16.msra.mxu1 %v5963_v2  ;;  %v6265_v2 = vld [vmem:[%s8010_s12 + $0x30] sm:$0xff]  }
 0x68f   :  { %5965 = vmatprep.subr.bf16.mxu1 %v6327_v3 }
 0x692   :  { %5967 = vmatpush1.bf16.msra.mxu1 %v5966_v7  ;;  %v6269_v7 = vld [vmem:[%s8010_s12 + $0x48] sm:$0xff]  }
 0x693   :  { %5968 = vmatprep.subr.bf16.mxu1 %v6327_v3 }
 0x738   :  { %v3299_v8 = vpop.f32.mrb[110].mxu1 }
 0x739   :  { %v3301_v9 = vpop.f32.mrb[111].mxu1 }
 0x73c   :  { %v3305_v10 = vpop.f32.mrb[112].mxu1 }
 0x73d   :  { %v3307_v11 = vpop.f32.mrb[113].mxu1 }
 0x740   :  { %v3385_v14 = vpop.f32.mrb[114].mxu1 }
 0x741   :  { %v3396_v15 = vmax.f32 %v3299_v8, %v3385_v14  ;;  %v3387_v16 = vpop.f32.mrb[115].mxu1  ;;  %v6270_v8 = vld [vmem:[%s8010_s12 + $0x8] sm:$0xff]  }
 0x742   :  { %v3397_v17 = vmax.f32 %v3301_v9, %v3387_v16  ;;  %v6271_v9 = vld [vmem:[%s8010_s12 + $0x10] sm:$0xff]  }
 0x744   :  { %v3391_v21 = vpop.f32.mrb[116].mxu1  ;;  %5042 = vmatprep.mubr.msk.f32.mxu1 %vm3420_vm12, %v3397_v17 }
 0x745   :  { %v3398_v22 = vmax.f32 %v3305_v10, %v3391_v21  ;;  %v3393_v23 = vpop.f32.mrb[117].mxu1  ;;  %3492 = vmatmul.mubr.f32.vlgmr.msra.gmra.mrb[118].mxu1 %v3396_v15  ;;  %v6272_v10 = vld [vmem:[%s8010_s12 + $0x18] sm:$0xff]   ;;  %v6277_v21 = vld [vmem:[%s8010_s12 + $0x60] sm:$0xff]  }
 0x746   :  { %v3399_v24 = vmax.f32 %v3307_v11, %v3393_v23  ;;  %5970 = vmatpush1.bf16.msra.mxu1 %v5969_v18  ;;  %v6273_v11 = vld [vmem:[%s8010_s12 + $0x20] sm:$0xff]   ;;  %v6276_v23 = vld [vmem:[%s8010_s12 + $0x78] sm:$0xff]  }
 0x747   :  { %5971 = vmatprep.subr.bf16.mxu1 %v6327_v3 }
 0x748   :  { %5043 = vmatprep.mubr.msk.f32.mxu1 %vm3420_vm12, %v3399_v24 }
 0x749   :  { %3497 = vmatmul.mubr.f32.gmra.mrb[120].mxu1 %v3398_v22 }
 0x74a   :  { %5973 = vmatpush1.bf16.msra.mxu1 %v5972_v25  ;;  %5064 = vmatprep.mubr.msk.f32.mxu1 %vm3420_vm12, %v3397_v17  ;;  %v6274_v17 = vld [vmem:[%s8010_s12 + $0x50] sm:$0xff]   ;;  %v6278_v25 = vld [vmem:[%s8010_s12 + $0x80] sm:$0xff]  }
 0x74b   :  { %5974 = vmatprep.subr.bf16.mxu1 %v6327_v3 }
 0x74e   :  { %5976 = vmatpush1.bf16.msra.mxu1 %v5975_v52  ;;  %v6282_v52 = vld [vmem:[%s8010_s12 + $0x90] sm:$0xff]  }
 0x74f   :  { %5977 = vmatprep.subr.bf16.mxu1 %v6327_v3 }
 0x752   :  { %5979 = vmatpush1.bf16.msra.mxu1 %v5978_v56 }
 0x753   :  { %5980 = vmatprep.subr.bf16.mxu1 %v6327_v3 }
 0x756   :  { %5982 = vmatpush1.bf16.msra.mxu1 %v5981_v31 }
 0x757   :  { %5983 = vmatprep.subr.bf16.mxu1 %v6327_v3 }
 0x75a   :  { %5985 = vmatpush1.bf16.msra.mxu1 %v5984_v34 }
 0x75b   :  { %5986 = vmatprep.subr.bf16.mxu1 %v6327_v3 }
 0x75e   :  { %5988 = vmatpush1.bf16.msra.mxu1 %v5987_v37 }
 0x75f   :  { %5989 = vmatprep.subr.bf16.mxu1 %v6327_v3 }
 0x762   :  { %5991 = vmatpush1.bf16.msra.mxu1 %v5990_v40 }
 0x763   :  { %5992 = vmatprep.subr.bf16.mxu1 %v6327_v3 }
 0x766   :  { %5994 = vmatpush1.bf16.msra.mxu1 %v5993_v43  ;;  %v6285_v43 = vld [vmem:[%s8010_s12 + $0xa8] sm:$0xff]  }
 0x767   :  { %5995 = vmatprep.subr.bf16.mxu1 %v6327_v3 }
 0x76a   :  { %5997 = vmatpush1.bf16.msra.mxu1 %v5996_v46  ;;  %v6288_v46 = vld [vmem:[%s8010_s12 + $0xc0] sm:$0xff]  }
 0x76b   :  { %5998 = vmatprep.subr.bf16.mxu1 %v6327_v3 }
 0x76d   :  { %3588 = vmatmul.mubr.f32.vlgmr.msra.gmra.mrb[122].mxu1 %v3396_v15 }
 0x76e   :  { %5065 = vmatprep.mubr.msk.f32.mxu1 %vm3420_vm12, %v3399_v24  ;;  %v6279_v24 = vld [vmem:[%s8010_s12 + $0x68] sm:$0xff]   ;;  %s6333_s12 = smov [#allocation2]  }
 0x76f   :  { %s4641_s4 = sshll.u32 %s6333_s12, 4  ;;  %s4642_s4 = int_to_ptr.vmem [resolvable:$true] %s4641_s4 }
 0x770   :  { %p6308_p1 = scmp.lt.s32.totalorder %s4642_s4, %s4642_s4 }
 0x771   :  { %3593 = vmatmul.mubr.f32.gmra.mrb[124].mxu1 %v3398_v22  ;;  %v5112_v22 = vld [vmem:[%s8009_s11 + $0x6] sm:$0x3] }
 0x772   :  { %5614 = vmatprep.mubr.msk.f32.mxu1 %vm6328_vm0, %v6329_v6 }
 0x818   :  { %v3493_v47 = vpop.f32.mrb[118].mxu1 }
 0x819   :  { %v3495_v49 = vpop.f32.mrb[119].mxu1 }
 0x81a   :  { %v6290_v49 = vld [vmem:[%s8012_s14 + $0x8] sm:$0xff]  }
 0x81c   :  { %v3498_v51 = vpop.f32.mrb[120].mxu1 }
 0x81d   :  { %v3500_v54 = vpop.f32.mrb[121].mxu1 }
 0x81e   :  { %v6292_v54 = vld [vmem:[%s8012_s14 + $0x18] sm:$0xff]  }
 0x840   :  { %v3589_v55 = vpop.f32.mrb[122].mxu1 }
 0x841   :  { %v3598_v50 = vmax.f32 %v3493_v47, %v3589_v55  ;;  %v3591_v53 = vpop.f32.mrb[123].mxu1  ;;  %v6289_v47 = vld [vmem:[%s8012_s14] sm:$0xff]  }
 0x842   :  { %v6293_v55 = vld [vmem:[%s8012_s14 + $0x20] sm:$0xff]  }
 0x844   :  { %v3594_v58 = vpop.f32.mrb[124].mxu1 }
 0x845   :  { %v3599_v59 = vmax.f32 %v3498_v51, %v3594_v58  ;;  %v3596_v60 = vpop.f32.mrb[125].mxu1  ;;  %v6291_v51 = vld [vmem:[%s8012_s14 + $0x10] sm:$0xff]  }
 0x847   :  { %v7754_v61 = vpack.c.bf16 %v3599_v59, %v3598_v50  ;;  %v6294_v50 = vld [vmem:[%s8012_s14 + $0x28] sm:$0xff]  }
 0x849   :  { %6001 = vmatpush3.bf16.msk.msra.mxu1 %vm7750_vm13, %v7754_v61  ;;  %6005 = vmatpush3.bf16.msk.msra.mxu0 %vm7750_vm13, %v7754_v61 }
 0x84a   :  { %5624 = vmatprep.subr.bf16.mxu1 %v6329_v6  ;;  %5638 = vmatprep.subr.bf16.mxu0 %v6329_v6 }
 0x84c   :  { %5622 = vmatmul.mubr.msk.f32.vlgmr.msra.gmra.mrb[54].mxu0 %vm3601_vm14, %v5068_v62  ;;  %5615 = vmatmul.mubr.msk.f32.vlgmr.msra.gmra.mrb[126].mxu1 %vm3601_vm14, %v3600_v63 }
 0x84d   :  { %5625 = vmatpush3.bf16.msra.mxu1 %v6264_v0  ;;  %5639 = vmatpush3.bf16.msra.mxu0 %v6268_v1 }
 0x84e   :  { %5626 = vmatprep.subr.bf16.mxu1 %v6329_v6  ;;  %5640 = vmatprep.subr.bf16.mxu0 %v6329_v6 }
 0x84f   :  { %5634 = vmatprep.mubr.msk.bf16.mxu1 %vm6328_vm0, %v6329_v6  ;;  %5648 = vmatprep.mubr.msk.bf16.mxu0 %vm6328_vm0, %v6329_v6 }
 0x851   :  { %5627 = vmatpush3.bf16.msra.mxu1 %v6265_v2  ;;  %5641 = vmatpush3.bf16.msra.mxu0 %v6270_v8  ;;  %v6296_v8 = vld [vmem:[%s8012_s14 + $0x38] ss:$0 sps:$4 sm:$0xff]  }
 0x852   :  { %5628 = vmatprep.subr.bf16.mxu1 %v6329_v6  ;;  %5642 = vmatprep.subr.bf16.mxu0 %v6329_v6 }
 0x855   :  { %5629 = vmatpush3.bf16.msra.mxu1 %v6266_v4  ;;  %5643 = vmatpush3.bf16.msra.mxu0 %v6271_v9  ;;  %v4488_v9 = vsel %vm2059_vm5, %v6296_v8, 0 }
 0x856   :  { %5630 = vmatprep.subr.bf16.mxu1 %v6329_v6  ;;  %5644 = vmatprep.subr.bf16.mxu0 %v6329_v6 }
 0x859   :  { %5631 = vmatpush3.bf16.msra.mxu1 %v6267_v5  ;;  %5645 = vmatpush3.bf16.msra.mxu0 %v6272_v10  ;;  %v6297_v10 = vld [vmem:[%s8014_s16] sm:$0xff]  }
 0x85a   :  { %5632 = vmatprep.subr.bf16.mxu1 %v6329_v6  ;;  %5646 = vmatprep.subr.bf16.mxu0 %v6329_v6 }
 0x85d   :  { %5633 = vmatpush3.bf16.msra.mxu1 %v6269_v7  ;;  %5647 = vmatpush3.bf16.msra.mxu0 %v6273_v11  ;;  %v6295_v7 = vld [vmem:[%s8012_s14 + $0x30] sm:$0xff]   ;;  %v6298_v11 = vld [vmem:[%s8014_s16 + $0x8] sm:$0xff]  }
 0x85e   :  { %6006 = vmatprep.subr.bf16.mxu1 %v6327_v3  ;;  %5659 = vmatprep.subr.bf16.mxu0 %v6329_v6 }
 0x91f   :  { %v3760_v12 = vpop.f32.mrb[54].mxu0  ;;  %v3674_v13 = vpop.f32.mrb[126].mxu1 }
 0x920   :  { %v3775_v14 = vpack.c.bf16 %v3760_v12, %v3760_v12  ;;  %v3688_v15 = vpack.c.bf16 %v3674_v13, %v3674_v13  ;;  %v5623_v16 = vpop.f32.mrb[55].mxu0  ;;  %v5616_v18 = vpop.f32.mrb[127].mxu1  ;;  %v6299_v12 = vld [vmem:[%s8014_s16 + $0x10] sm:$0xff]   ;;  %v6300_v13 = vld [vmem:[%s8014_s16 + $0x18] sm:$0xff]  }
 0x922   :  { %5635 = vmatmul.mubr.msk.bf16.vlgmr.msra.gmra.mrb[128].mxu1 %vm3806_vm15, %v3775_v14  ;;  %5649 = vmatmul.mubr.msk.bf16.vlgmr.msra.gmra.mrb[80].mxu0 %vm3806_vm15, %v3688_v15  ;;  %v5150_v15 = vld [vmem:[%s8011_s13] ss:$0 sm:$0xff] }
 0x923   :  { %6009 = vmatpush3.bf16.msk.msra.mxu1 %vm7750_vm13, %v7754_v61  ;;  %5656 = vmatprep.mubr.msk.f32.mxu1 %vm6328_vm0, %v6329_v6 }
 0x924   :  { %6010 = vmatprep.subr.bf16.mxu1 %v6327_v3  ;;  %5660 = vmatpush3.bf16.msra.mxu0 %v6274_v17 }
 0x925   :  { %5661 = vmatprep.subr.bf16.mxu0 %v6329_v6  ;;  %5669 = vmatprep.mubr.msk.bf16.mxu0 %vm6328_vm0, %v6329_v6 }
 0x928   :  { %5662 = vmatpush3.bf16.msra.mxu0 %v6275_v19 }
 0x929   :  { %5663 = vmatprep.subr.bf16.mxu0 %v6329_v6 }
 0x92a   :  { %5657 = vmatmul.mubr.msk.f32.vlgmr.msra.gmra.mrb[132].mxu1 %vm3601_vm14, %v5093_v20 }
 0x92b   :  { %6013 = vmatpush3.bf16.msk.msra.mxu1 %vm7750_vm13, %v7754_v61  ;;  %5677 = vmatprep.mubr.msk.f32.mxu1 %vm6328_vm0, %v6329_v6 }
 0x92c   :  { %5680 = vmatprep.subr.bf16.mxu1 %v6329_v6  ;;  %5664 = vmatpush3.bf16.msra.mxu0 %v6277_v21 }
 0x92d   :  { %5665 = vmatprep.subr.bf16.mxu0 %v6329_v6 }
 0x92e   :  { %5678 = vmatmul.mubr.msk.f32.vlgmr.msra.gmra.mrb[134].mxu1 %vm3601_vm14, %v5112_v22 }
 0x92f   :  { %5681 = vmatpush3.bf16.msra.mxu1 %v6276_v23  ;;  %5690 = vmatprep.mubr.msk.bf16.mxu1 %vm6328_vm0, %v6329_v6  ;;  %v6301_v23 = vld [vmem:[%s8014_s16 + $0x20] sm:$0xff]  }
 0x930   :  { %5682 = vmatprep.subr.bf16.mxu1 %v6329_v6  ;;  %5666 = vmatpush3.bf16.msra.mxu0 %v6279_v24  ;;  %v6302_v24 = vld [vmem:[%s8014_s16 + $0x28] ss:$0 sps:$4 sm:$0x77]  }
 0x931   :  { %5667 = vmatprep.subr.bf16.mxu0 %v6329_v6 }
 0x933   :  { %5683 = vmatpush3.bf16.msra.mxu1 %v6278_v25  ;;  %v6332_v25 = vmov 65535  }
 0x934   :  { %5684 = vmatprep.subr.bf16.mxu1 %v6329_v6  ;;  %5668 = vmatpush3.bf16.msra.mxu0 %v6281_v27 }
 0x935   :  { %6014 = vmatprep.subr.bf16.mxu0 %v6327_v3 }
 0x937   :  { %5685 = vmatpush3.bf16.msra.mxu1 %v6280_v26  ;;  %v4588_v26 = vsel %vm2325_vm9, 4294967295, %v6332_v25 }
 0x938   :  { %5686 = vmatprep.subr.bf16.mxu1 %v6329_v6  ;;  %v4589_v27 = vsel %vm4587_vm1, %v4588_v26, 0 }
 0x93b   :  { %5687 = vmatpush3.bf16.msra.mxu1 %v6282_v52  ;;  %v4591_v52 = vand.u32 %v6302_v24, %v4589_v27 }
 0x93c   :  { %5688 = vmatprep.subr.bf16.mxu1 %v6329_v6 }
 0x93f   :  { %5689 = vmatpush3.bf16.msra.mxu1 %v6283_v28  ;;  %v5151_v28 = vld [vmem:[%s8013_s15] ss:$0 sm:$0xff]  ;;  %s6303_s15 = scalar_lea.vmem %s4642_s4, 32 }
 0x940   :  { %5715 = vmatprep.subr.bf16.mxu1 %v6329_v6  ;;  %p6304_p0 = scmp.ne.s32.totalorder %s4642_s4, %s6303_s15  ;;  %p6309_p2 = scmp.lt.s32.totalorder %s6303_s15, %s6303_s15 }
 0x942   :  { %p6310_p3 = por %p6309_p2, %p6308_p1 }
 0x944   :  { %p6311_p4 = pnand %p6310_p3, %p6304_p0 }
 0x9f5   :  { %v3844_v48 = vpop.f32.mrb[128].mxu1  ;;  %v3917_v56 = vpop.f32.mrb[80].mxu0 }
 0x9f6   :  { %v5636_v29 = vpop.f32.mrb[129].mxu1  ;;  %v3918_v30 = vadd.f32 %v3917_v56, %v3844_v48  ;;  %v5650_v31 = vpop.f32.mrb[81].mxu0 }
 0x9f7   :  { %v3847_v3 = vpop.f32.mrb[130].mxu1  ;;  %v3920_v32 = vpop.f32.mrb[82].mxu0 }
 0x9f8   :  { %v5637_v33 = vpop.f32.mrb[131].mxu1  ;;  %v5651_v34 = vpop.f32.mrb[83].mxu0 }
 0x9fd   :  { %v3994_v35 = vpop.f32.mrb[132].mxu1 }
 0x9fe   :  { %v4009_v36 = vpack.c.bf16 %v3994_v35, %v3994_v35  ;;  %v5658_v37 = vpop.f32.mrb[133].mxu1 }
 0xa00   :  { %5670 = vmatmul.mubr.msk.bf16.vlgmr.msra.gmra.mrb[84].mxu0 %vm3806_vm15, %v4009_v36 }
 0xa01   :  { %6017 = vmatpush3.bf16.msk.msra.mxu0 %vm7750_vm13, %v7754_v61  ;;  %v4155_v38 = vpop.f32.mrb[134].mxu1  ;;  %5698 = vmatprep.mubr.msk.f32.mxu0 %vm6328_vm0, %v6329_v6 }
 0xa02   :  { %v4170_v39 = vpack.c.bf16 %v4155_v38, %v4155_v38  ;;  %5701 = vmatprep.subr.bf16.mxu0 %v6329_v6  ;;  %v5679_v40 = vpop.f32.mrb[135].mxu1 }
 0xa04   :  { %5691 = vmatmul.mubr.msk.bf16.vlgmr.msra.gmra.mrb[136].mxu1 %vm3806_vm15, %v4170_v39 }
 0xa05   :  { %5731 = vmatprep.mubr.msk.bf16.mxu1 %vm6328_vm0, %v6329_v6  ;;  %5716 = vmatpush3.bf16.msra.mxu1 %v6289_v47 }
 0xa06   :  { %5717 = vmatprep.subr.bf16.mxu1 %v6329_v6 }
 0xa08   :  { %5699 = vmatmul.mubr.msk.f32.vlgmr.msra.gmra.mrb[88].mxu0 %vm3601_vm14, %v5131_v41 }
 0xa09   :  { %5702 = vmatpush3.bf16.msra.mxu0 %v6284_v42  ;;  %5711 = vmatprep.mubr.msk.bf16.mxu0 %vm6328_vm0, %v6329_v6 }
 0xa0a   :  { %5703 = vmatprep.subr.bf16.mxu0 %v6329_v6  ;;  %5718 = vmatpush3.bf16.msra.mxu1 %v6290_v49 }
 0xa0b   :  { %5719 = vmatprep.subr.bf16.mxu1 %v6329_v6 }
 0xa0d   :  { %5704 = vmatpush3.bf16.msra.mxu0 %v6285_v43 }
 0xa0e   :  { %5705 = vmatprep.subr.bf16.mxu0 %v6329_v6  ;;  %5720 = vmatpush3.bf16.msra.mxu1 %v6291_v51 }
 0xa0f   :  { %5721 = vmatprep.subr.bf16.mxu1 %v6329_v6 }
 0xa11   :  { %5706 = vmatpush3.bf16.msra.mxu0 %v6286_v44 }
 0xa12   :  { %5707 = vmatprep.subr.bf16.mxu0 %v6329_v6  ;;  %5722 = vmatpush3.bf16.msra.mxu1 %v6292_v54 }
 0xa13   :  { %5723 = vmatprep.subr.bf16.mxu1 %v6329_v6 }
 0xa15   :  { %5708 = vmatpush3.bf16.msra.mxu0 %v6287_v45 }
 0xa16   :  { %5709 = vmatprep.subr.bf16.mxu0 %v6329_v6  ;;  %5724 = vmatpush3.bf16.msra.mxu1 %v6293_v55 }
 0xa17   :  { %5725 = vmatprep.subr.bf16.mxu1 %v6329_v6 }
 0xa19   :  { %5710 = vmatpush3.bf16.msra.mxu0 %v6288_v46 }
 0xa1a   :  { %5735 = vmatprep.subr.bf16.mxu0 %v6329_v6  ;;  %5726 = vmatpush3.bf16.msra.mxu1 %v6294_v50 }
 0xa1b   :  { %5727 = vmatprep.subr.bf16.mxu1 %v6329_v6 }
 0xa1e   :  { %5728 = vmatpush3.bf16.msra.mxu1 %v6295_v7 }
 0xa1f   :  { %5729 = vmatprep.subr.bf16.mxu1 %v6329_v6 }
 0xa22   :  { %5730 = vmatpush3.bf16.msra.mxu1 %v4488_v9 }
 0xad3   :  { %v4077_v53 = vpop.f32.mrb[84].mxu0 }
 0xad4   :  { %v4083_v58 = vadd.f32 %v4077_v53, %v3918_v30  ;;  %v5671_v59 = vpop.f32.mrb[85].mxu0 }
 0xad5   :  { %v4080_v60 = vpop.f32.mrb[86].mxu0 }
 0xad6   :  { %v5672_v57 = vpop.f32.mrb[87].mxu0 }
 0xad7   :  { %v4238_v61 = vpop.f32.mrb[136].mxu1 }
 0xad8   :  { %v4244_v62 = vadd.f32 %v4238_v61, %v4083_v58  ;;  %v5692_v63 = vpop.f32.mrb[137].mxu1 }
 0xad9   :  { %v4241_v0 = vpop.f32.mrb[138].mxu1 }
 0xada   :  { %v5693_v1 = vpop.f32.mrb[139].mxu1 }
 0xadb   :  { %v4316_v2 = vpop.f32.mrb[88].mxu0 }
 0xadc   :  { %v4331_v4 = vpack.c.bf16 %v4316_v2, %v4316_v2  ;;  %v5700_v5 = vpop.f32.mrb[89].mxu0 }
 0xade   :  { %5712 = vmatmul.mubr.msk.bf16.vlgmr.msra.gmra.mrb[92].mxu0 %vm3806_vm15, %v4331_v4 }
 0xadf   :  { %5747 = vmatprep.mubr.msk.bf16.mxu0 %vm6328_vm0, %v6329_v6  ;;  %5736 = vmatpush3.bf16.msra.mxu0 %v6297_v10  ;;  %vm4483_vm0 = vcmask 982016  }
 0xae0   :  { %5737 = vmatprep.subr.bf16.mxu0 %v6329_v6 }
 0xae3   :  { %5738 = vmatpush3.bf16.msra.mxu0 %v6298_v11 }
 0xae4   :  { %5739 = vmatprep.subr.bf16.mxu0 %v6329_v6 }
 0xae7   :  { %5740 = vmatpush3.bf16.msra.mxu0 %v6299_v12 }
 0xae8   :  { %5741 = vmatprep.subr.bf16.mxu0 %v6329_v6 }
 0xaeb   :  { %5742 = vmatpush3.bf16.msra.mxu0 %v6300_v13 }
 0xaec   :  { %5743 = vmatprep.subr.bf16.mxu0 %v6329_v6 }
 0xaef   :  { %5744 = vmatpush3.bf16.msra.mxu0 %v6301_v23 }
 0xaf0   :  { %5745 = vmatprep.subr.bf16.mxu0 %v6329_v6  ;;  %v5161_v6 = vld [vmem:[%s8015_s17] ss:$0 sm:$0xff] }
 0xaf3   :  { %5746 = vmatpush3.bf16.msra.mxu0 %v4591_v52 }
 0xbb1   :  { %v4399_v14 = vpop.f32.mrb[92].mxu0 }
 0xbb2   :  { %v4405_v16 = vadd.f32 %v4399_v14, %v4244_v62  ;;  %v5713_v17 = vpop.f32.mrb[93].mxu0 }
 0xbb3   :  { %v4402_v18 = vpop.f32.mrb[94].mxu0 }
 0xbb4   :  { %v4413_v19 = vadd.f32 %v5150_v15, %v4405_v16  ;;  %v5714_v20 = vpop.f32.mrb[95].mxu0 }
 0xbb6   :  { %v4414_v21 = vmax.f32 %v4413_v19, 0.0 }
 0xbb8   :  { %v4430_v22 = vpack.c.bf16 %v4414_v21, %v4414_v21 }
 0xbba   :  { %5732 = vmatmul.mubr.msk.bf16.vlgmr.msra.gmra.mrb[140].mxu1 %vm4483_vm0, %v4430_v22 }
 0xc8d   :  { %v4524_v48 = vpop.f32.mrb[140].mxu1 }
 0xc8e   :  { %v4525_v56 = vadd.f32 %v5151_v28, %v4524_v48  ;;  %v5733_v29 = vpop.f32.mrb[141].mxu1 }
 0xc8f   :  { %v4527_v30 = vpop.f32.mrb[142].mxu1 }
 0xc90   :  { %v4530_v31 = vmax.f32 %v4525_v56, 0.0  ;;  %v5734_v3 = vpop.f32.mrb[143].mxu1 }
 0xc92   :  { %v4542_v32 = vpack.c.bf16 %v4530_v31, %v4530_v31 }
 0xc94   :  { %5748 = vmatmul.mubr.msk.bf16.vlgmr.msra.gmra.mrb[96].mxu0 %vm4583_vm2, %v4542_v32 }
 0xd67   :  { %v4627_v33 = vpop.f32.mrb[96].mxu0 }
 0xd68   :  { %v4628_v34 = vadd.f32 %v5161_v6, %v4627_v33  ;;  %v5749_v35 = vpop.f32.mrb[97].mxu0 }
 0xd69   :  { %v4630_v36 = vpop.f32.mrb[98].mxu0 }
 0xd6a   :  { %v5750_v37 = vpop.f32.mrb[99].mxu0  ;;  %4634 = vst.msk [vmem:[#allocation2] sm:$0x3] %vm4633_vm3, %v4628_v34 }
 0xd6b   :  { %6314 = shalt.err (!%p6311_p4)
}
 0xd6c   :  { %s6315_s17 = scalar_lea.hbm %s8016_s18, 32 }
 0xd6d   :  { %p6316_p5 = scmp.ne.s32.totalorder %s8016_s18, %s6315_s17  ;;  %p6319_p6 = scmp.lt.u32.totalorder %s6315_s17, %s8016_s18 }
 0xd6f   :  { %p6321_p7 = pnand %p6319_p6, %p6316_p5 }
 0xd71   :  { %6324 = shalt.err (!%p6321_p7)
}
 0xd72   :  { %4644 = dma.vmem_to_hbm [thread:$0]  %s4642_s4, 32, %s8016_s18, [#allocation3]  }
 0xd73   :  { %6325 = dma.done.wait [#allocation3], 32  }
 0xd74   :  { %6326 = vsyncadd [#allocation3], 4294967264 }
 0xd75   :  { %4648 = vsyncpa [#allocation3], 1 }

</bundles_post_ra>
